<compile_context>
chip_gen: v7x
topology: tpu7x:2x2x1
jax: 0.10.0
libtpu: 0.0.40
codegen_flags: <defaults>
</compile_context>

<pallas_src>
import jax
import jax.numpy as jnp
from jax import lax
from jax.experimental import pallas as pl
from jax.experimental.pallas import tpu as pltpu


_T = 8    # rows per sample everywhere in the kernel == LSTM sequence length
_H = 64   # LSTM hidden size (repair: reference nn.LSTM omits hidden_size)


# ------------------------------ fused kernel -------------------------------- #

def _con_lstm_kernel(xw_ref, w1_ref, b1_ref, w2_ref, b2_ref, w3_ref, b3_ref,
                     wih1_ref, whh1_ref, bl1_ref, wih2_ref, whh2_ref, bl2_ref,
                     wout_ref, bout_ref, o_ref, h1_tm):
    bf16 = jnp.bfloat16
    bt = xw_ref.shape[0]

    def mm(x3, w):
        """(bt, 8, K) x (K, N) -> (bt, 8, N) as one 2-D MXU matmul, f32 accum."""
        b_, r_, k_ = x3.shape
        y = jnp.dot(x3.reshape(b_ * r_, k_), w, preferred_element_type=jnp.float32)
        return y.reshape(b_, r_, w.shape[1])

    def shift_rows(x, offset):
        """y[:, r, :] = x[:, r + offset, :]; rows outside [0, 8) read as zero."""
        rolled = pltpu.roll(x, (-offset) % _T, 1)            # XLU sublane rotate
        rows = lax.broadcasted_iota(jnp.int32, x.shape, 1)
        ok = jnp.logical_and(rows + offset >= 0, rows + offset < _T)
        return jnp.where(ok, rolled, jnp.zeros_like(rolled))

    # --- conv1 (1->32, K=8, stride 2, SAME) + ReLU + MaxPool(2,2) ---------------
    # operand row t = x_pad[64t : 64t+70]; output row t holds 32 conv positions
    # laid out (even half | odd half) along lanes, so pool1 is a lane-half max.
    c1 = jnp.maximum(mm(xw_ref[...], w1_ref[...]) + b1_ref[...], 0.0)   # (bt,8,1024)
    pool1 = jnp.maximum(c1[:, :, 0:512], c1[:, :, 512:1024])            # (bt,8,512)

    # --- conv2 (32->32, K=4, stride 2, SAME) + ReLU + MaxPool(2,2) --------------
    prev1 = shift_rows(pool1[:, :, 480:512], -1)          # pool1[16t-1]  halo
    next1 = shift_rows(pool1[:, :, 0:32], 1)              # pool1[16t+16] halo
    op2 = jnp.concatenate([prev1, pool1, next1], axis=-1).astype(bf16)  # (bt,8,576)
    c2 = jnp.maximum(mm(op2, w2_ref[...]) + b2_ref[...], 0.0)           # (bt,8,256)
    p2 = jnp.maximum(c2[:, :, 0:128], c2[:, :, 128:256])                # (bt,8,128)

    # --- conv3 (32->32, K=4, stride 1, SAME) + ReLU -----------------------------
    prev2 = shift_rows(p2[:, :, 96:128], -1)              # p2[4t-1]       halo
    next2 = shift_rows(p2[:, :, 0:64], 1)                 # p2[4t+4..4t+5] halo
    op3 = jnp.concatenate([prev2, p2, next2], axis=-1).astype(bf16)     # (bt,8,224)
    xl = jnp.maximum(mm(op3, w3_ref[...]) + b3_ref[...], 0.0)           # (bt,8,128)
    # row t of xl == [pos 4t | 4t+1 | 4t+2 | 4t+3] x 32 ch: the LSTM 128-d input.

    def lstm_steps(xproj_at, whh, emit):
        h = jnp.zeros((bt, _H), jnp.float32)
        c = jnp.zeros((bt, _H), jnp.float32)
        for t in range(_T):
            g = xproj_at(t) + jnp.dot(h.astype(bf16), whh,
                                      preferred_element_type=jnp.float32)
            i_f = jax.nn.sigmoid(g[:, 0:2 * _H])          # i and f gates only
            g_g = jnp.tanh(g[:, 2 * _H:3 * _H])           # cell candidate only
            o_g = jax.nn.sigmoid(g[:, 3 * _H:4 * _H])
            c = i_f[:, _H:2 * _H] * c + i_f[:, 0:_H] * g_g
            h = o_g * jnp.tanh(c)
            emit(t, h)

    # --- LSTM1 (input projection hoisted out of the recurrence) -----------------
    xproj1 = mm(xl.astype(bf16), wih1_ref[...]) + bl1_ref[...]          # (bt,8,256)
    whh1 = whh1_ref[...]

    def emit1(t, h):
        h1_tm[t] = h.astype(bf16)                         # aligned time-major slab

    lstm_steps(lambda t: xproj1[:, t, :], whh1, emit1)
    # TODO(synk): F.dropout on the nn.LSTM output tuple is invalid in the
    # reference; both dropouts are treated as inference-mode identity.

    # --- LSTM2 + Linear(64,1) + sigmoid head ------------------------------------
    h1_all = h1_tm[...]                                   # (8, bt, 64) bf16
    xp2 = jnp.dot(h1_all.reshape(_T * bt, _H), wih2_ref[...],
                  preferred_element_type=jnp.float32) + bl2_ref[...]
    xp2 = xp2.reshape(_T, bt, 4 * _H)
    whh2 = whh2_ref[...]
    wout = wout_ref[...]                                  # (1, 64)
    zs = [None] * _T

    def emit2(t, h):
        zs[t] = jnp.sum(h * wout, axis=-1, keepdims=True)   # (bt, 1)

    lstm_steps(lambda t: xp2[t], whh2, emit2)

    logits = jnp.concatenate(zs, axis=-1) + bout_ref[...]   # (bt, 8)
    o_ref[...] = jax.nn.sigmoid(logits)


def _run_fused(xw, pk, *, block_b):
    bp = xw.shape[0]
    grid = (bp // block_b,)

    def full(arr):
        return pl.BlockSpec(arr.shape, lambda i: (0,) * arr.ndim)

    return pl.pallas_call(
        _con_lstm_kernel,
        out_shape=jax.ShapeDtypeStruct((bp, _T), jnp.float32),
        grid=grid,
        in_specs=[pl.BlockSpec((block_b, _T, 70), lambda i: (i, 0, 0)),
                  full(pk["w1f"]), full(pk["b1"]),
                  full(pk["w2f"]), full(pk["b2"]),
                  full(pk["w3f"]), full(pk["b3"]),
                  full(pk["wih1"]), full(pk["whh1"]), full(pk["bl1"]),
                  full(pk["wih2"]), full(pk["whh2"]), full(pk["bl2"]),
                  full(pk["wout"]), full(pk["bout"])],
        out_specs=pl.BlockSpec((block_b, _T), lambda i: (i, 0)),
        scratch_shapes=[pltpu.VMEM((_T, block_b, _H), jnp.bfloat16)],
        compiler_params=pltpu.CompilerParams(
            dimension_semantics=("parallel",),
            vmem_limit_bytes=64 * 1024 * 1024),
    )(xw, pk["w1f"], pk["b1"], pk["w2f"], pk["b2"], pk["w3f"], pk["b3"],
      pk["wih1"], pk["whh1"], pk["bl1"], pk["wih2"], pk["whh2"], pk["bl2"],
      pk["wout"], pk["bout"])


# ------------------------------- weight packing ----------------------------- #

def _even_odd(n):
    return list(range(0, n, 2)) + list(range(1, n, 2))


def _banded(stack, n_rows, starts):
    """Block-banded matrix: one padded copy of `stack` per output block column."""
    cols = [jnp.pad(stack, ((r0, n_rows - r0 - stack.shape[0]), (0, 0)))
            for r0 in starts]
    return jnp.concatenate(cols, axis=1)


def _pack_params(p):
    f32, bf16 = jnp.float32, jnp.bfloat16

    # conv1: output lane block o = conv1 position 32t + s, s = 2o (o<16, even half)
    # or 2(o-16)+1 (odd half); position 32t+s reads operand rows 2s..2s+7 (taps 0..7).
    w1t = p["conv1_w"].reshape(32, 8).T.astype(f32)                  # (tap, out_ch)
    w1f = _banded(w1t, 70, [2 * s for s in _even_odd(32)]).astype(bf16)      # (70,1024)
    b1 = jnp.tile(p["conv1_b"], 32).reshape(1, 1024).astype(f32)

    # conv2: operand row t = [pool1[16t-1] | pool1[16t..16t+15] | pool1[16t+16]];
    # output block o = y2 position 8t + s (even|odd order); y2[8t+s] reads operand
    # blocks 2s..2s+3 with taps 0..3 -> stacked taps start at row 64*s.
    w2stack = jnp.concatenate([p["conv2_w"][:, :, k].T for k in range(4)],
                              axis=0).astype(f32)                    # (128, 32)
    w2f = _banded(w2stack, 576, [64 * s for s in _even_odd(8)]).astype(bf16)  # (576,256)
    b2 = jnp.tile(p["conv2_b"], 8).reshape(1, 256).astype(f32)

    # conv3: operand row t = [p2[4t-1] | p2[4t..4t+3] | p2[4t+4] | p2[4t+5]];
    # output block s = conv3 position 4t+s, reading operand blocks s..s+3 (taps 0..3).
    w3stack = jnp.concatenate([p["conv3_w"][:, :, k].T for k in range(4)],
                              axis=0).astype(f32)                    # (128, 32)
    w3f = _banded(w3stack, 224, [32 * s for s in range(4)]).astype(bf16)      # (224,128)
    b3 = jnp.tile(p["conv3_b"], 4).reshape(1, 128).astype(f32)

    return {
        "w1f": w1f, "b1": b1, "w2f": w2f, "b2": b2, "w3f": w3f, "b3": b3,
        "wih1": p["lstm1_wih"].T.astype(bf16),
        "whh1": p["lstm1_whh"].T.astype(bf16),
        "bl1": (p["lstm1_bih"] + p["lstm1_bhh"]).reshape(1, -1).astype(f32),
        "wih2": p["lstm2_wih"].T.astype(bf16),
        "whh2": p["lstm2_whh"].T.astype(bf16),
        "bl2": (p["lstm2_bih"] + p["lstm2_bhh"]).reshape(1, -1).astype(f32),
        "wout": p["out_w"].reshape(1, -1).astype(f32),
        "bout": p["out_b"].reshape(1, 1).astype(f32),
    }


def init_params(key, num_of_drugs=16, emb_size=256, hidden=_H):
    ks = jax.random.split(key, 16)

    def norm(k, shape, scale=0.05):
        return (scale * jax.random.normal(k, shape)).astype(jnp.float32)

    return {
        "emb": norm(ks[0], (num_of_drugs, emb_size), 1.0),
        "conv1_w": norm(ks[1], (32, 1, 8)),
        "conv1_b": norm(ks[2], (32,)),
        "conv2_w": norm(ks[3], (32, 32, 4)),
        "conv2_b": norm(ks[4], (32,)),
        "conv3_w": norm(ks[5], (32, 32, 4)),
        "conv3_b": norm(ks[6], (32,)),
        # TODO(synk): nn.LSTM(input_size=128) omits hidden_size in the reference;
        # hidden_size=64 chosen so LSTM2(input_size=64) and Linear(64,1) are consistent.
        "lstm1_wih": norm(ks[7], (4 * hidden, 128)),
        "lstm1_whh": norm(ks[8], (4 * hidden, hidden)),
        "lstm1_bih": norm(ks[9], (4 * hidden,)),
        "lstm1_bhh": norm(ks[10], (4 * hidden,)),
        "lstm2_wih": norm(ks[11], (4 * hidden, hidden)),
        "lstm2_whh": norm(ks[12], (4 * hidden, hidden)),
        "lstm2_bih": norm(ks[13], (4 * hidden,)),
        "lstm2_bhh": norm(ks[14], (4 * hidden,)),
        "out_w": norm(ks[15], (1, hidden)),
        "out_b": jnp.zeros((1,), jnp.float32),
    }


def _batch_block(batch):
    # Big batch blocks (tall M on every matmul, few grid steps); keep >=2 blocks
    # when possible so dimension_semantics=("parallel",) can shard across v7x's
    # two TensorCores.  Per-block VMEM footprint at 128 is well under the limit.
    if batch <= 128:
        return batch, batch
    padded = ((batch + 127) // 128) * 128
    return 128, padded


def con_lstm_forward(params, a, b):
    """a, b: int32 drug-id vectors of shape (batch,)."""
    pk = _pack_params(params)

    ea = params["emb"][a]                                 # (B, 256)  (XLA gather)
    eb = params["emb"][b]
    x = jnp.concatenate([ea, eb], axis=1)                 # (B, 512)  torch.cat(..., 1)
    batch = x.shape[0]

    # TODO(synk): PyTorch rejects padding='same' with stride>1; TF-SAME semantics
    # are used (lpad=3 for conv1).  Overlapping 70-wide windows (one per kernel
    # row) are built host-side so the kernel is pure matmul/VPU work.
    x_pad = jnp.pad(x, ((0, 0), (3, 3)))                  # (B, 518)
    xw = jnp.stack([x_pad[:, 64 * t:64 * t + 70] for t in range(_T)],
                   axis=1).astype(jnp.bfloat16)           # (B, 8, 70)

    block_b, padded = _batch_block(batch)
    if padded != batch:
        xw = jnp.pad(xw, ((0, padded - batch), (0, 0), (0, 0)))

    y = _run_fused(xw, pk, block_b=block_b)[:batch]       # (B, 8)
    # TODO(synk): MaxPool1d(padding='same') == VALID here since lengths are even.
    # TODO(synk): reference feeds the 32-channel conv map into nn.LSTM(input_size=128)
    # with inconsistent shapes; 4 consecutive positions x 32 channels are grouped
    # into one 128-d feature per step (seq len 8).
    # TODO(synk): torch.flatten followed by Linear(64,1) is shape-invalid in the
    # reference; linear+sigmoid is applied per (timestep, batch) row instead.
    return y.T.reshape(-1)                                # (8*B,), t-major


if __name__ == "__main__":
    key = jax.random.PRNGKey(0)
    k_param, k_a, k_b = jax.random.split(key, 3)

    num_of_drugs = 16
    batch = 2
    params = init_params(k_param, num_of_drugs=num_of_drugs, emb_size=256)
    a = jax.random.randint(k_a, (batch,), 0, num_of_drugs, dtype=jnp.int32)
    b = jax.random.randint(k_b, (batch,), 0, num_of_drugs, dtype=jnp.int32)

    out = jax.jit(con_lstm_forward)(params, a, b)
    jax.block_until_ready(out)
    assert out.shape == (8 * batch,)
    assert bool(jnp.all(jnp.isfinite(out)))
    print("KERNEL_OK")
</pallas_src>

<mosaic_0001>
module attributes {stable_mosaic.version = 11 : i64} {
  func.func @_con_lstm_kernel(%arg0: i32, %arg1: memref<2x8x70xbf16, #tpu.memory_space<vmem>>, %arg2: memref<70x1024xbf16, #tpu.memory_space<vmem>>, %arg3: memref<1x1024xf32, #tpu.memory_space<vmem>>, %arg4: memref<576x256xbf16, #tpu.memory_space<vmem>>, %arg5: memref<1x256xf32, #tpu.memory_space<vmem>>, %arg6: memref<224x128xbf16, #tpu.memory_space<vmem>>, %arg7: memref<1x128xf32, #tpu.memory_space<vmem>>, %arg8: memref<128x256xbf16, #tpu.memory_space<vmem>>, %arg9: memref<64x256xbf16, #tpu.memory_space<vmem>>, %arg10: memref<1x256xf32, #tpu.memory_space<vmem>>, %arg11: memref<64x256xbf16, #tpu.memory_space<vmem>>, %arg12: memref<64x256xbf16, #tpu.memory_space<vmem>>, %arg13: memref<1x256xf32, #tpu.memory_space<vmem>>, %arg14: memref<1x64xf32, #tpu.memory_space<vmem>>, %arg15: memref<1x1xf32, #tpu.memory_space<vmem>>, %arg16: memref<2x8xf32, #tpu.memory_space<vmem>>, %arg17: memref<8x2x64xbf16, #tpu.memory_space<vmem>>) attributes {dimension_semantics = [#tpu.dimension_semantics<parallel>], iteration_bounds = array<i64: 1>, scalar_prefetch = 0 : i64, scratch_operands = 1 : i64, tpu.core_type = #tpu.core_type<tc>, window_params = [{transform_indices = @transform_0, window_bounds = array<i64: 2, 8, 70>}, {pipeline_mode = #tpu.pipeline_mode<synchronous>, transform_indices = @transform_1, window_bounds = array<i64: 70, 1024>}, {pipeline_mode = #tpu.pipeline_mode<synchronous>, transform_indices = @transform_2, window_bounds = array<i64: 1, 1024>}, {pipeline_mode = #tpu.pipeline_mode<synchronous>, transform_indices = @transform_3, window_bounds = array<i64: 576, 256>}, {pipeline_mode = #tpu.pipeline_mode<synchronous>, transform_indices = @transform_4, window_bounds = array<i64: 1, 256>}, {pipeline_mode = #tpu.pipeline_mode<synchronous>, transform_indices = @transform_5, window_bounds = array<i64: 224, 128>}, {pipeline_mode = #tpu.pipeline_mode<synchronous>, transform_indices = @transform_6, window_bounds = array<i64: 1, 128>}, {pipeline_mode = #tpu.pipeline_mode<synchronous>, transform_indices = @transform_7, window_bounds = array<i64: 128, 256>}, {pipeline_mode = #tpu.pipeline_mode<synchronous>, transform_indices = @transform_8, window_bounds = array<i64: 64, 256>}, {pipeline_mode = #tpu.pipeline_mode<synchronous>, transform_indices = @transform_9, window_bounds = array<i64: 1, 256>}, {pipeline_mode = #tpu.pipeline_mode<synchronous>, transform_indices = @transform_10, window_bounds = array<i64: 64, 256>}, {pipeline_mode = #tpu.pipeline_mode<synchronous>, transform_indices = @transform_11, window_bounds = array<i64: 64, 256>}, {pipeline_mode = #tpu.pipeline_mode<synchronous>, transform_indices = @transform_12, window_bounds = array<i64: 1, 256>}, {pipeline_mode = #tpu.pipeline_mode<synchronous>, transform_indices = @transform_13, window_bounds = array<i64: 1, 64>}, {pipeline_mode = #tpu.pipeline_mode<synchronous>, transform_indices = @transform_14, window_bounds = array<i64: 1, 1>}, {transform_indices = @transform_15, window_bounds = array<i64: 2, 8>}]} {
    %c0 = arith.constant 0 : index
    %c0_0 = arith.constant 0 : index
    %c0_1 = arith.constant 0 : index
    %0 = vector.load %arg1[%c0, %c0_0, %c0_1] : memref<2x8x70xbf16, #tpu.memory_space<vmem>>, vector<2x8x70xbf16>
    %c0_2 = arith.constant 0 : index
    %c0_3 = arith.constant 0 : index
    %1 = vector.load %arg2[%c0_2, %c0_3] : memref<70x1024xbf16, #tpu.memory_space<vmem>>, vector<70x1024xbf16>
    %2 = vector.shape_cast %0 : vector<2x8x70xbf16> to vector<16x70xbf16>
    %cst = arith.constant dense<0.000000e+00> : vector<16x1024xf32>
    %3 = tpu.matmul %2, %1, %cst {dimension_numbers = #tpu.dot_dimension_numbers<[1], [0], [0], [1], [0, 0, 1, 1], [], []>} : vector<16x70xbf16>, vector<70x1024xbf16>, vector<16x1024xf32> -> vector<16x1024xf32>
    %4 = vector.shape_cast %3 : vector<16x1024xf32> to vector<2x8x1024xf32>
    %c0_4 = arith.constant 0 : index
    %c0_5 = arith.constant 0 : index
    %5 = vector.load %arg3[%c0_4, %c0_5] : memref<1x1024xf32, #tpu.memory_space<vmem>>, vector<1x1024xf32>
    %6 = vector.shape_cast %5 : vector<1x1024xf32> to vector<1x1x1024xf32>
    %7 = vector.broadcast %6 : vector<1x1x1024xf32> to vector<2x8x1024xf32>
    %8 = arith.addf %4, %7 : vector<2x8x1024xf32>
    %cst_6 = arith.constant 0.000000e+00 : f32
    %9 = vector.broadcast %cst_6 : f32 to vector<2x8x1024xf32>
    %10 = arith.maximumf %8, %9 : vector<2x8x1024xf32>
    %11 = vector.extract_strided_slice %10 {offsets = [0, 0, 0], sizes = [2, 8, 512], strides = [1, 1, 1]} : vector<2x8x1024xf32> to vector<2x8x512xf32>
    %12 = vector.extract_strided_slice %10 {offsets = [0, 0, 512], sizes = [2, 8, 512], strides = [1, 1, 1]} : vector<2x8x1024xf32> to vector<2x8x512xf32>
    %13 = arith.maximumf %11, %12 : vector<2x8x512xf32>
    %14 = vector.extract_strided_slice %13 {offsets = [0, 0, 480], sizes = [2, 8, 32], strides = [1, 1, 1]} : vector<2x8x512xf32> to vector<2x8x32xf32>
    %c1_i32 = arith.constant 1 : i32
    %15 = tpu.dynamic_rotate %14 by %c1_i32 dim 1 : vector<2x8x32xf32>, i32 -> vector<2x8x32xf32>
    %16 = tpu.iota {dimensions = array<i32: 1>} : vector<2x8x32xi32>
    %c-1_i32 = arith.constant -1 : i32
    %17 = vector.broadcast %c-1_i32 : i32 to vector<2x8x32xi32>
    %18 = arith.addi %16, %17 : vector<2x8x32xi32>
    %c0_i32 = arith.constant 0 : i32
    %19 = vector.broadcast %c0_i32 : i32 to vector<2x8x32xi32>
    %20 = arith.cmpi sge, %18, %19 : vector<2x8x32xi32>
    %c-1_i32_7 = arith.constant -1 : i32
    %21 = vector.broadcast %c-1_i32_7 : i32 to vector<2x8x32xi32>
    %22 = arith.addi %16, %21 : vector<2x8x32xi32>
    %c8_i32 = arith.constant 8 : i32
    %23 = vector.broadcast %c8_i32 : i32 to vector<2x8x32xi32>
    %24 = arith.cmpi slt, %22, %23 : vector<2x8x32xi32>
    %25 = arith.andi %20, %24 : vector<2x8x32xi1>
    %cst_8 = arith.constant 0.000000e+00 : f32
    %26 = vector.broadcast %cst_8 : f32 to vector<2x8x32xf32>
    %27 = arith.select %25, %15, %26 : vector<2x8x32xi1>, vector<2x8x32xf32>
    %28 = vector.extract_strided_slice %13 {offsets = [0, 0, 0], sizes = [2, 8, 32], strides = [1, 1, 1]} : vector<2x8x512xf32> to vector<2x8x32xf32>
    %c7_i32 = arith.constant 7 : i32
    %29 = tpu.dynamic_rotate %28 by %c7_i32 dim 1 : vector<2x8x32xf32>, i32 -> vector<2x8x32xf32>
    %30 = tpu.iota {dimensions = array<i32: 1>} : vector<2x8x32xi32>
    %c1_i32_9 = arith.constant 1 : i32
    %31 = vector.broadcast %c1_i32_9 : i32 to vector<2x8x32xi32>
    %32 = arith.addi %30, %31 : vector<2x8x32xi32>
    %c0_i32_10 = arith.constant 0 : i32
    %33 = vector.broadcast %c0_i32_10 : i32 to vector<2x8x32xi32>
    %34 = arith.cmpi sge, %32, %33 : vector<2x8x32xi32>
    %c1_i32_11 = arith.constant 1 : i32
    %35 = vector.broadcast %c1_i32_11 : i32 to vector<2x8x32xi32>
    %36 = arith.addi %30, %35 : vector<2x8x32xi32>
    %c8_i32_12 = arith.constant 8 : i32
    %37 = vector.broadcast %c8_i32_12 : i32 to vector<2x8x32xi32>
    %38 = arith.cmpi slt, %36, %37 : vector<2x8x32xi32>
    %39 = arith.andi %34, %38 : vector<2x8x32xi1>
    %cst_13 = arith.constant 0.000000e+00 : f32
    %40 = vector.broadcast %cst_13 : f32 to vector<2x8x32xf32>
    %41 = arith.select %39, %29, %40 : vector<2x8x32xi1>, vector<2x8x32xf32>
    %42 = tpu.concatenate %27, %13, %41 in 2 : vector<2x8x32xf32>, vector<2x8x512xf32>, vector<2x8x32xf32> -> vector<2x8x576xf32>
    %43 = arith.truncf %42 : vector<2x8x576xf32> to vector<2x8x576xbf16>
    %c0_14 = arith.constant 0 : index
    %c0_15 = arith.constant 0 : index
    %44 = vector.load %arg4[%c0_14, %c0_15] : memref<576x256xbf16, #tpu.memory_space<vmem>>, vector<576x256xbf16>
    %45 = vector.shape_cast %43 : vector<2x8x576xbf16> to vector<16x576xbf16>
    %cst_16 = arith.constant dense<0.000000e+00> : vector<16x256xf32>
    %46 = tpu.matmul %45, %44, %cst_16 {dimension_numbers = #tpu.dot_dimension_numbers<[1], [0], [0], [1], [0, 0, 1, 1], [], []>} : vector<16x576xbf16>, vector<576x256xbf16>, vector<16x256xf32> -> vector<16x256xf32>
    %47 = vector.shape_cast %46 : vector<16x256xf32> to vector<2x8x256xf32>
    %c0_17 = arith.constant 0 : index
    %c0_18 = arith.constant 0 : index
    %48 = vector.load %arg5[%c0_17, %c0_18] : memref<1x256xf32, #tpu.memory_space<vmem>>, vector<1x256xf32>
    %49 = vector.shape_cast %48 : vector<1x256xf32> to vector<1x1x256xf32>
    %50 = vector.broadcast %49 : vector<1x1x256xf32> to vector<2x8x256xf32>
    %51 = arith.addf %47, %50 : vector<2x8x256xf32>
    %cst_19 = arith.constant 0.000000e+00 : f32
    %52 = vector.broadcast %cst_19 : f32 to vector<2x8x256xf32>
    %53 = arith.maximumf %51, %52 : vector<2x8x256xf32>
    %54 = vector.extract_strided_slice %53 {offsets = [0, 0, 0], sizes = [2, 8, 128], strides = [1, 1, 1]} : vector<2x8x256xf32> to vector<2x8x128xf32>
    %55 = vector.extract_strided_slice %53 {offsets = [0, 0, 128], sizes = [2, 8, 128], strides = [1, 1, 1]} : vector<2x8x256xf32> to vector<2x8x128xf32>
    %56 = arith.maximumf %54, %55 : vector<2x8x128xf32>
    %57 = vector.extract_strided_slice %56 {offsets = [0, 0, 96], sizes = [2, 8, 32], strides = [1, 1, 1]} : vector<2x8x128xf32> to vector<2x8x32xf32>
    %c1_i32_20 = arith.constant 1 : i32
    %58 = tpu.dynamic_rotate %57 by %c1_i32_20 dim 1 : vector<2x8x32xf32>, i32 -> vector<2x8x32xf32>
    %59 = tpu.iota {dimensions = array<i32: 1>} : vector<2x8x32xi32>
    %c-1_i32_21 = arith.constant -1 : i32
    %60 = vector.broadcast %c-1_i32_21 : i32 to vector<2x8x32xi32>
    %61 = arith.addi %59, %60 : vector<2x8x32xi32>
    %c0_i32_22 = arith.constant 0 : i32
    %62 = vector.broadcast %c0_i32_22 : i32 to vector<2x8x32xi32>
    %63 = arith.cmpi sge, %61, %62 : vector<2x8x32xi32>
    %c-1_i32_23 = arith.constant -1 : i32
    %64 = vector.broadcast %c-1_i32_23 : i32 to vector<2x8x32xi32>
    %65 = arith.addi %59, %64 : vector<2x8x32xi32>
    %c8_i32_24 = arith.constant 8 : i32
    %66 = vector.broadcast %c8_i32_24 : i32 to vector<2x8x32xi32>
    %67 = arith.cmpi slt, %65, %66 : vector<2x8x32xi32>
    %68 = arith.andi %63, %67 : vector<2x8x32xi1>
    %cst_25 = arith.constant 0.000000e+00 : f32
    %69 = vector.broadcast %cst_25 : f32 to vector<2x8x32xf32>
    %70 = arith.select %68, %58, %69 : vector<2x8x32xi1>, vector<2x8x32xf32>
    %71 = vector.extract_strided_slice %56 {offsets = [0, 0, 0], sizes = [2, 8, 64], strides = [1, 1, 1]} : vector<2x8x128xf32> to vector<2x8x64xf32>
    %c7_i32_26 = arith.constant 7 : i32
    %72 = tpu.dynamic_rotate %71 by %c7_i32_26 dim 1 : vector<2x8x64xf32>, i32 -> vector<2x8x64xf32>
    %73 = tpu.iota {dimensions = array<i32: 1>} : vector<2x8x64xi32>
    %c1_i32_27 = arith.constant 1 : i32
    %74 = vector.broadcast %c1_i32_27 : i32 to vector<2x8x64xi32>
    %75 = arith.addi %73, %74 : vector<2x8x64xi32>
    %c0_i32_28 = arith.constant 0 : i32
    %76 = vector.broadcast %c0_i32_28 : i32 to vector<2x8x64xi32>
    %77 = arith.cmpi sge, %75, %76 : vector<2x8x64xi32>
    %c1_i32_29 = arith.constant 1 : i32
    %78 = vector.broadcast %c1_i32_29 : i32 to vector<2x8x64xi32>
    %79 = arith.addi %73, %78 : vector<2x8x64xi32>
    %c8_i32_30 = arith.constant 8 : i32
    %80 = vector.broadcast %c8_i32_30 : i32 to vector<2x8x64xi32>
    %81 = arith.cmpi slt, %79, %80 : vector<2x8x64xi32>
    %82 = arith.andi %77, %81 : vector<2x8x64xi1>
    %cst_31 = arith.constant 0.000000e+00 : f32
    %83 = vector.broadcast %cst_31 : f32 to vector<2x8x64xf32>
    %84 = arith.select %82, %72, %83 : vector<2x8x64xi1>, vector<2x8x64xf32>
    %85 = tpu.concatenate %70, %56, %84 in 2 : vector<2x8x32xf32>, vector<2x8x128xf32>, vector<2x8x64xf32> -> vector<2x8x224xf32>
    %86 = arith.truncf %85 : vector<2x8x224xf32> to vector<2x8x224xbf16>
    %c0_32 = arith.constant 0 : index
    %c0_33 = arith.constant 0 : index
    %87 = vector.load %arg6[%c0_32, %c0_33] : memref<224x128xbf16, #tpu.memory_space<vmem>>, vector<224x128xbf16>
    %88 = vector.shape_cast %86 : vector<2x8x224xbf16> to vector<16x224xbf16>
    %cst_34 = arith.constant dense<0.000000e+00> : vector<16x128xf32>
    %89 = tpu.matmul %88, %87, %cst_34 {dimension_numbers = #tpu.dot_dimension_numbers<[1], [0], [0], [1], [0, 0, 1, 1], [], []>} : vector<16x224xbf16>, vector<224x128xbf16>, vector<16x128xf32> -> vector<16x128xf32>
    %90 = vector.shape_cast %89 : vector<16x128xf32> to vector<2x8x128xf32>
    %c0_35 = arith.constant 0 : index
    %c0_36 = arith.constant 0 : index
    %91 = vector.load %arg7[%c0_35, %c0_36] : memref<1x128xf32, #tpu.memory_space<vmem>>, vector<1x128xf32>
    %92 = vector.shape_cast %91 : vector<1x128xf32> to vector<1x1x128xf32>
    %93 = vector.broadcast %92 : vector<1x1x128xf32> to vector<2x8x128xf32>
    %94 = arith.addf %90, %93 : vector<2x8x128xf32>
    %cst_37 = arith.constant 0.000000e+00 : f32
    %95 = vector.broadcast %cst_37 : f32 to vector<2x8x128xf32>
    %96 = arith.maximumf %94, %95 : vector<2x8x128xf32>
    %97 = arith.truncf %96 : vector<2x8x128xf32> to vector<2x8x128xbf16>
    %c0_38 = arith.constant 0 : index
    %c0_39 = arith.constant 0 : index
    %98 = vector.load %arg8[%c0_38, %c0_39] : memref<128x256xbf16, #tpu.memory_space<vmem>>, vector<128x256xbf16>
    %99 = vector.shape_cast %97 : vector<2x8x128xbf16> to vector<16x128xbf16>
    %cst_40 = arith.constant dense<0.000000e+00> : vector<16x256xf32>
    %100 = tpu.matmul %99, %98, %cst_40 {dimension_numbers = #tpu.dot_dimension_numbers<[1], [0], [0], [1], [0, 0, 1, 1], [], []>} : vector<16x128xbf16>, vector<128x256xbf16>, vector<16x256xf32> -> vector<16x256xf32>
    %101 = vector.shape_cast %100 : vector<16x256xf32> to vector<2x8x256xf32>
    %c0_41 = arith.constant 0 : index
    %c0_42 = arith.constant 0 : index
    %102 = vector.load %arg10[%c0_41, %c0_42] : memref<1x256xf32, #tpu.memory_space<vmem>>, vector<1x256xf32>
    %103 = vector.shape_cast %102 : vector<1x256xf32> to vector<1x1x256xf32>
    %104 = vector.broadcast %103 : vector<1x1x256xf32> to vector<2x8x256xf32>
    %105 = arith.addf %101, %104 : vector<2x8x256xf32>
    %c0_43 = arith.constant 0 : index
    %c0_44 = arith.constant 0 : index
    %106 = vector.load %arg9[%c0_43, %c0_44] : memref<64x256xbf16, #tpu.memory_space<vmem>>, vector<64x256xbf16>
    %cst_45 = arith.constant 0.000000e+00 : f32
    %107 = vector.broadcast %cst_45 : f32 to vector<2x64xf32>
    %cst_46 = arith.constant 0.000000e+00 : f32
    %108 = vector.broadcast %cst_46 : f32 to vector<2x64xf32>
    %109 = vector.extract_strided_slice %105 {offsets = [0, 0, 0], sizes = [2, 1, 256], strides = [1, 1, 1]} : vector<2x8x256xf32> to vector<2x1x256xf32>
    %110 = vector.shape_cast %109 : vector<2x1x256xf32> to vector<2x256xf32>
    %111 = arith.truncf %107 : vector<2x64xf32> to vector<2x64xbf16>
    %cst_47 = arith.constant dense<0.000000e+00> : vector<2x256xf32>
    %112 = tpu.matmul %111, %106, %cst_47 {dimension_numbers = #tpu.dot_dimension_numbers<[1], [0], [0], [1], [0, 0, 1, 1], [], []>} : vector<2x64xbf16>, vector<64x256xbf16>, vector<2x256xf32> -> vector<2x256xf32>
    %113 = arith.addf %110, %112 : vector<2x256xf32>
    %114 = vector.extract_strided_slice %113 {offsets = [0, 0], sizes = [2, 128], strides = [1, 1]} : vector<2x256xf32> to vector<2x128xf32>
    %115 = arith.negf %114 : vector<2x128xf32>
    %116 = math.exp %115 : vector<2x128xf32>
    %cst_48 = arith.constant 1.000000e+00 : f32
    %117 = vector.broadcast %cst_48 : f32 to vector<2x128xf32>
    %118 = arith.addf %117, %116 : vector<2x128xf32>
    %119 = arith.divf %117, %118 : vector<2x128xf32>
    %120 = vector.extract_strided_slice %113 {offsets = [0, 128], sizes = [2, 64], strides = [1, 1]} : vector<2x256xf32> to vector<2x64xf32>
    %121 = math.tanh %120 : vector<2x64xf32>
    %122 = vector.extract_strided_slice %113 {offsets = [0, 192], sizes = [2, 64], strides = [1, 1]} : vector<2x256xf32> to vector<2x64xf32>
    %123 = arith.negf %122 : vector<2x64xf32>
    %124 = math.exp %123 : vector<2x64xf32>
    %cst_49 = arith.constant 1.000000e+00 : f32
    %125 = vector.broadcast %cst_49 : f32 to vector<2x64xf32>
    %126 = arith.addf %125, %124 : vector<2x64xf32>
    %127 = arith.divf %125, %126 : vector<2x64xf32>
    %128 = vector.extract_strided_slice %119 {offsets = [0, 64], sizes = [2, 64], strides = [1, 1]} : vector<2x128xf32> to vector<2x64xf32>
    %129 = arith.mulf %128, %108 : vector<2x64xf32>
    %130 = vector.extract_strided_slice %119 {offsets = [0, 0], sizes = [2, 64], strides = [1, 1]} : vector<2x128xf32> to vector<2x64xf32>
    %131 = arith.mulf %130, %121 : vector<2x64xf32>
    %132 = arith.addf %129, %131 : vector<2x64xf32>
    %133 = math.tanh %132 : vector<2x64xf32>
    %134 = arith.mulf %127, %133 : vector<2x64xf32>
    %135 = arith.truncf %134 : vector<2x64xf32> to vector<2x64xbf16>
    %c0_50 = arith.constant 0 : index
    %c0_51 = arith.constant 0 : index
    %c0_52 = arith.constant 0 : index
    %136 = vector.load %arg17[%c0_50, %c0_51, %c0_52] : memref<8x2x64xbf16, #tpu.memory_space<vmem>>, vector<1x2x64xbf16>
    %137 = vector.shape_cast %136 : vector<1x2x64xbf16> to vector<2x64xbf16>
    %138 = vector.shape_cast %135 : vector<2x64xbf16> to vector<1x2x64xbf16>
    tpu.vector_store %arg17[%c0_50, %c0_51, %c0_52], %138 {strides = array<i32>} : memref<8x2x64xbf16, #tpu.memory_space<vmem>>, vector<1x2x64xbf16>,
    %139 = vector.extract_strided_slice %105 {offsets = [0, 1, 0], sizes = [2, 1, 256], strides = [1, 1, 1]} : vector<2x8x256xf32> to vector<2x1x256xf32>
    %140 = vector.shape_cast %139 : vector<2x1x256xf32> to vector<2x256xf32>
    %141 = arith.truncf %134 : vector<2x64xf32> to vector<2x64xbf16>
    %cst_53 = arith.constant dense<0.000000e+00> : vector<2x256xf32>
    %142 = tpu.matmul %141, %106, %cst_53 {dimension_numbers = #tpu.dot_dimension_numbers<[1], [0], [0], [1], [0, 0, 1, 1], [], []>} : vector<2x64xbf16>, vector<64x256xbf16>, vector<2x256xf32> -> vector<2x256xf32>
    %143 = arith.addf %140, %142 : vector<2x256xf32>
    %144 = vector.extract_strided_slice %143 {offsets = [0, 0], sizes = [2, 128], strides = [1, 1]} : vector<2x256xf32> to vector<2x128xf32>
    %145 = arith.negf %144 : vector<2x128xf32>
    %146 = math.exp %145 : vector<2x128xf32>
    %cst_54 = arith.constant 1.000000e+00 : f32
    %147 = vector.broadcast %cst_54 : f32 to vector<2x128xf32>
    %148 = arith.addf %147, %146 : vector<2x128xf32>
    %149 = arith.divf %147, %148 : vector<2x128xf32>
    %150 = vector.extract_strided_slice %143 {offsets = [0, 128], sizes = [2, 64], strides = [1, 1]} : vector<2x256xf32> to vector<2x64xf32>
    %151 = math.tanh %150 : vector<2x64xf32>
    %152 = vector.extract_strided_slice %143 {offsets = [0, 192], sizes = [2, 64], strides = [1, 1]} : vector<2x256xf32> to vector<2x64xf32>
    %153 = arith.negf %152 : vector<2x64xf32>
    %154 = math.exp %153 : vector<2x64xf32>
    %cst_55 = arith.constant 1.000000e+00 : f32
    %155 = vector.broadcast %cst_55 : f32 to vector<2x64xf32>
    %156 = arith.addf %155, %154 : vector<2x64xf32>
    %157 = arith.divf %155, %156 : vector<2x64xf32>
    %158 = vector.extract_strided_slice %149 {offsets = [0, 64], sizes = [2, 64], strides = [1, 1]} : vector<2x128xf32> to vector<2x64xf32>
    %159 = arith.mulf %158, %132 : vector<2x64xf32>
    %160 = vector.extract_strided_slice %149 {offsets = [0, 0], sizes = [2, 64], strides = [1, 1]} : vector<2x128xf32> to vector<2x64xf32>
    %161 = arith.mulf %160, %151 : vector<2x64xf32>
    %162 = arith.addf %159, %161 : vector<2x64xf32>
    %163 = math.tanh %162 : vector<2x64xf32>
    %164 = arith.mulf %157, %163 : vector<2x64xf32>
    %165 = arith.truncf %164 : vector<2x64xf32> to vector<2x64xbf16>
    %c1 = arith.constant 1 : index
    %c0_56 = arith.constant 0 : index
    %c0_57 = arith.constant 0 : index
    %166 = vector.load %arg17[%c1, %c0_56, %c0_57] : memref<8x2x64xbf16, #tpu.memory_space<vmem>>, vector<1x2x64xbf16>
    %167 = vector.shape_cast %166 : vector<1x2x64xbf16> to vector<2x64xbf16>
    %168 = vector.shape_cast %165 : vector<2x64xbf16> to vector<1x2x64xbf16>
    tpu.vector_store %arg17[%c1, %c0_56, %c0_57], %168 {strides = array<i32>} : memref<8x2x64xbf16, #tpu.memory_space<vmem>>, vector<1x2x64xbf16>,
    %169 = vector.extract_strided_slice %105 {offsets = [0, 2, 0], sizes = [2, 1, 256], strides = [1, 1, 1]} : vector<2x8x256xf32> to vector<2x1x256xf32>
    %170 = vector.shape_cast %169 : vector<2x1x256xf32> to vector<2x256xf32>
    %171 = arith.truncf %164 : vector<2x64xf32> to vector<2x64xbf16>
    %cst_58 = arith.constant dense<0.000000e+00> : vector<2x256xf32>
    %172 = tpu.matmul %171, %106, %cst_58 {dimension_numbers = #tpu.dot_dimension_numbers<[1], [0], [0], [1], [0, 0, 1, 1], [], []>} : vector<2x64xbf16>, vector<64x256xbf16>, vector<2x256xf32> -> vector<2x256xf32>
    %173 = arith.addf %170, %172 : vector<2x256xf32>
    %174 = vector.extract_strided_slice %173 {offsets = [0, 0], sizes = [2, 128], strides = [1, 1]} : vector<2x256xf32> to vector<2x128xf32>
    %175 = arith.negf %174 : vector<2x128xf32>
    %176 = math.exp %175 : vector<2x128xf32>
    %cst_59 = arith.constant 1.000000e+00 : f32
    %177 = vector.broadcast %cst_59 : f32 to vector<2x128xf32>
    %178 = arith.addf %177, %176 : vector<2x128xf32>
    %179 = arith.divf %177, %178 : vector<2x128xf32>
    %180 = vector.extract_strided_slice %173 {offsets = [0, 128], sizes = [2, 64], strides = [1, 1]} : vector<2x256xf32> to vector<2x64xf32>
    %181 = math.tanh %180 : vector<2x64xf32>
    %182 = vector.extract_strided_slice %173 {offsets = [0, 192], sizes = [2, 64], strides = [1, 1]} : vector<2x256xf32> to vector<2x64xf32>
    %183 = arith.negf %182 : vector<2x64xf32>
    %184 = math.exp %183 : vector<2x64xf32>
    %cst_60 = arith.constant 1.000000e+00 : f32
    %185 = vector.broadcast %cst_60 : f32 to vector<2x64xf32>
    %186 = arith.addf %185, %184 : vector<2x64xf32>
    %187 = arith.divf %185, %186 : vector<2x64xf32>
    %188 = vector.extract_strided_slice %179 {offsets = [0, 64], sizes = [2, 64], strides = [1, 1]} : vector<2x128xf32> to vector<2x64xf32>
    %189 = arith.mulf %188, %162 : vector<2x64xf32>
    %190 = vector.extract_strided_slice %179 {offsets = [0, 0], sizes = [2, 64], strides = [1, 1]} : vector<2x128xf32> to vector<2x64xf32>
    %191 = arith.mulf %190, %181 : vector<2x64xf32>
    %192 = arith.addf %189, %191 : vector<2x64xf32>
    %193 = math.tanh %192 : vector<2x64xf32>
    %194 = arith.mulf %187, %193 : vector<2x64xf32>
    %195 = arith.truncf %194 : vector<2x64xf32> to vector<2x64xbf16>
    %c2 = arith.constant 2 : index
    %c0_61 = arith.constant 0 : index
    %c0_62 = arith.constant 0 : index
    %196 = vector.load %arg17[%c2, %c0_61, %c0_62] : memref<8x2x64xbf16, #tpu.memory_space<vmem>>, vector<1x2x64xbf16>
    %197 = vector.shape_cast %196 : vector<1x2x64xbf16> to vector<2x64xbf16>
    %198 = vector.shape_cast %195 : vector<2x64xbf16> to vector<1x2x64xbf16>
    tpu.vector_store %arg17[%c2, %c0_61, %c0_62], %198 {strides = array<i32>} : memref<8x2x64xbf16, #tpu.memory_space<vmem>>, vector<1x2x64xbf16>,
    %199 = vector.extract_strided_slice %105 {offsets = [0, 3, 0], sizes = [2, 1, 256], strides = [1, 1, 1]} : vector<2x8x256xf32> to vector<2x1x256xf32>
    %200 = vector.shape_cast %199 : vector<2x1x256xf32> to vector<2x256xf32>
    %201 = arith.truncf %194 : vector<2x64xf32> to vector<2x64xbf16>
    %cst_63 = arith.constant dense<0.000000e+00> : vector<2x256xf32>
    %202 = tpu.matmul %201, %106, %cst_63 {dimension_numbers = #tpu.dot_dimension_numbers<[1], [0], [0], [1], [0, 0, 1, 1], [], []>} : vector<2x64xbf16>, vector<64x256xbf16>, vector<2x256xf32> -> vector<2x256xf32>
    %203 = arith.addf %200, %202 : vector<2x256xf32>
    %204 = vector.extract_strided_slice %203 {offsets = [0, 0], sizes = [2, 128], strides = [1, 1]} : vector<2x256xf32> to vector<2x128xf32>
    %205 = arith.negf %204 : vector<2x128xf32>
    %206 = math.exp %205 : vector<2x128xf32>
    %cst_64 = arith.constant 1.000000e+00 : f32
    %207 = vector.broadcast %cst_64 : f32 to vector<2x128xf32>
    %208 = arith.addf %207, %206 : vector<2x128xf32>
    %209 = arith.divf %207, %208 : vector<2x128xf32>
    %210 = vector.extract_strided_slice %203 {offsets = [0, 128], sizes = [2, 64], strides = [1, 1]} : vector<2x256xf32> to vector<2x64xf32>
    %211 = math.tanh %210 : vector<2x64xf32>
    %212 = vector.extract_strided_slice %203 {offsets = [0, 192], sizes = [2, 64], strides = [1, 1]} : vector<2x256xf32> to vector<2x64xf32>
    %213 = arith.negf %212 : vector<2x64xf32>
    %214 = math.exp %213 : vector<2x64xf32>
    %cst_65 = arith.constant 1.000000e+00 : f32
    %215 = vector.broadcast %cst_65 : f32 to vector<2x64xf32>
    %216 = arith.addf %215, %214 : vector<2x64xf32>
    %217 = arith.divf %215, %216 : vector<2x64xf32>
    %218 = vector.extract_strided_slice %209 {offsets = [0, 64], sizes = [2, 64], strides = [1, 1]} : vector<2x128xf32> to vector<2x64xf32>
    %219 = arith.mulf %218, %192 : vector<2x64xf32>
    %220 = vector.extract_strided_slice %209 {offsets = [0, 0], sizes = [2, 64], strides = [1, 1]} : vector<2x128xf32> to vector<2x64xf32>
    %221 = arith.mulf %220, %211 : vector<2x64xf32>
    %222 = arith.addf %219, %221 : vector<2x64xf32>
    %223 = math.tanh %222 : vector<2x64xf32>
    %224 = arith.mulf %217, %223 : vector<2x64xf32>
    %225 = arith.truncf %224 : vector<2x64xf32> to vector<2x64xbf16>
    %c3 = arith.constant 3 : index
    %c0_66 = arith.constant 0 : index
    %c0_67 = arith.constant 0 : index
    %226 = vector.load %arg17[%c3, %c0_66, %c0_67] : memref<8x2x64xbf16, #tpu.memory_space<vmem>>, vector<1x2x64xbf16>
    %227 = vector.shape_cast %226 : vector<1x2x64xbf16> to vector<2x64xbf16>
    %228 = vector.shape_cast %225 : vector<2x64xbf16> to vector<1x2x64xbf16>
    tpu.vector_store %arg17[%c3, %c0_66, %c0_67], %228 {strides = array<i32>} : memref<8x2x64xbf16, #tpu.memory_space<vmem>>, vector<1x2x64xbf16>,
    %229 = vector.extract_strided_slice %105 {offsets = [0, 4, 0], sizes = [2, 1, 256], strides = [1, 1, 1]} : vector<2x8x256xf32> to vector<2x1x256xf32>
    %230 = vector.shape_cast %229 : vector<2x1x256xf32> to vector<2x256xf32>
    %231 = arith.truncf %224 : vector<2x64xf32> to vector<2x64xbf16>
    %cst_68 = arith.constant dense<0.000000e+00> : vector<2x256xf32>
    %232 = tpu.matmul %231, %106, %cst_68 {dimension_numbers = #tpu.dot_dimension_numbers<[1], [0], [0], [1], [0, 0, 1, 1], [], []>} : vector<2x64xbf16>, vector<64x256xbf16>, vector<2x256xf32> -> vector<2x256xf32>
    %233 = arith.addf %230, %232 : vector<2x256xf32>
    %234 = vector.extract_strided_slice %233 {offsets = [0, 0], sizes = [2, 128], strides = [1, 1]} : vector<2x256xf32> to vector<2x128xf32>
    %235 = arith.negf %234 : vector<2x128xf32>
    %236 = math.exp %235 : vector<2x128xf32>
    %cst_69 = arith.constant 1.000000e+00 : f32
    %237 = vector.broadcast %cst_69 : f32 to vector<2x128xf32>
    %238 = arith.addf %237, %236 : vector<2x128xf32>
    %239 = arith.divf %237, %238 : vector<2x128xf32>
    %240 = vector.extract_strided_slice %233 {offsets = [0, 128], sizes = [2, 64], strides = [1, 1]} : vector<2x256xf32> to vector<2x64xf32>
    %241 = math.tanh %240 : vector<2x64xf32>
    %242 = vector.extract_strided_slice %233 {offsets = [0, 192], sizes = [2, 64], strides = [1, 1]} : vector<2x256xf32> to vector<2x64xf32>
    %243 = arith.negf %242 : vector<2x64xf32>
    %244 = math.exp %243 : vector<2x64xf32>
    %cst_70 = arith.constant 1.000000e+00 : f32
    %245 = vector.broadcast %cst_70 : f32 to vector<2x64xf32>
    %246 = arith.addf %245, %244 : vector<2x64xf32>
    %247 = arith.divf %245, %246 : vector<2x64xf32>
    %248 = vector.extract_strided_slice %239 {offsets = [0, 64], sizes = [2, 64], strides = [1, 1]} : vector<2x128xf32> to vector<2x64xf32>
    %249 = arith.mulf %248, %222 : vector<2x64xf32>
    %250 = vector.extract_strided_slice %239 {offsets = [0, 0], sizes = [2, 64], strides = [1, 1]} : vector<2x128xf32> to vector<2x64xf32>
    %251 = arith.mulf %250, %241 : vector<2x64xf32>
    %252 = arith.addf %249, %251 : vector<2x64xf32>
    %253 = math.tanh %252 : vector<2x64xf32>
    %254 = arith.mulf %247, %253 : vector<2x64xf32>
    %255 = arith.truncf %254 : vector<2x64xf32> to vector<2x64xbf16>
    %c4 = arith.constant 4 : index
    %c0_71 = arith.constant 0 : index
    %c0_72 = arith.constant 0 : index
    %256 = vector.load %arg17[%c4, %c0_71, %c0_72] : memref<8x2x64xbf16, #tpu.memory_space<vmem>>, vector<1x2x64xbf16>
    %257 = vector.shape_cast %256 : vector<1x2x64xbf16> to vector<2x64xbf16>
    %258 = vector.shape_cast %255 : vector<2x64xbf16> to vector<1x2x64xbf16>
    tpu.vector_store %arg17[%c4, %c0_71, %c0_72], %258 {strides = array<i32>} : memref<8x2x64xbf16, #tpu.memory_space<vmem>>, vector<1x2x64xbf16>,
    %259 = vector.extract_strided_slice %105 {offsets = [0, 5, 0], sizes = [2, 1, 256], strides = [1, 1, 1]} : vector<2x8x256xf32> to vector<2x1x256xf32>
    %260 = vector.shape_cast %259 : vector<2x1x256xf32> to vector<2x256xf32>
    %261 = arith.truncf %254 : vector<2x64xf32> to vector<2x64xbf16>
    %cst_73 = arith.constant dense<0.000000e+00> : vector<2x256xf32>
    %262 = tpu.matmul %261, %106, %cst_73 {dimension_numbers = #tpu.dot_dimension_numbers<[1], [0], [0], [1], [0, 0, 1, 1], [], []>} : vector<2x64xbf16>, vector<64x256xbf16>, vector<2x256xf32> -> vector<2x256xf32>
    %263 = arith.addf %260, %262 : vector<2x256xf32>
    %264 = vector.extract_strided_slice %263 {offsets = [0, 0], sizes = [2, 128], strides = [1, 1]} : vector<2x256xf32> to vector<2x128xf32>
    %265 = arith.negf %264 : vector<2x128xf32>
    %266 = math.exp %265 : vector<2x128xf32>
    %cst_74 = arith.constant 1.000000e+00 : f32
    %267 = vector.broadcast %cst_74 : f32 to vector<2x128xf32>
    %268 = arith.addf %267, %266 : vector<2x128xf32>
    %269 = arith.divf %267, %268 : vector<2x128xf32>
    %270 = vector.extract_strided_slice %263 {offsets = [0, 128], sizes = [2, 64], strides = [1, 1]} : vector<2x256xf32> to vector<2x64xf32>
    %271 = math.tanh %270 : vector<2x64xf32>
    %272 = vector.extract_strided_slice %263 {offsets = [0, 192], sizes = [2, 64], strides = [1, 1]} : vector<2x256xf32> to vector<2x64xf32>
    %273 = arith.negf %272 : vector<2x64xf32>
    %274 = math.exp %273 : vector<2x64xf32>
    %cst_75 = arith.constant 1.000000e+00 : f32
    %275 = vector.broadcast %cst_75 : f32 to vector<2x64xf32>
    %276 = arith.addf %275, %274 : vector<2x64xf32>
    %277 = arith.divf %275, %276 : vector<2x64xf32>
    %278 = vector.extract_strided_slice %269 {offsets = [0, 64], sizes = [2, 64], strides = [1, 1]} : vector<2x128xf32> to vector<2x64xf32>
    %279 = arith.mulf %278, %252 : vector<2x64xf32>
    %280 = vector.extract_strided_slice %269 {offsets = [0, 0], sizes = [2, 64], strides = [1, 1]} : vector<2x128xf32> to vector<2x64xf32>
    %281 = arith.mulf %280, %271 : vector<2x64xf32>
    %282 = arith.addf %279, %281 : vector<2x64xf32>
    %283 = math.tanh %282 : vector<2x64xf32>
    %284 = arith.mulf %277, %283 : vector<2x64xf32>
    %285 = arith.truncf %284 : vector<2x64xf32> to vector<2x64xbf16>
    %c5 = arith.constant 5 : index
    %c0_76 = arith.constant 0 : index
    %c0_77 = arith.constant 0 : index
    %286 = vector.load %arg17[%c5, %c0_76, %c0_77] : memref<8x2x64xbf16, #tpu.memory_space<vmem>>, vector<1x2x64xbf16>
    %287 = vector.shape_cast %286 : vector<1x2x64xbf16> to vector<2x64xbf16>
    %288 = vector.shape_cast %285 : vector<2x64xbf16> to vector<1x2x64xbf16>
    tpu.vector_store %arg17[%c5, %c0_76, %c0_77], %288 {strides = array<i32>} : memref<8x2x64xbf16, #tpu.memory_space<vmem>>, vector<1x2x64xbf16>,
    %289 = vector.extract_strided_slice %105 {offsets = [0, 6, 0], sizes = [2, 1, 256], strides = [1, 1, 1]} : vector<2x8x256xf32> to vector<2x1x256xf32>
    %290 = vector.shape_cast %289 : vector<2x1x256xf32> to vector<2x256xf32>
    %291 = arith.truncf %284 : vector<2x64xf32> to vector<2x64xbf16>
    %cst_78 = arith.constant dense<0.000000e+00> : vector<2x256xf32>
    %292 = tpu.matmul %291, %106, %cst_78 {dimension_numbers = #tpu.dot_dimension_numbers<[1], [0], [0], [1], [0, 0, 1, 1], [], []>} : vector<2x64xbf16>, vector<64x256xbf16>, vector<2x256xf32> -> vector<2x256xf32>
    %293 = arith.addf %290, %292 : vector<2x256xf32>
    %294 = vector.extract_strided_slice %293 {offsets = [0, 0], sizes = [2, 128], strides = [1, 1]} : vector<2x256xf32> to vector<2x128xf32>
    %295 = arith.negf %294 : vector<2x128xf32>
    %296 = math.exp %295 : vector<2x128xf32>
    %cst_79 = arith.constant 1.000000e+00 : f32
    %297 = vector.broadcast %cst_79 : f32 to vector<2x128xf32>
    %298 = arith.addf %297, %296 : vector<2x128xf32>
    %299 = arith.divf %297, %298 : vector<2x128xf32>
    %300 = vector.extract_strided_slice %293 {offsets = [0, 128], sizes = [2, 64], strides = [1, 1]} : vector<2x256xf32> to vector<2x64xf32>
    %301 = math.tanh %300 : vector<2x64xf32>
    %302 = vector.extract_strided_slice %293 {offsets = [0, 192], sizes = [2, 64], strides = [1, 1]} : vector<2x256xf32> to vector<2x64xf32>
    %303 = arith.negf %302 : vector<2x64xf32>
    %304 = math.exp %303 : vector<2x64xf32>
    %cst_80 = arith.constant 1.000000e+00 : f32
    %305 = vector.broadcast %cst_80 : f32 to vector<2x64xf32>
    %306 = arith.addf %305, %304 : vector<2x64xf32>
    %307 = arith.divf %305, %306 : vector<2x64xf32>
    %308 = vector.extract_strided_slice %299 {offsets = [0, 64], sizes = [2, 64], strides = [1, 1]} : vector<2x128xf32> to vector<2x64xf32>
    %309 = arith.mulf %308, %282 : vector<2x64xf32>
    %310 = vector.extract_strided_slice %299 {offsets = [0, 0], sizes = [2, 64], strides = [1, 1]} : vector<2x128xf32> to vector<2x64xf32>
    %311 = arith.mulf %310, %301 : vector<2x64xf32>
    %312 = arith.addf %309, %311 : vector<2x64xf32>
    %313 = math.tanh %312 : vector<2x64xf32>
    %314 = arith.mulf %307, %313 : vector<2x64xf32>
    %315 = arith.truncf %314 : vector<2x64xf32> to vector<2x64xbf16>
    %c6 = arith.constant 6 : index
    %c0_81 = arith.constant 0 : index
    %c0_82 = arith.constant 0 : index
    %316 = vector.load %arg17[%c6, %c0_81, %c0_82] : memref<8x2x64xbf16, #tpu.memory_space<vmem>>, vector<1x2x64xbf16>
    %317 = vector.shape_cast %316 : vector<1x2x64xbf16> to vector<2x64xbf16>
    %318 = vector.shape_cast %315 : vector<2x64xbf16> to vector<1x2x64xbf16>
    tpu.vector_store %arg17[%c6, %c0_81, %c0_82], %318 {strides = array<i32>} : memref<8x2x64xbf16, #tpu.memory_space<vmem>>, vector<1x2x64xbf16>,
    %319 = vector.extract_strided_slice %105 {offsets = [0, 7, 0], sizes = [2, 1, 256], strides = [1, 1, 1]} : vector<2x8x256xf32> to vector<2x1x256xf32>
    %320 = vector.shape_cast %319 : vector<2x1x256xf32> to vector<2x256xf32>
    %321 = arith.truncf %314 : vector<2x64xf32> to vector<2x64xbf16>
    %cst_83 = arith.constant dense<0.000000e+00> : vector<2x256xf32>
    %322 = tpu.matmul %321, %106, %cst_83 {dimension_numbers = #tpu.dot_dimension_numbers<[1], [0], [0], [1], [0, 0, 1, 1], [], []>} : vector<2x64xbf16>, vector<64x256xbf16>, vector<2x256xf32> -> vector<2x256xf32>
    %323 = arith.addf %320, %322 : vector<2x256xf32>
    %324 = vector.extract_strided_slice %323 {offsets = [0, 0], sizes = [2, 128], strides = [1, 1]} : vector<2x256xf32> to vector<2x128xf32>
    %325 = arith.negf %324 : vector<2x128xf32>
    %326 = math.exp %325 : vector<2x128xf32>
    %cst_84 = arith.constant 1.000000e+00 : f32
    %327 = vector.broadcast %cst_84 : f32 to vector<2x128xf32>
    %328 = arith.addf %327, %326 : vector<2x128xf32>
    %329 = arith.divf %327, %328 : vector<2x128xf32>
    %330 = vector.extract_strided_slice %323 {offsets = [0, 128], sizes = [2, 64], strides = [1, 1]} : vector<2x256xf32> to vector<2x64xf32>
    %331 = math.tanh %330 : vector<2x64xf32>
    %332 = vector.extract_strided_slice %323 {offsets = [0, 192], sizes = [2, 64], strides = [1, 1]} : vector<2x256xf32> to vector<2x64xf32>
    %333 = arith.negf %332 : vector<2x64xf32>
    %334 = math.exp %333 : vector<2x64xf32>
    %cst_85 = arith.constant 1.000000e+00 : f32
    %335 = vector.broadcast %cst_85 : f32 to vector<2x64xf32>
    %336 = arith.addf %335, %334 : vector<2x64xf32>
    %337 = arith.divf %335, %336 : vector<2x64xf32>
    %338 = vector.extract_strided_slice %329 {offsets = [0, 64], sizes = [2, 64], strides = [1, 1]} : vector<2x128xf32> to vector<2x64xf32>
    %339 = arith.mulf %338, %312 : vector<2x64xf32>
    %340 = vector.extract_strided_slice %329 {offsets = [0, 0], sizes = [2, 64], strides = [1, 1]} : vector<2x128xf32> to vector<2x64xf32>
    %341 = arith.mulf %340, %331 : vector<2x64xf32>
    %342 = arith.addf %339, %341 : vector<2x64xf32>
    %343 = math.tanh %342 : vector<2x64xf32>
    %344 = arith.mulf %337, %343 : vector<2x64xf32>
    %345 = arith.truncf %344 : vector<2x64xf32> to vector<2x64xbf16>
    %c7 = arith.constant 7 : index
    %c0_86 = arith.constant 0 : index
    %c0_87 = arith.constant 0 : index
    %346 = vector.load %arg17[%c7, %c0_86, %c0_87] : memref<8x2x64xbf16, #tpu.memory_space<vmem>>, vector<1x2x64xbf16>
    %347 = vector.shape_cast %346 : vector<1x2x64xbf16> to vector<2x64xbf16>
    %348 = vector.shape_cast %345 : vector<2x64xbf16> to vector<1x2x64xbf16>
    tpu.vector_store %arg17[%c7, %c0_86, %c0_87], %348 {strides = array<i32>} : memref<8x2x64xbf16, #tpu.memory_space<vmem>>, vector<1x2x64xbf16>,
    %c0_88 = arith.constant 0 : index
    %c0_89 = arith.constant 0 : index
    %c0_90 = arith.constant 0 : index
    %349 = vector.load %arg17[%c0_88, %c0_89, %c0_90] : memref<8x2x64xbf16, #tpu.memory_space<vmem>>, vector<8x2x64xbf16>
    %350 = vector.shape_cast %349 : vector<8x2x64xbf16> to vector<16x64xbf16>
    %c0_91 = arith.constant 0 : index
    %c0_92 = arith.constant 0 : index
    %351 = vector.load %arg11[%c0_91, %c0_92] : memref<64x256xbf16, #tpu.memory_space<vmem>>, vector<64x256xbf16>
    %cst_93 = arith.constant dense<0.000000e+00> : vector<16x256xf32>
    %352 = tpu.matmul %350, %351, %cst_93 {dimension_numbers = #tpu.dot_dimension_numbers<[1], [0], [0], [1], [0, 0, 1, 1], [], []>} : vector<16x64xbf16>, vector<64x256xbf16>, vector<16x256xf32> -> vector<16x256xf32>
    %c0_94 = arith.constant 0 : index
    %c0_95 = arith.constant 0 : index
    %353 = vector.load %arg13[%c0_94, %c0_95] : memref<1x256xf32, #tpu.memory_space<vmem>>, vector<1x256xf32>
    %354 = vector.broadcast %353 : vector<1x256xf32> to vector<16x256xf32>
    %355 = arith.addf %352, %354 : vector<16x256xf32>
    %356 = vector.shape_cast %355 : vector<16x256xf32> to vector<8x2x256xf32>
    %c0_96 = arith.constant 0 : index
    %c0_97 = arith.constant 0 : index
    %357 = vector.load %arg12[%c0_96, %c0_97] : memref<64x256xbf16, #tpu.memory_space<vmem>>, vector<64x256xbf16>
    %c0_98 = arith.constant 0 : index
    %c0_99 = arith.constant 0 : index
    %358 = vector.load %arg14[%c0_98, %c0_99] : memref<1x64xf32, #tpu.memory_space<vmem>>, vector<1x64xf32>
    %cst_100 = arith.constant 0.000000e+00 : f32
    %359 = vector.broadcast %cst_100 : f32 to vector<2x64xf32>
    %cst_101 = arith.constant 0.000000e+00 : f32
    %360 = vector.broadcast %cst_101 : f32 to vector<2x64xf32>
    %361 = vector.extract_strided_slice %356 {offsets = [0, 0, 0], sizes = [1, 2, 256], strides = [1, 1, 1]} : vector<8x2x256xf32> to vector<1x2x256xf32>
    %362 = vector.shape_cast %361 : vector<1x2x256xf32> to vector<2x256xf32>
    %363 = arith.truncf %359 : vector<2x64xf32> to vector<2x64xbf16>
    %cst_102 = arith.constant dense<0.000000e+00> : vector<2x256xf32>
    %364 = tpu.matmul %363, %357, %cst_102 {dimension_numbers = #tpu.dot_dimension_numbers<[1], [0], [0], [1], [0, 0, 1, 1], [], []>} : vector<2x64xbf16>, vector<64x256xbf16>, vector<2x256xf32> -> vector<2x256xf32>
    %365 = arith.addf %362, %364 : vector<2x256xf32>
    %366 = vector.extract_strided_slice %365 {offsets = [0, 0], sizes = [2, 128], strides = [1, 1]} : vector<2x256xf32> to vector<2x128xf32>
    %367 = arith.negf %366 : vector<2x128xf32>
    %368 = math.exp %367 : vector<2x128xf32>
    %cst_103 = arith.constant 1.000000e+00 : f32
    %369 = vector.broadcast %cst_103 : f32 to vector<2x128xf32>
    %370 = arith.addf %369, %368 : vector<2x128xf32>
    %371 = arith.divf %369, %370 : vector<2x128xf32>
    %372 = vector.extract_strided_slice %365 {offsets = [0, 128], sizes = [2, 64], strides = [1, 1]} : vector<2x256xf32> to vector<2x64xf32>
    %373 = math.tanh %372 : vector<2x64xf32>
    %374 = vector.extract_strided_slice %365 {offsets = [0, 192], sizes = [2, 64], strides = [1, 1]} : vector<2x256xf32> to vector<2x64xf32>
    %375 = arith.negf %374 : vector<2x64xf32>
    %376 = math.exp %375 : vector<2x64xf32>
    %cst_104 = arith.constant 1.000000e+00 : f32
    %377 = vector.broadcast %cst_104 : f32 to vector<2x64xf32>
    %378 = arith.addf %377, %376 : vector<2x64xf32>
    %379 = arith.divf %377, %378 : vector<2x64xf32>
    %380 = vector.extract_strided_slice %371 {offsets = [0, 64], sizes = [2, 64], strides = [1, 1]} : vector<2x128xf32> to vector<2x64xf32>
    %381 = arith.mulf %380, %360 : vector<2x64xf32>
    %382 = vector.extract_strided_slice %371 {offsets = [0, 0], sizes = [2, 64], strides = [1, 1]} : vector<2x128xf32> to vector<2x64xf32>
    %383 = arith.mulf %382, %373 : vector<2x64xf32>
    %384 = arith.addf %381, %383 : vector<2x64xf32>
    %385 = math.tanh %384 : vector<2x64xf32>
    %386 = arith.mulf %379, %385 : vector<2x64xf32>
    %387 = vector.broadcast %358 : vector<1x64xf32> to vector<2x64xf32>
    %388 = arith.mulf %386, %387 : vector<2x64xf32>
    %cst_105 = arith.constant dense<0.000000e+00> : vector<2xf32>
    %389 = vector.multi_reduction <add>, %388, %cst_105 [1] : vector<2x64xf32> to vector<2xf32>
    %390 = vector.shape_cast %389 : vector<2xf32> to vector<2x1xf32>
    %391 = vector.extract_strided_slice %356 {offsets = [1, 0, 0], sizes = [1, 2, 256], strides = [1, 1, 1]} : vector<8x2x256xf32> to vector<1x2x256xf32>
    %392 = vector.shape_cast %391 : vector<1x2x256xf32> to vector<2x256xf32>
    %393 = arith.truncf %386 : vector<2x64xf32> to vector<2x64xbf16>
    %cst_106 = arith.constant dense<0.000000e+00> : vector<2x256xf32>
    %394 = tpu.matmul %393, %357, %cst_106 {dimension_numbers = #tpu.dot_dimension_numbers<[1], [0], [0], [1], [0, 0, 1, 1], [], []>} : vector<2x64xbf16>, vector<64x256xbf16>, vector<2x256xf32> -> vector<2x256xf32>
    %395 = arith.addf %392, %394 : vector<2x256xf32>
    %396 = vector.extract_strided_slice %395 {offsets = [0, 0], sizes = [2, 128], strides = [1, 1]} : vector<2x256xf32> to vector<2x128xf32>
    %397 = arith.negf %396 : vector<2x128xf32>
    %398 = math.exp %397 : vector<2x128xf32>
    %cst_107 = arith.constant 1.000000e+00 : f32
    %399 = vector.broadcast %cst_107 : f32 to vector<2x128xf32>
    %400 = arith.addf %399, %398 : vector<2x128xf32>
    %401 = arith.divf %399, %400 : vector<2x128xf32>
    %402 = vector.extract_strided_slice %395 {offsets = [0, 128], sizes = [2, 64], strides = [1, 1]} : vector<2x256xf32> to vector<2x64xf32>
    %403 = math.tanh %402 : vector<2x64xf32>
    %404 = vector.extract_strided_slice %395 {offsets = [0, 192], sizes = [2, 64], strides = [1, 1]} : vector<2x256xf32> to vector<2x64xf32>
    %405 = arith.negf %404 : vector<2x64xf32>
    %406 = math.exp %405 : vector<2x64xf32>
    %cst_108 = arith.constant 1.000000e+00 : f32
    %407 = vector.broadcast %cst_108 : f32 to vector<2x64xf32>
    %408 = arith.addf %407, %406 : vector<2x64xf32>
    %409 = arith.divf %407, %408 : vector<2x64xf32>
    %410 = vector.extract_strided_slice %401 {offsets = [0, 64], sizes = [2, 64], strides = [1, 1]} : vector<2x128xf32> to vector<2x64xf32>
    %411 = arith.mulf %410, %384 : vector<2x64xf32>
    %412 = vector.extract_strided_slice %401 {offsets = [0, 0], sizes = [2, 64], strides = [1, 1]} : vector<2x128xf32> to vector<2x64xf32>
    %413 = arith.mulf %412, %403 : vector<2x64xf32>
    %414 = arith.addf %411, %413 : vector<2x64xf32>
    %415 = math.tanh %414 : vector<2x64xf32>
    %416 = arith.mulf %409, %415 : vector<2x64xf32>
    %417 = vector.broadcast %358 : vector<1x64xf32> to vector<2x64xf32>
    %418 = arith.mulf %416, %417 : vector<2x64xf32>
    %cst_109 = arith.constant dense<0.000000e+00> : vector<2xf32>
    %419 = vector.multi_reduction <add>, %418, %cst_109 [1] : vector<2x64xf32> to vector<2xf32>
    %420 = vector.shape_cast %419 : vector<2xf32> to vector<2x1xf32>
    %421 = vector.extract_strided_slice %356 {offsets = [2, 0, 0], sizes = [1, 2, 256], strides = [1, 1, 1]} : vector<8x2x256xf32> to vector<1x2x256xf32>
    %422 = vector.shape_cast %421 : vector<1x2x256xf32> to vector<2x256xf32>
    %423 = arith.truncf %416 : vector<2x64xf32> to vector<2x64xbf16>
    %cst_110 = arith.constant dense<0.000000e+00> : vector<2x256xf32>
    %424 = tpu.matmul %423, %357, %cst_110 {dimension_numbers = #tpu.dot_dimension_numbers<[1], [0], [0], [1], [0, 0, 1, 1], [], []>} : vector<2x64xbf16>, vector<64x256xbf16>, vector<2x256xf32> -> vector<2x256xf32>
    %425 = arith.addf %422, %424 : vector<2x256xf32>
    %426 = vector.extract_strided_slice %425 {offsets = [0, 0], sizes = [2, 128], strides = [1, 1]} : vector<2x256xf32> to vector<2x128xf32>
    %427 = arith.negf %426 : vector<2x128xf32>
    %428 = math.exp %427 : vector<2x128xf32>
    %cst_111 = arith.constant 1.000000e+00 : f32
    %429 = vector.broadcast %cst_111 : f32 to vector<2x128xf32>
    %430 = arith.addf %429, %428 : vector<2x128xf32>
    %431 = arith.divf %429, %430 : vector<2x128xf32>
    %432 = vector.extract_strided_slice %425 {offsets = [0, 128], sizes = [2, 64], strides = [1, 1]} : vector<2x256xf32> to vector<2x64xf32>
    %433 = math.tanh %432 : vector<2x64xf32>
    %434 = vector.extract_strided_slice %425 {offsets = [0, 192], sizes = [2, 64], strides = [1, 1]} : vector<2x256xf32> to vector<2x64xf32>
    %435 = arith.negf %434 : vector<2x64xf32>
    %436 = math.exp %435 : vector<2x64xf32>
    %cst_112 = arith.constant 1.000000e+00 : f32
    %437 = vector.broadcast %cst_112 : f32 to vector<2x64xf32>
    %438 = arith.addf %437, %436 : vector<2x64xf32>
    %439 = arith.divf %437, %438 : vector<2x64xf32>
    %440 = vector.extract_strided_slice %431 {offsets = [0, 64], sizes = [2, 64], strides = [1, 1]} : vector<2x128xf32> to vector<2x64xf32>
    %441 = arith.mulf %440, %414 : vector<2x64xf32>
    %442 = vector.extract_strided_slice %431 {offsets = [0, 0], sizes = [2, 64], strides = [1, 1]} : vector<2x128xf32> to vector<2x64xf32>
    %443 = arith.mulf %442, %433 : vector<2x64xf32>
    %444 = arith.addf %441, %443 : vector<2x64xf32>
    %445 = math.tanh %444 : vector<2x64xf32>
    %446 = arith.mulf %439, %445 : vector<2x64xf32>
    %447 = vector.broadcast %358 : vector<1x64xf32> to vector<2x64xf32>
    %448 = arith.mulf %446, %447 : vector<2x64xf32>
    %cst_113 = arith.constant dense<0.000000e+00> : vector<2xf32>
    %449 = vector.multi_reduction <add>, %448, %cst_113 [1] : vector<2x64xf32> to vector<2xf32>
    %450 = vector.shape_cast %449 : vector<2xf32> to vector<2x1xf32>
    %451 = vector.extract_strided_slice %356 {offsets = [3, 0, 0], sizes = [1, 2, 256], strides = [1, 1, 1]} : vector<8x2x256xf32> to vector<1x2x256xf32>
    %452 = vector.shape_cast %451 : vector<1x2x256xf32> to vector<2x256xf32>
    %453 = arith.truncf %446 : vector<2x64xf32> to vector<2x64xbf16>
    %cst_114 = arith.constant dense<0.000000e+00> : vector<2x256xf32>
    %454 = tpu.matmul %453, %357, %cst_114 {dimension_numbers = #tpu.dot_dimension_numbers<[1], [0], [0], [1], [0, 0, 1, 1], [], []>} : vector<2x64xbf16>, vector<64x256xbf16>, vector<2x256xf32> -> vector<2x256xf32>
    %455 = arith.addf %452, %454 : vector<2x256xf32>
    %456 = vector.extract_strided_slice %455 {offsets = [0, 0], sizes = [2, 128], strides = [1, 1]} : vector<2x256xf32> to vector<2x128xf32>
    %457 = arith.negf %456 : vector<2x128xf32>
    %458 = math.exp %457 : vector<2x128xf32>
    %cst_115 = arith.constant 1.000000e+00 : f32
    %459 = vector.broadcast %cst_115 : f32 to vector<2x128xf32>
    %460 = arith.addf %459, %458 : vector<2x128xf32>
    %461 = arith.divf %459, %460 : vector<2x128xf32>
    %462 = vector.extract_strided_slice %455 {offsets = [0, 128], sizes = [2, 64], strides = [1, 1]} : vector<2x256xf32> to vector<2x64xf32>
    %463 = math.tanh %462 : vector<2x64xf32>
    %464 = vector.extract_strided_slice %455 {offsets = [0, 192], sizes = [2, 64], strides = [1, 1]} : vector<2x256xf32> to vector<2x64xf32>
    %465 = arith.negf %464 : vector<2x64xf32>
    %466 = math.exp %465 : vector<2x64xf32>
    %cst_116 = arith.constant 1.000000e+00 : f32
    %467 = vector.broadcast %cst_116 : f32 to vector<2x64xf32>
    %468 = arith.addf %467, %466 : vector<2x64xf32>
    %469 = arith.divf %467, %468 : vector<2x64xf32>
    %470 = vector.extract_strided_slice %461 {offsets = [0, 64], sizes = [2, 64], strides = [1, 1]} : vector<2x128xf32> to vector<2x64xf32>
    %471 = arith.mulf %470, %444 : vector<2x64xf32>
    %472 = vector.extract_strided_slice %461 {offsets = [0, 0], sizes = [2, 64], strides = [1, 1]} : vector<2x128xf32> to vector<2x64xf32>
    %473 = arith.mulf %472, %463 : vector<2x64xf32>
    %474 = arith.addf %471, %473 : vector<2x64xf32>
    %475 = math.tanh %474 : vector<2x64xf32>
    %476 = arith.mulf %469, %475 : vector<2x64xf32>
    %477 = vector.broadcast %358 : vector<1x64xf32> to vector<2x64xf32>
    %478 = arith.mulf %476, %477 : vector<2x64xf32>
    %cst_117 = arith.constant dense<0.000000e+00> : vector<2xf32>
    %479 = vector.multi_reduction <add>, %478, %cst_117 [1] : vector<2x64xf32> to vector<2xf32>
    %480 = vector.shape_cast %479 : vector<2xf32> to vector<2x1xf32>
    %481 = vector.extract_strided_slice %356 {offsets = [4, 0, 0], sizes = [1, 2, 256], strides = [1, 1, 1]} : vector<8x2x256xf32> to vector<1x2x256xf32>
    %482 = vector.shape_cast %481 : vector<1x2x256xf32> to vector<2x256xf32>
    %483 = arith.truncf %476 : vector<2x64xf32> to vector<2x64xbf16>
    %cst_118 = arith.constant dense<0.000000e+00> : vector<2x256xf32>
    %484 = tpu.matmul %483, %357, %cst_118 {dimension_numbers = #tpu.dot_dimension_numbers<[1], [0], [0], [1], [0, 0, 1, 1], [], []>} : vector<2x64xbf16>, vector<64x256xbf16>, vector<2x256xf32> -> vector<2x256xf32>
    %485 = arith.addf %482, %484 : vector<2x256xf32>
    %486 = vector.extract_strided_slice %485 {offsets = [0, 0], sizes = [2, 128], strides = [1, 1]} : vector<2x256xf32> to vector<2x128xf32>
    %487 = arith.negf %486 : vector<2x128xf32>
    %488 = math.exp %487 : vector<2x128xf32>
    %cst_119 = arith.constant 1.000000e+00 : f32
    %489 = vector.broadcast %cst_119 : f32 to vector<2x128xf32>
    %490 = arith.addf %489, %488 : vector<2x128xf32>
    %491 = arith.divf %489, %490 : vector<2x128xf32>
    %492 = vector.extract_strided_slice %485 {offsets = [0, 128], sizes = [2, 64], strides = [1, 1]} : vector<2x256xf32> to vector<2x64xf32>
    %493 = math.tanh %492 : vector<2x64xf32>
    %494 = vector.extract_strided_slice %485 {offsets = [0, 192], sizes = [2, 64], strides = [1, 1]} : vector<2x256xf32> to vector<2x64xf32>
    %495 = arith.negf %494 : vector<2x64xf32>
    %496 = math.exp %495 : vector<2x64xf32>
    %cst_120 = arith.constant 1.000000e+00 : f32
    %497 = vector.broadcast %cst_120 : f32 to vector<2x64xf32>
    %498 = arith.addf %497, %496 : vector<2x64xf32>
    %499 = arith.divf %497, %498 : vector<2x64xf32>
    %500 = vector.extract_strided_slice %491 {offsets = [0, 64], sizes = [2, 64], strides = [1, 1]} : vector<2x128xf32> to vector<2x64xf32>
    %501 = arith.mulf %500, %474 : vector<2x64xf32>
    %502 = vector.extract_strided_slice %491 {offsets = [0, 0], sizes = [2, 64], strides = [1, 1]} : vector<2x128xf32> to vector<2x64xf32>
    %503 = arith.mulf %502, %493 : vector<2x64xf32>
    %504 = arith.addf %501, %503 : vector<2x64xf32>
    %505 = math.tanh %504 : vector<2x64xf32>
    %506 = arith.mulf %499, %505 : vector<2x64xf32>
    %507 = vector.broadcast %358 : vector<1x64xf32> to vector<2x64xf32>
    %508 = arith.mulf %506, %507 : vector<2x64xf32>
    %cst_121 = arith.constant dense<0.000000e+00> : vector<2xf32>
    %509 = vector.multi_reduction <add>, %508, %cst_121 [1] : vector<2x64xf32> to vector<2xf32>
    %510 = vector.shape_cast %509 : vector<2xf32> to vector<2x1xf32>
    %511 = vector.extract_strided_slice %356 {offsets = [5, 0, 0], sizes = [1, 2, 256], strides = [1, 1, 1]} : vector<8x2x256xf32> to vector<1x2x256xf32>
    %512 = vector.shape_cast %511 : vector<1x2x256xf32> to vector<2x256xf32>
    %513 = arith.truncf %506 : vector<2x64xf32> to vector<2x64xbf16>
    %cst_122 = arith.constant dense<0.000000e+00> : vector<2x256xf32>
    %514 = tpu.matmul %513, %357, %cst_122 {dimension_numbers = #tpu.dot_dimension_numbers<[1], [0], [0], [1], [0, 0, 1, 1], [], []>} : vector<2x64xbf16>, vector<64x256xbf16>, vector<2x256xf32> -> vector<2x256xf32>
    %515 = arith.addf %512, %514 : vector<2x256xf32>
    %516 = vector.extract_strided_slice %515 {offsets = [0, 0], sizes = [2, 128], strides = [1, 1]} : vector<2x256xf32> to vector<2x128xf32>
    %517 = arith.negf %516 : vector<2x128xf32>
    %518 = math.exp %517 : vector<2x128xf32>
    %cst_123 = arith.constant 1.000000e+00 : f32
    %519 = vector.broadcast %cst_123 : f32 to vector<2x128xf32>
    %520 = arith.addf %519, %518 : vector<2x128xf32>
    %521 = arith.divf %519, %520 : vector<2x128xf32>
    %522 = vector.extract_strided_slice %515 {offsets = [0, 128], sizes = [2, 64], strides = [1, 1]} : vector<2x256xf32> to vector<2x64xf32>
    %523 = math.tanh %522 : vector<2x64xf32>
    %524 = vector.extract_strided_slice %515 {offsets = [0, 192], sizes = [2, 64], strides = [1, 1]} : vector<2x256xf32> to vector<2x64xf32>
    %525 = arith.negf %524 : vector<2x64xf32>
    %526 = math.exp %525 : vector<2x64xf32>
    %cst_124 = arith.constant 1.000000e+00 : f32
    %527 = vector.broadcast %cst_124 : f32 to vector<2x64xf32>
    %528 = arith.addf %527, %526 : vector<2x64xf32>
    %529 = arith.divf %527, %528 : vector<2x64xf32>
    %530 = vector.extract_strided_slice %521 {offsets = [0, 64], sizes = [2, 64], strides = [1, 1]} : vector<2x128xf32> to vector<2x64xf32>
    %531 = arith.mulf %530, %504 : vector<2x64xf32>
    %532 = vector.extract_strided_slice %521 {offsets = [0, 0], sizes = [2, 64], strides = [1, 1]} : vector<2x128xf32> to vector<2x64xf32>
    %533 = arith.mulf %532, %523 : vector<2x64xf32>
    %534 = arith.addf %531, %533 : vector<2x64xf32>
    %535 = math.tanh %534 : vector<2x64xf32>
    %536 = arith.mulf %529, %535 : vector<2x64xf32>
    %537 = vector.broadcast %358 : vector<1x64xf32> to vector<2x64xf32>
    %538 = arith.mulf %536, %537 : vector<2x64xf32>
    %cst_125 = arith.constant dense<0.000000e+00> : vector<2xf32>
    %539 = vector.multi_reduction <add>, %538, %cst_125 [1] : vector<2x64xf32> to vector<2xf32>
    %540 = vector.shape_cast %539 : vector<2xf32> to vector<2x1xf32>
    %541 = vector.extract_strided_slice %356 {offsets = [6, 0, 0], sizes = [1, 2, 256], strides = [1, 1, 1]} : vector<8x2x256xf32> to vector<1x2x256xf32>
    %542 = vector.shape_cast %541 : vector<1x2x256xf32> to vector<2x256xf32>
    %543 = arith.truncf %536 : vector<2x64xf32> to vector<2x64xbf16>
    %cst_126 = arith.constant dense<0.000000e+00> : vector<2x256xf32>
    %544 = tpu.matmul %543, %357, %cst_126 {dimension_numbers = #tpu.dot_dimension_numbers<[1], [0], [0], [1], [0, 0, 1, 1], [], []>} : vector<2x64xbf16>, vector<64x256xbf16>, vector<2x256xf32> -> vector<2x256xf32>
    %545 = arith.addf %542, %544 : vector<2x256xf32>
    %546 = vector.extract_strided_slice %545 {offsets = [0, 0], sizes = [2, 128], strides = [1, 1]} : vector<2x256xf32> to vector<2x128xf32>
    %547 = arith.negf %546 : vector<2x128xf32>
    %548 = math.exp %547 : vector<2x128xf32>
    %cst_127 = arith.constant 1.000000e+00 : f32
    %549 = vector.broadcast %cst_127 : f32 to vector<2x128xf32>
    %550 = arith.addf %549, %548 : vector<2x128xf32>
    %551 = arith.divf %549, %550 : vector<2x128xf32>
    %552 = vector.extract_strided_slice %545 {offsets = [0, 128], sizes = [2, 64], strides = [1, 1]} : vector<2x256xf32> to vector<2x64xf32>
    %553 = math.tanh %552 : vector<2x64xf32>
    %554 = vector.extract_strided_slice %545 {offsets = [0, 192], sizes = [2, 64], strides = [1, 1]} : vector<2x256xf32> to vector<2x64xf32>
    %555 = arith.negf %554 : vector<2x64xf32>
    %556 = math.exp %555 : vector<2x64xf32>
    %cst_128 = arith.constant 1.000000e+00 : f32
    %557 = vector.broadcast %cst_128 : f32 to vector<2x64xf32>
    %558 = arith.addf %557, %556 : vector<2x64xf32>
    %559 = arith.divf %557, %558 : vector<2x64xf32>
    %560 = vector.extract_strided_slice %551 {offsets = [0, 64], sizes = [2, 64], strides = [1, 1]} : vector<2x128xf32> to vector<2x64xf32>
    %561 = arith.mulf %560, %534 : vector<2x64xf32>
    %562 = vector.extract_strided_slice %551 {offsets = [0, 0], sizes = [2, 64], strides = [1, 1]} : vector<2x128xf32> to vector<2x64xf32>
    %563 = arith.mulf %562, %553 : vector<2x64xf32>
    %564 = arith.addf %561, %563 : vector<2x64xf32>
    %565 = math.tanh %564 : vector<2x64xf32>
    %566 = arith.mulf %559, %565 : vector<2x64xf32>
    %567 = vector.broadcast %358 : vector<1x64xf32> to vector<2x64xf32>
    %568 = arith.mulf %566, %567 : vector<2x64xf32>
    %cst_129 = arith.constant dense<0.000000e+00> : vector<2xf32>
    %569 = vector.multi_reduction <add>, %568, %cst_129 [1] : vector<2x64xf32> to vector<2xf32>
    %570 = vector.shape_cast %569 : vector<2xf32> to vector<2x1xf32>
    %571 = vector.extract_strided_slice %356 {offsets = [7, 0, 0], sizes = [1, 2, 256], strides = [1, 1, 1]} : vector<8x2x256xf32> to vector<1x2x256xf32>
    %572 = vector.shape_cast %571 : vector<1x2x256xf32> to vector<2x256xf32>
    %573 = arith.truncf %566 : vector<2x64xf32> to vector<2x64xbf16>
    %cst_130 = arith.constant dense<0.000000e+00> : vector<2x256xf32>
    %574 = tpu.matmul %573, %357, %cst_130 {dimension_numbers = #tpu.dot_dimension_numbers<[1], [0], [0], [1], [0, 0, 1, 1], [], []>} : vector<2x64xbf16>, vector<64x256xbf16>, vector<2x256xf32> -> vector<2x256xf32>
    %575 = arith.addf %572, %574 : vector<2x256xf32>
    %576 = vector.extract_strided_slice %575 {offsets = [0, 0], sizes = [2, 128], strides = [1, 1]} : vector<2x256xf32> to vector<2x128xf32>
    %577 = arith.negf %576 : vector<2x128xf32>
    %578 = math.exp %577 : vector<2x128xf32>
    %cst_131 = arith.constant 1.000000e+00 : f32
    %579 = vector.broadcast %cst_131 : f32 to vector<2x128xf32>
    %580 = arith.addf %579, %578 : vector<2x128xf32>
    %581 = arith.divf %579, %580 : vector<2x128xf32>
    %582 = vector.extract_strided_slice %575 {offsets = [0, 128], sizes = [2, 64], strides = [1, 1]} : vector<2x256xf32> to vector<2x64xf32>
    %583 = math.tanh %582 : vector<2x64xf32>
    %584 = vector.extract_strided_slice %575 {offsets = [0, 192], sizes = [2, 64], strides = [1, 1]} : vector<2x256xf32> to vector<2x64xf32>
    %585 = arith.negf %584 : vector<2x64xf32>
    %586 = math.exp %585 : vector<2x64xf32>
    %cst_132 = arith.constant 1.000000e+00 : f32
    %587 = vector.broadcast %cst_132 : f32 to vector<2x64xf32>
    %588 = arith.addf %587, %586 : vector<2x64xf32>
    %589 = arith.divf %587, %588 : vector<2x64xf32>
    %590 = vector.extract_strided_slice %581 {offsets = [0, 64], sizes = [2, 64], strides = [1, 1]} : vector<2x128xf32> to vector<2x64xf32>
    %591 = arith.mulf %590, %564 : vector<2x64xf32>
    %592 = vector.extract_strided_slice %581 {offsets = [0, 0], sizes = [2, 64], strides = [1, 1]} : vector<2x128xf32> to vector<2x64xf32>
    %593 = arith.mulf %592, %583 : vector<2x64xf32>
    %594 = arith.addf %591, %593 : vector<2x64xf32>
    %595 = math.tanh %594 : vector<2x64xf32>
    %596 = arith.mulf %589, %595 : vector<2x64xf32>
    %597 = vector.broadcast %358 : vector<1x64xf32> to vector<2x64xf32>
    %598 = arith.mulf %596, %597 : vector<2x64xf32>
    %cst_133 = arith.constant dense<0.000000e+00> : vector<2xf32>
    %599 = vector.multi_reduction <add>, %598, %cst_133 [1] : vector<2x64xf32> to vector<2xf32>
    %600 = vector.shape_cast %599 : vector<2xf32> to vector<2x1xf32>
    %601 = tpu.concatenate %390, %420, %450, %480, %510, %540, %570, %600 in 1 : vector<2x1xf32>, vector<2x1xf32>, vector<2x1xf32>, vector<2x1xf32>, vector<2x1xf32>, vector<2x1xf32>, vector<2x1xf32>, vector<2x1xf32> -> vector<2x8xf32>
    %c0_134 = arith.constant 0 : index
    %c0_135 = arith.constant 0 : index
    %602 = vector.load %arg15[%c0_134, %c0_135] : memref<1x1xf32, #tpu.memory_space<vmem>>, vector<1x1xf32>
    %603 = vector.broadcast %602 : vector<1x1xf32> to vector<2x8xf32>
    %604 = arith.addf %601, %603 : vector<2x8xf32>
    %605 = arith.negf %604 : vector<2x8xf32>
    %606 = math.exp %605 : vector<2x8xf32>
    %cst_136 = arith.constant 1.000000e+00 : f32
    %607 = vector.broadcast %cst_136 : f32 to vector<2x8xf32>
    %608 = arith.addf %607, %606 : vector<2x8xf32>
    %609 = arith.divf %607, %608 : vector<2x8xf32>
    %c0_137 = arith.constant 0 : index
    %c0_138 = arith.constant 0 : index
    %610 = vector.load %arg16[%c0_137, %c0_138] : memref<2x8xf32, #tpu.memory_space<vmem>>, vector<2x8xf32>
    tpu.vector_store %arg16[%c0_137, %c0_138], %609 {strides = array<i32>} : memref<2x8xf32, #tpu.memory_space<vmem>>, vector<2x8xf32>,
    return
  }
  func.func @transform_0(%arg0: i32) -> (i32, i32, i32) {
    %c0_i32 = arith.constant 0 : i32
    %c0_i32_0 = arith.constant 0 : i32
    %c0_i32_1 = arith.constant 0 : i32
    return %arg0, %c0_i32, %c0_i32_0 : i32, i32, i32
  }
  func.func @transform_1(%arg0: i32) -> (i32, i32) {
    %c0_i32 = arith.constant 0 : i32
    %c0_i32_0 = arith.constant 0 : i32
    %c0_i32_1 = arith.constant 0 : i32
    return %c0_i32, %c0_i32_0 : i32, i32
  }
  func.func @transform_2(%arg0: i32) -> (i32, i32) {
    %c0_i32 = arith.constant 0 : i32
    %c0_i32_0 = arith.constant 0 : i32
    %c0_i32_1 = arith.constant 0 : i32
    return %c0_i32, %c0_i32_0 : i32, i32
  }
  func.func @transform_3(%arg0: i32) -> (i32, i32) {
    %c0_i32 = arith.constant 0 : i32
    %c0_i32_0 = arith.constant 0 : i32
    %c0_i32_1 = arith.constant 0 : i32
    return %c0_i32, %c0_i32_0 : i32, i32
  }
  func.func @transform_4(%arg0: i32) -> (i32, i32) {
    %c0_i32 = arith.constant 0 : i32
    %c0_i32_0 = arith.constant 0 : i32
    %c0_i32_1 = arith.constant 0 : i32
    return %c0_i32, %c0_i32_0 : i32, i32
  }
  func.func @transform_5(%arg0: i32) -> (i32, i32) {
    %c0_i32 = arith.constant 0 : i32
    %c0_i32_0 = arith.constant 0 : i32
    %c0_i32_1 = arith.constant 0 : i32
    return %c0_i32, %c0_i32_0 : i32, i32
  }
  func.func @transform_6(%arg0: i32) -> (i32, i32) {
    %c0_i32 = arith.constant 0 : i32
    %c0_i32_0 = arith.constant 0 : i32
    %c0_i32_1 = arith.constant 0 : i32
    return %c0_i32, %c0_i32_0 : i32, i32
  }
  func.func @transform_7(%arg0: i32) -> (i32, i32) {
    %c0_i32 = arith.constant 0 : i32
    %c0_i32_0 = arith.constant 0 : i32
    %c0_i32_1 = arith.constant 0 : i32
    return %c0_i32, %c0_i32_0 : i32, i32
  }
  func.func @transform_8(%arg0: i32) -> (i32, i32) {
    %c0_i32 = arith.constant 0 : i32
    %c0_i32_0 = arith.constant 0 : i32
    %c0_i32_1 = arith.constant 0 : i32
    return %c0_i32, %c0_i32_0 : i32, i32
  }
  func.func @transform_9(%arg0: i32) -> (i32, i32) {
    %c0_i32 = arith.constant 0 : i32
    %c0_i32_0 = arith.constant 0 : i32
    %c0_i32_1 = arith.constant 0 : i32
    return %c0_i32, %c0_i32_0 : i32, i32
  }
  func.func @transform_10(%arg0: i32) -> (i32, i32) {
    %c0_i32 = arith.constant 0 : i32
    %c0_i32_0 = arith.constant 0 : i32
    %c0_i32_1 = arith.constant 0 : i32
    return %c0_i32, %c0_i32_0 : i32, i32
  }
  func.func @transform_11(%arg0: i32) -> (i32, i32) {
    %c0_i32 = arith.constant 0 : i32
    %c0_i32_0 = arith.constant 0 : i32
    %c0_i32_1 = arith.constant 0 : i32
    return %c0_i32, %c0_i32_0 : i32, i32
  }
  func.func @transform_12(%arg0: i32) -> (i32, i32) {
    %c0_i32 = arith.constant 0 : i32
    %c0_i32_0 = arith.constant 0 : i32
    %c0_i32_1 = arith.constant 0 : i32
    return %c0_i32, %c0_i32_0 : i32, i32
  }
  func.func @transform_13(%arg0: i32) -> (i32, i32) {
    %c0_i32 = arith.constant 0 : i32
    %c0_i32_0 = arith.constant 0 : i32
    %c0_i32_1 = arith.constant 0 : i32
    return %c0_i32, %c0_i32_0 : i32, i32
  }
  func.func @transform_14(%arg0: i32) -> (i32, i32) {
    %c0_i32 = arith.constant 0 : i32
    %c0_i32_0 = arith.constant 0 : i32
    %c0_i32_1 = arith.constant 0 : i32
    return %c0_i32, %c0_i32_0 : i32, i32
  }
  func.func @transform_15(%arg0: i32) -> (i32, i32) {
    %c0_i32 = arith.constant 0 : i32
    %c0_i32_0 = arith.constant 0 : i32
    return %arg0, %c0_i32 : i32, i32
  }
}

</mosaic_0001>

<bundles_post_ra>
// kernel: tile.18
= control target key start
LH: loop header
LB: loop body
LE: loop exit
PB: predicated region body
PF: predicated region fallthrough
CT: control target
= control target key end

     0   :  { %s40_s0 = inlined_call_operand.vmem [shape: f32[32], index: 0, kind: input, shape index: {}]   ;;  %s41_s1 = inlined_call_operand.vmem [shape: f32[32,32], index: 1, kind: output, shape index: {}]  }
   0x1   :  { %v4_v0 = vld [vmem:[%s40_s0] ss:$0 sm:$0xff] }
   0x2   :  { %5 = vst [vmem:[%s41_s1] sm:$0xff] %v4_v0  ;;  %12 = vst [vmem:[%s41_s1 + $0x8] sm:$0xff] %v4_v0 }
   0x3   :  { %13 = vst [vmem:[%s41_s1 + $0x10] sm:$0xff] %v4_v0  ;;  %14 = vst [vmem:[%s41_s1 + $0x18] sm:$0xff] %v4_v0 }

// kernel: tile.19
= control target key start
LH: loop header
LB: loop body
LE: loop exit
PB: predicated region body
PF: predicated region fallthrough
CT: control target
= control target key end

     0   :  { %s122_s8 = smov 96   ;;  %vm4_vm0 = vcmask 261120   ;;  %s160_s0 = inlined_call_operand.vmem [shape: f32[32,32], index: 0, kind: input, shape index: {}]   ;;  %s161_s1 = inlined_call_operand.hbm [shape: f32[1,1024], index: 1, kind: output, shape index: {}]  }
   0x1   :  { %v91_v0 = vld [vmem:[%s160_s0 + $0x3] ss:$4 sm:$0xff]   ;;  %v93_v1 = vld [vmem:[%s160_s0 + $0x1] ss:$4 sm:$0xff]   ;;  %v3_v2 = vld [vmem:[%s160_s0] ss:$4 sm:$0xff]  }
   0x2   :  { %9 = vrot.lane.b32.xlu0 %v91_v0, %s122_s8  ;;  %v92_v3 = vld [vmem:[%s160_s0 + $0x2] ss:$4 sm:$0xff]   ;;  %s123_s0 = smov 32  }
   0x3   :  { %23 = vrot.lane.b32.xlu1 %v93_v1, %s123_s0 }
   0x4   :  { %2 = vsyncpa [#allocation1], 0  ;;  %5 = vst.msk [vmem:[#allocation2] ss:$8 sm:$0xf] %vm4_vm0, %v3_v2   ;;  %s124_s15 = smov 64  }
   0x5   :  { %6 = vst.msk [vmem:[#allocation2] ss:$8 sm:$0xf0] %vm4_vm0, %v3_v2   ;;  %vm11_vm1 = vcmask 1048320   ;;  %vm18_vm2 = vcmask 785920   ;;  %vm25_vm3 = vcmask 523520  }
   0x6   :  { %16 = vrot.lane.b32.xlu0 %v92_v3, %s124_s15  ;;  %s125_s16 = smov [#allocation0]  }
   0x7   :  { %s79_s17 = sshll.u32 %s125_s16, 4  ;;  %s80_s17 = int_to_ptr.vmem [resolvable:$true] %s79_s17 }
   0x8   :  { %s98_s18 = scalar_lea.vmem %s80_s17, 128  ;;  %p103_p1 = scmp.lt.s32.totalorder %s80_s17, %s80_s17 }
   0x9   :  { %p99_p0 = scmp.ne.s32.totalorder %s80_s17, %s98_s18  ;;  %p104_p2 = scmp.lt.s32.totalorder %s98_s18, %s98_s18 }
   0xb   :  { %p105_p3 = por %p104_p2, %p103_p1 }
   0xd   :  { %p106_p4 = pnand %p105_p3, %p99_p0 }
  0x74   :  { %v10_v4 = vpop.permute.xlu0 %9  }
  0x75   :  { %12 = vst.msk [vmem:[#allocation2] ss:$8 sm:$0xf] %vm11_vm1, %v10_v4   ;;  %13 = vst.msk [vmem:[#allocation2] ss:$8 sm:$0xf0] %vm11_vm1, %v10_v4   ;;  %v24_v5 = vpop.permute.xlu1 %23  }
  0x78   :  { %v17_v6 = vpop.permute.xlu0 %16  }
  0x79   :  { %19 = vst.msk [vmem:[#allocation2] ss:$8 sm:$0xf] %vm18_vm2, %v17_v6   ;;  %20 = vst.msk [vmem:[#allocation2] ss:$8 sm:$0xf0] %vm18_vm2, %v17_v6  }
  0x7a   :  { %26 = vst.msk [vmem:[#allocation2] ss:$8 sm:$0xf] %vm25_vm3, %v24_v5   ;;  %27 = vst.msk [vmem:[#allocation2] ss:$8 sm:$0xf0] %vm25_vm3, %v24_v5  }
  0x81   :  { %v31_v7 = vld [vmem:[#allocation2] sm:$0x1]  ;;  %v35_v8 = vld [vmem:[#allocation2 + $0x8] sm:$0x1]  ;;  %v40_v9 = vld [vmem:[#allocation2 + $0x10] sm:$0x1] }
  0x82   :  { %33 = vst [vmem:[#allocation0] sm:$0x1] %v31_v7  ;;  %38 = vst [vmem:[#allocation0 + $0x1] sm:$0x1] %v35_v8  ;;  %v46_v10 = vld [vmem:[#allocation2 + $0x18] sm:$0x1] }
  0x83   :  { %44 = vst [vmem:[#allocation0 + $0x2] sm:$0x1] %v40_v9  ;;  %v52_v11 = vld [vmem:[#allocation2 + $0x20] sm:$0x1]  ;;  %v58_v12 = vld [vmem:[#allocation2 + $0x28] sm:$0x1] }
  0x84   :  { %50 = vst [vmem:[#allocation0 + $0x3] sm:$0x1] %v46_v10  ;;  %56 = vst [vmem:[#allocation0 + $0x4] sm:$0x1] %v52_v11  ;;  %v64_v13 = vld [vmem:[#allocation2 + $0x30] sm:$0x1] }
  0x85   :  { %62 = vst [vmem:[#allocation0 + $0x5] sm:$0x1] %v58_v12  ;;  %v70_v14 = vld [vmem:[#allocation2 + $0x38] sm:$0x1]  ;;  %68 = vst [vmem:[#allocation0 + $0x6] sm:$0x1] %v64_v13 }
  0x86   :  { %74 = vst [vmem:[#allocation0 + $0x7] sm:$0x1] %v70_v14 }
  0x87   :  { %109 = shalt.err (!%p106_p4)
}
  0x88   :  { %s110_s21 = scalar_lea.hbm %s161_s1, 128 }
  0x89   :  { %p111_p5 = scmp.ne.s32.totalorder %s161_s1, %s110_s21  ;;  %p114_p6 = scmp.lt.u32.totalorder %s110_s21, %s161_s1 }
  0x8b   :  { %p116_p7 = pnand %p114_p6, %p111_p5 }
  0x8d   :  { %119 = shalt.err (!%p116_p7)
}
  0x8e   :  { %82 = dma.vmem_to_hbm [thread:$0]  %s80_s17, 128, %s161_s1, [#allocation1]  }
  0x8f   :  { %120 = dma.done.wait [#allocation1], 128  }
  0x90   :  { %121 = vsyncadd [#allocation1], 4294967168 }
  0x91   :  { %84 = vsyncpa [#allocation1], 1 }

// kernel: tile.23
= control target key start
LH: loop header
LB: loop body
LE: loop exit
PB: predicated region body
PF: predicated region fallthrough
CT: control target
= control target key end

     0   :  { %s22_s0 = inlined_call_operand.vmem [shape: f32[32], index: 0, kind: input, shape index: {}]   ;;  %s23_s1 = inlined_call_operand.vmem [shape: f32[8,32], index: 1, kind: output, shape index: {}]  }
   0x1   :  { %v4_v0 = vld [vmem:[%s22_s0] ss:$0 sm:$0xff] }
   0x2   :  { %5 = vst [vmem:[%s23_s1] sm:$0xff] %v4_v0 }

// kernel: tile.24
= control target key start
LH: loop header
LB: loop body
LE: loop exit
PB: predicated region body
PF: predicated region fallthrough
CT: control target
= control target key end

     0   :  { %s8_s6 = smov 3  ;;  %s15_s9 = smov 3  ;;  %s118_s0 = inlined_call_operand.vmem [shape: f32[8,32], index: 0, kind: input, shape index: {}]   ;;  %s119_s1 = inlined_call_operand.hbm [shape: f32[1,256], index: 1, kind: output, shape index: {}]  }
   0x1   :  { %v49_v0 = vld [vmem:[%s118_s0 + $0x3] ss:$4 sm:%s8_s6]  }
   0x2   :  { %2 = vsyncpa [#allocation1], 0  ;;  %s80_s10 = smov 96   ;;  %s22_s11 = smov 3  ;;  %vm5_vm0 = vcmask 261120   ;;  %vm12_vm1 = vcmask 1048320  }
   0x3   :  { %10 = vrot.lane.b32.xlu0 %v49_v0, %s80_s10  ;;  %v50_v1 = vld [vmem:[%s118_s0 + $0x2] ss:$4 sm:%s15_s9]   ;;  %s3_s16 = smov 3  ;;  %s81_s17 = smov 32   ;;  %vm19_vm2 = vcmask 785920   ;;  %vm26_vm3 = vcmask 523520  }
   0x4   :  { %v51_v2 = vld [vmem:[%s118_s0 + $0x1] ss:$4 sm:%s22_s11]   ;;  %v4_v3 = vld [vmem:[%s118_s0] ss:$4 sm:%s3_s16]   ;;  %s82_s0 = smov 64   ;;  %s83_s20 = smov [#allocation0]  }
   0x5   :  { %24 = vrot.lane.b32.xlu1 %v51_v2, %s81_s17  ;;  %6 = vst.msk [vmem:[#allocation2] ss:$8 sm:$0x3] %vm5_vm0, %v4_v3   ;;  %s43_s21 = sshll.u32 %s83_s20, 4  ;;  %s44_s21 = int_to_ptr.vmem [resolvable:$true] %s43_s21 }
   0x6   :  { %s56_s22 = scalar_lea.vmem %s44_s21, 32  ;;  %p61_p1 = scmp.lt.s32.totalorder %s44_s21, %s44_s21 }
   0x7   :  { %17 = vrot.lane.b32.xlu0 %v50_v1, %s82_s0  ;;  %p57_p0 = scmp.ne.s32.totalorder %s44_s21, %s56_s22  ;;  %p62_p2 = scmp.lt.s32.totalorder %s56_s22, %s56_s22 }
   0x9   :  { %p63_p3 = por %p62_p2, %p61_p1 }
   0xb   :  { %p64_p4 = pnand %p63_p3, %p57_p0 }
  0x75   :  { %v11_v4 = vpop.permute.xlu0 %10  }
  0x76   :  { %13 = vst.msk [vmem:[#allocation2] ss:$8 sm:$0x3] %vm12_vm1, %v11_v4  }
  0x77   :  { %v25_v5 = vpop.permute.xlu1 %24  }
  0x79   :  { %v18_v6 = vpop.permute.xlu0 %17  }
  0x7a   :  { %20 = vst.msk [vmem:[#allocation2] ss:$8 sm:$0x3] %vm19_vm2, %v18_v6  }
  0x7b   :  { %27 = vst.msk [vmem:[#allocation2] ss:$8 sm:$0x3] %vm26_vm3, %v25_v5  }
  0x82   :  { %v31_v7 = vld [vmem:[#allocation2] sm:$0x1]  ;;  %v35_v8 = vld [vmem:[#allocation2 + $0x8] sm:$0x1] }
  0x83   :  { %33 = vst [vmem:[#allocation0] sm:$0x1] %v31_v7  ;;  %38 = vst [vmem:[#allocation0 + $0x1] sm:$0x1] %v35_v8 }
  0x84   :  { %67 = shalt.err (!%p64_p4)
}
  0x85   :  { %s68_s25 = scalar_lea.hbm %s119_s1, 32 }
  0x86   :  { %p69_p5 = scmp.ne.s32.totalorder %s119_s1, %s68_s25  ;;  %p72_p6 = scmp.lt.u32.totalorder %s68_s25, %s119_s1 }
  0x88   :  { %p74_p7 = pnand %p72_p6, %p69_p5 }
  0x8a   :  { %77 = shalt.err (!%p74_p7)
}
  0x8b   :  { %46 = dma.vmem_to_hbm [thread:$0]  %s44_s21, 32, %s119_s1, [#allocation1]  }
  0x8c   :  { %78 = dma.done.wait [#allocation1], 32  }
  0x8d   :  { %79 = vsyncadd [#allocation1], 4294967264 }
  0x8e   :  { %48 = vsyncpa [#allocation1], 1 }

// kernel: tile.28
= control target key start
LH: loop header
LB: loop body
LE: loop exit
PB: predicated region body
PF: predicated region fallthrough
CT: control target
= control target key end

     0   :  { %s22_s0 = inlined_call_operand.vmem [shape: f32[32], index: 0, kind: input, shape index: {}]   ;;  %s23_s1 = inlined_call_operand.vmem [shape: f32[4,32], index: 1, kind: output, shape index: {}]  }
   0x1   :  { %v4_v0 = vld [vmem:[%s22_s0] ss:$0 sm:$0xff] }
   0x2   :  { %5 = vst [vmem:[%s23_s1] sm:$0xf] %v4_v0 }

// kernel: tile.29
= control target key start
LH: loop header
LB: loop body
LE: loop exit
PB: predicated region body
PF: predicated region fallthrough
CT: control target
= control target key end

     0   :  { %s101_s0 = inlined_call_operand.vmem [shape: f32[4,32], index: 0, kind: input, shape index: {}]   ;;  %s102_s1 = inlined_call_operand.hbm [shape: f32[1,128], index: 1, kind: output, shape index: {}]  }
   0x1   :  { %v5_v0 = vld [vmem:[%s101_s0] sm:$0xf] }
   0x2   :  { %6 = vst [vmem:[#allocation3] sm:$0xf] %v5_v0 }
   0x3   :  { %2 = vsyncpa [#allocation1], 0  ;;  %vm8_vm0 = vcmask 261120   ;;  %s72_s0 = smov 96   ;;  %s73_s8 = smov 32   ;;  %vm14_vm1 = vcmask 1048320  }
   0x4   :  { %s74_s9 = smov 64   ;;  %vm20_vm2 = vcmask 785920   ;;  %vm26_vm3 = vcmask 523520   ;;  %s75_s10 = smov [#allocation0]  }
   0x5   :  { %s38_s11 = sshll.u32 %s75_s10, 4  ;;  %s39_s11 = int_to_ptr.vmem [resolvable:$true] %s38_s11 }
   0x6   :  { %s48_s12 = scalar_lea.vmem %s39_s11, 16  ;;  %s52_s13 = scalar_lea.vmem %s39_s11, 32 }
   0x7   :  { %p49_p0 = scmp.ne.s32.totalorder %s39_s11, %s48_s12  ;;  %p53_p1 = scmp.lt.s32.totalorder %s39_s11, %s39_s11 }
   0x8   :  { %p54_p2 = scmp.lt.s32.totalorder %s52_s13, %s48_s12 }
   0x9   :  { %v11_v1 = vld [vmem:[#allocation3 + $0x3] sm:$0x1]   ;;  %v23_v2 = vld [vmem:[#allocation3 + $0x1] sm:$0x1]   ;;  %v7_v3 = vld [vmem:[#allocation3] sm:$0x1]  }
   0xa   :  { %12 = vrot.lane.b32.xlu0 %v11_v1, %s72_s0  ;;  %24 = vrot.lane.b32.xlu1 %v23_v2, %s73_s8  ;;  %v17_v4 = vld [vmem:[#allocation3 + $0x2] sm:$0x1]   ;;  %9 = vst.msk [vmem:[#allocation2] sm:$0x1] %vm8_vm0, %v7_v3   ;;  %p55_p3 = por %p54_p2, %p53_p1 }
   0xc   :  { %p56_p4 = pnand %p55_p3, %p49_p0 }
   0xe   :  { %18 = vrot.lane.b32.xlu0 %v17_v4, %s74_s9 }
  0x7c   :  { %v13_v5 = vpop.permute.xlu0 %12   ;;  %v25_v6 = vpop.permute.xlu1 %24  }
  0x7d   :  { %15 = vst.msk [vmem:[#allocation2] sm:$0x1] %vm14_vm1, %v13_v5  }
  0x80   :  { %v19_v7 = vpop.permute.xlu0 %18  }
  0x81   :  { %21 = vst.msk [vmem:[#allocation2] sm:$0x1] %vm20_vm2, %v19_v7  }
  0x82   :  { %27 = vst.msk [vmem:[#allocation2] sm:$0x1] %vm26_vm3, %v25_v6  }
  0x89   :  { %v31_v8 = vld [vmem:[#allocation2] sm:$0x1] }
  0x8a   :  { %33 = vst [vmem:[#allocation0] sm:$0x1] %v31_v8 }
  0x8b   :  { %59 = shalt.err (!%p56_p4)
}
  0x8c   :  { %s60_s16 = scalar_lea.hbm %s102_s1, 16 }
  0x8d   :  { %p61_p5 = scmp.ne.s32.totalorder %s102_s1, %s60_s16  ;;  %p64_p6 = scmp.lt.u32.totalorder %s60_s16, %s102_s1 }
  0x8f   :  { %p66_p7 = pnand %p64_p6, %p61_p5 }
  0x91   :  { %69 = shalt.err (!%p66_p7)
}
  0x92   :  { %41 = dma.vmem_to_hbm [thread:$0]  %s39_s11, 16, %s102_s1, [#allocation1]  }
  0x93   :  { %70 = dma.done.wait [#allocation1], 16  }
  0x94   :  { %71 = vsyncadd [#allocation1], 4294967280 }
  0x95   :  { %43 = vsyncpa [#allocation1], 1 }

// kernel: con_lstm_forward.1
= control target key start
LH: loop header
LB: loop body
LE: loop exit
PB: predicated region body
PF: predicated region fallthrough
CT: control target
= control target key end

     0   :  { %s6726_s0 = inlined_call_operand.hbm [shape: bf16[2,8,70], index: 0, kind: input, shape index: {}]   ;;  %s6727_s1 = inlined_call_operand.hbm [shape: bf16[70,1024], index: 1, kind: input, shape index: {}]   ;;  %s6728_s2 = inlined_call_operand.hbm [shape: f32[1,1024], index: 2, kind: input, shape index: {}]   ;;  %s6729_s3 = inlined_call_operand.hbm [shape: bf16[576,256], index: 3, kind: input, shape index: {}]   ;;  %s6730_s4 = inlined_call_operand.hbm [shape: f32[1,256], index: 4, kind: input, shape index: {}]   ;;  %s6731_s5 = inlined_call_operand.hbm [shape: bf16[224,128], index: 5, kind: input, shape index: {}]   ;;  %s6732_s6 = inlined_call_operand.hbm [shape: f32[1,128], index: 6, kind: input, shape index: {}]   ;;  %s6733_s7 = inlined_call_operand.hbm [shape: bf16[128,256], index: 7, kind: input, shape index: {}]   ;;  %s6734_s8 = inlined_call_operand.hbm [shape: bf16[64,256], index: 8, kind: input, shape index: {}]   ;;  %s6735_s9 = inlined_call_operand.hbm [shape: f32[1,256], index: 9, kind: input, shape index: {}]   ;;  %s6736_s10 = inlined_call_operand.hbm [shape: bf16[64,256], index: 10, kind: input, shape index: {}]   ;;  %s6737_s11 = inlined_call_operand.hbm [shape: bf16[64,256], index: 11, kind: input, shape index: {}]   ;;  %s6738_s12 = inlined_call_operand.hbm [shape: f32[1,256], index: 12, kind: input, shape index: {}]   ;;  %s6739_s13 = inlined_call_operand.hbm [shape: f32[1,64], index: 13, kind: input, shape index: {}]   ;;  %s6740_s14 = inlined_call_operand.<no memory space> [shape: f32[1,1], index: 14, kind: input, shape index: {}]   ;;  %s6741_s15 = inlined_call_operand.hbm [shape: f32[2,8], index: 15, kind: output, shape index: {}]  }
   0x1   :  { %v20_v0 = vstv %s6740_s14 }
   0x2   :  { %21 = vst [vmem:[#allocation3] sm:$0x1] %v20_v0 }
   0x3   :  { %22 = vsyncpa [#allocation5], 0 }
   0x4   :  { %23 = vsyncpa [#allocation8], 0 }
   0x5   :  { %24 = vsyncpa [#allocation11], 0 }
   0x6   :  { %25 = vsyncpa [#allocation14], 0 }
   0x7   :  { %26 = vsyncpa [#allocation17], 0 }
   0x8   :  { %27 = vsyncpa [#allocation20], 0 }
   0x9   :  { %28 = vsyncpa [#allocation23], 0 }
   0xa   :  { %29 = vsyncpa [#allocation26], 0 }
   0xb   :  { %30 = vsyncpa [#allocation6], 0  ;;  %s5693_s20 = smov [#allocation7]   ;;  %s5345_s24 = scalar_lea.hbm %s6727_s1, 4608 }
   0xc   :  { %s48_s21 = sshll.u32 %s5693_s20, 4  ;;  %p5346_p0 = scmp.ne.s32.totalorder %s6727_s1, %s5345_s24  ;;  %s49_s21 = int_to_ptr.vmem [resolvable:$true] %s48_s21 }
   0xd   :  { %p5349_p1 = scmp.lt.u32.totalorder %s5345_s24, %s6727_s1 }
   0xf   :  { %p5351_p2 = pnand %p5349_p1, %p5346_p0 }
  0x11   :  { %5354 = shalt.err (!%p5351_p2)
}
  0x12   :  { %s5355_s28 = scalar_lea.vmem %s49_s21, 4608  ;;  %p5360_p4 = scmp.lt.s32.totalorder %s49_s21, %s49_s21 }
  0x13   :  { %p5356_p3 = scmp.ne.s32.totalorder %s49_s21, %s5355_s28  ;;  %p5361_p5 = scmp.lt.s32.totalorder %s5355_s28, %s5355_s28 }
  0x15   :  { %p5362_p6 = por %p5361_p5, %p5360_p4 }
  0x17   :  { %p5363_p7 = pnand %p5362_p6, %p5356_p3 }
  0x19   :  { %5366 = shalt.err (!%p5363_p7)
}
  0x1a   :  { %s5694_s29 = smov 512   ;;  %s5695_s30 = smov 32  }
  0x1b   :  { %54 = dma.hbm_to_vmem [thread:$0]  %s6727_s1, 4608, %s49_s21, [#allocation8], %s5694_s29, %s5694_s29, %s5695_s30  }
  0x1c   :  { %s5696_s18 = smov [#allocation10]   ;;  %s5367_s23 = scalar_lea.hbm %s6729_s3, 9216 }
  0x1d   :  { %s70_s19 = sshll.u32 %s5696_s18, 4  ;;  %p5368_p8 = scmp.ne.s32.totalorder %s6729_s3, %s5367_s23  ;;  %s71_s19 = int_to_ptr.vmem [resolvable:$true] %s70_s19 }
  0x1e   :  { %p5371_p9 = scmp.lt.u32.totalorder %s5367_s23, %s6729_s3 }
  0x20   :  { %p5373_p10 = pnand %p5371_p9, %p5368_p8 }
  0x22   :  { %5376 = shalt.err (!%p5373_p10)
}
  0x23   :  { %s5377_s27 = scalar_lea.vmem %s71_s19, 9216  ;;  %p5382_p12 = scmp.lt.s32.totalorder %s71_s19, %s71_s19 }
  0x24   :  { %p5378_p11 = scmp.ne.s32.totalorder %s71_s19, %s5377_s27  ;;  %p5383_p13 = scmp.lt.s32.totalorder %s5377_s27, %s5377_s27 }
  0x26   :  { %p5384_p0 = por %p5383_p13, %p5382_p12 }
  0x28   :  { %p5385_p1 = pnand %p5384_p0, %p5378_p11 }
  0x2a   :  { %5388 = shalt.err (!%p5385_p1)
}
  0x2b   :  { %s5697_s1 = smov 128   ;;  %s5698_s21 = smov 8  }
  0x2c   :  { %76 = dma.hbm_to_vmem [thread:$0]  %s6729_s3, 9216, %s71_s19, [#allocation11], %s5697_s1, %s5697_s1, %s5698_s21  }
  0x2d   :  { %s5699_s16 = smov [#allocation13]   ;;  %s5700_s18 = smov [#allocation16]  }
  0x2e   :  { %s92_s17 = sshll.u32 %s5699_s16, 4  ;;  %s114_s20 = sshll.u32 %s5700_s18, 4  ;;  %s93_s17 = int_to_ptr.vmem [resolvable:$true] %s92_s17  ;;  %s5829_s20 = int_to_ptr.vmem [resolvable:$true] %s114_s20 }
  0x2f   :  { %s5389_s24 = scalar_lea.hbm %s6731_s5, 1792 }
  0x30   :  { %p5390_p2 = scmp.ne.s32.totalorder %s6731_s5, %s5389_s24  ;;  %p5393_p3 = scmp.lt.u32.totalorder %s5389_s24, %s6731_s5 }
  0x32   :  { %p5395_p4 = pnand %p5393_p3, %p5390_p2 }
  0x34   :  { %5398 = shalt.err (!%p5395_p4)
}
  0x35   :  { %s5399_s3 = scalar_lea.vmem %s93_s17, 1792  ;;  %p5404_p6 = scmp.lt.s32.totalorder %s93_s17, %s93_s17 }
  0x36   :  { %p5400_p5 = scmp.ne.s32.totalorder %s93_s17, %s5399_s3  ;;  %p5405_p7 = scmp.lt.s32.totalorder %s5399_s3, %s5399_s3 }
  0x38   :  { %p5406_p8 = por %p5405_p7, %p5404_p6 }
  0x3a   :  { %p5407_p9 = pnand %p5406_p8, %p5400_p5 }
  0x3c   :  { %5410 = shalt.err (!%p5407_p9)
}
  0x3d   :  { %s5701_s19 = smov 64   ;;  %s5702_s28 = smov 4  }
  0x3e   :  { %98 = dma.hbm_to_vmem [thread:$0]  %s6731_s5, 1792, %s93_s17, [#allocation14], %s5701_s19, %s5701_s19, %s5702_s28  }
  0x3f   :  { %s5411_s23 = scalar_lea.hbm %s6733_s7, 2048 }
  0x40   :  { %p5412_p10 = scmp.ne.s32.totalorder %s6733_s7, %s5411_s23  ;;  %p5415_p11 = scmp.lt.u32.totalorder %s5411_s23, %s6733_s7 }
  0x42   :  { %p5417_p12 = pnand %p5415_p11, %p5412_p10 }
  0x44   :  { %5420 = shalt.err (!%p5417_p12)
}
  0x45   :  { %s5421_s27 = scalar_lea.vmem %s5829_s20, 2048  ;;  %p5426_p0 = scmp.lt.s32.totalorder %s5829_s20, %s5829_s20 }
  0x46   :  { %p5422_p13 = scmp.ne.s32.totalorder %s5829_s20, %s5421_s27  ;;  %p5427_p1 = scmp.lt.s32.totalorder %s5421_s27, %s5421_s27 }
  0x48   :  { %p5428_p2 = por %p5427_p1, %p5426_p0 }
  0x4a   :  { %p5429_p3 = pnand %p5428_p2, %p5422_p13 }
  0x4c   :  { %5432 = shalt.err (!%p5429_p3)
}
  0x4d   :  { %120 = dma.hbm_to_vmem [thread:$0]  %s6733_s7, 2048, %s5829_s20, [#allocation17], %s5697_s1, %s5697_s1, %s5698_s21  }
  0x4e   :  { %s5703_s3 = smov [#allocation19]   ;;  %s5704_s16 = smov [#allocation22]  }
  0x4f   :  { %s139_s29 = sshll.u32 %s5703_s3, 4  ;;  %s160_s18 = sshll.u32 %s5704_s16, 4  ;;  %s140_s29 = int_to_ptr.vmem [resolvable:$true] %s139_s29  ;;  %s5866_s18 = int_to_ptr.vmem [resolvable:$true] %s160_s18 }
  0x50   :  { %s5433_s24 = scalar_lea.hbm %s6735_s9, 32 }
  0x51   :  { %p5434_p4 = scmp.ne.s32.totalorder %s6735_s9, %s5433_s24  ;;  %p5437_p5 = scmp.lt.u32.totalorder %s5433_s24, %s6735_s9 }
  0x53   :  { %p5439_p6 = pnand %p5437_p5, %p5434_p4 }
  0x55   :  { %5442 = shalt.err (!%p5439_p6)
}
  0x56   :  { %s5443_s7 = scalar_lea.vmem %s140_s29, 32  ;;  %p5448_p8 = scmp.lt.s32.totalorder %s140_s29, %s140_s29 }
  0x57   :  { %p5444_p7 = scmp.ne.s32.totalorder %s140_s29, %s5443_s7  ;;  %p5449_p9 = scmp.lt.s32.totalorder %s5443_s7, %s5443_s7 }
  0x59   :  { %p5450_p10 = por %p5449_p9, %p5448_p8 }
  0x5b   :  { %p5451_p11 = pnand %p5450_p10, %p5444_p7 }
  0x5d   :  { %5454 = shalt.err (!%p5451_p11)
}
  0x5e   :  { %142 = dma.hbm_to_vmem [thread:$0]  %s6735_s9, 32, %s140_s29, [#allocation20]  }
  0x5f   :  { %s5455_s16 = scalar_lea.hbm %s6737_s11, 1024 }
  0x60   :  { %p5456_p12 = scmp.ne.s32.totalorder %s6737_s11, %s5455_s16  ;;  %p5459_p13 = scmp.lt.u32.totalorder %s5455_s16, %s6737_s11 }
  0x62   :  { %p5461_p0 = pnand %p5459_p13, %p5456_p12 }
  0x64   :  { %5464 = shalt.err (!%p5461_p0)
}
  0x65   :  { %s5465_s26 = scalar_lea.vmem %s5866_s18, 1024  ;;  %p5470_p2 = scmp.lt.s32.totalorder %s5866_s18, %s5866_s18 }
  0x66   :  { %p5466_p1 = scmp.ne.s32.totalorder %s5866_s18, %s5465_s26  ;;  %p5471_p3 = scmp.lt.s32.totalorder %s5465_s26, %s5465_s26 }
  0x68   :  { %p5472_p4 = por %p5471_p3, %p5470_p2 }
  0x6a   :  { %p5473_p5 = pnand %p5472_p4, %p5466_p1 }
  0x6c   :  { %5476 = shalt.err (!%p5473_p5)
}
  0x6d   :  { %166 = dma.hbm_to_vmem [thread:$0]  %s6737_s11, 1024, %s5866_s18, [#allocation23], %s5697_s1, %s5697_s1, %s5698_s21  }
  0x6e   :  { %s5705_s14 = smov [#allocation4]   ;;  %s5706_s7 = smov [#allocation9]  }
  0x6f   :  { %s36_s27 = sshll.u32 %s5705_s14, 4  ;;  %s61_s20 = sshll.u32 %s5706_s7, 4  ;;  %s37_s27 = int_to_ptr.vmem [resolvable:$true] %s36_s27  ;;  %s62_s20 = int_to_ptr.vmem [resolvable:$true] %s61_s20 }
  0x70   :  { %s5477_s3 = scalar_lea.hbm %s6726_s0, 128 }
  0x71   :  { %p5478_p6 = scmp.ne.s32.totalorder %s6726_s0, %s5477_s3  ;;  %p5481_p7 = scmp.lt.u32.totalorder %s5477_s3, %s6726_s0 }
  0x73   :  { %p5483_p8 = pnand %p5481_p7, %p5478_p6 }
  0x75   :  { %5486 = shalt.err (!%p5483_p8)
}
  0x76   :  { %s5487_s11 = scalar_lea.vmem %s37_s27, 128  ;;  %p5492_p10 = scmp.lt.s32.totalorder %s37_s27, %s37_s27 }
  0x77   :  { %p5488_p9 = scmp.ne.s32.totalorder %s37_s27, %s5487_s11  ;;  %p5493_p11 = scmp.lt.s32.totalorder %s5487_s11, %s5487_s11 }
  0x79   :  { %p5494_p12 = por %p5493_p11, %p5492_p10 }
  0x7b   :  { %p5495_p13 = pnand %p5494_p12, %p5488_p9 }
  0x7d   :  { %5498 = shalt.err (!%p5495_p13)
}
  0x7e   :  { %42 = dma.hbm_to_vmem [thread:$0]  %s6726_s0, 128, %s37_s27, [#allocation5], %s5701_s19, %s5701_s19, %s5702_s28  }
  0x7f   :  { %s5499_s29 = scalar_lea.hbm %s6728_s2, 128 }
  0x80   :  { %p5500_p0 = scmp.ne.s32.totalorder %s6728_s2, %s5499_s29  ;;  %p5503_p1 = scmp.lt.u32.totalorder %s5499_s29, %s6728_s2 }
  0x82   :  { %p5505_p2 = pnand %p5503_p1, %p5500_p0 }
  0x84   :  { %5508 = shalt.err (!%p5505_p2)
}
  0x85   :  { %s5509_s3 = scalar_lea.vmem %s62_s20, 128  ;;  %p5514_p4 = scmp.lt.s32.totalorder %s62_s20, %s62_s20 }
  0x86   :  { %p5510_p3 = scmp.ne.s32.totalorder %s62_s20, %s5509_s3  ;;  %p5515_p5 = scmp.lt.s32.totalorder %s5509_s3, %s5509_s3 }
  0x88   :  { %p5516_p6 = por %p5515_p5, %p5514_p4 }
  0x8a   :  { %p5517_p7 = pnand %p5516_p6, %p5510_p3 }
  0x8c   :  { %5520 = shalt.err (!%p5517_p7)
}
  0x8d   :  { %64 = dma.hbm_to_vmem [thread:$0]  %s6728_s2, 128, %s62_s20, [#allocation8]  }
  0x8e   :  { %s5707_s27 = smov [#allocation12]   ;;  %s5708_s22 = smov [#allocation15]  }
  0x8f   :  { %s83_s16 = sshll.u32 %s5707_s27, 4  ;;  %s105_s23 = sshll.u32 %s5708_s22, 4  ;;  %s84_s16 = int_to_ptr.vmem [resolvable:$true] %s83_s16  ;;  %s106_s23 = int_to_ptr.vmem [resolvable:$true] %s105_s23 }
  0x90   :  { %s5521_s18 = scalar_lea.hbm %s6730_s4, 32 }
  0x91   :  { %p5522_p8 = scmp.ne.s32.totalorder %s6730_s4, %s5521_s18  ;;  %p5525_p9 = scmp.lt.u32.totalorder %s5521_s18, %s6730_s4 }
  0x93   :  { %p5527_p10 = pnand %p5525_p9, %p5522_p8 }
  0x95   :  { %5530 = shalt.err (!%p5527_p10)
}
  0x96   :  { %s5531_s2 = scalar_lea.vmem %s84_s16, 32  ;;  %p5536_p12 = scmp.lt.s32.totalorder %s84_s16, %s84_s16 }
  0x97   :  { %p5532_p11 = scmp.ne.s32.totalorder %s84_s16, %s5531_s2  ;;  %p5537_p13 = scmp.lt.s32.totalorder %s5531_s2, %s5531_s2 }
  0x99   :  { %p5538_p0 = por %p5537_p13, %p5536_p12 }
  0x9b   :  { %p5539_p1 = pnand %p5538_p0, %p5532_p11 }
  0x9d   :  { %5542 = shalt.err (!%p5539_p1)
}
  0x9e   :  { %86 = dma.hbm_to_vmem [thread:$0]  %s6730_s4, 32, %s84_s16, [#allocation11]  }
  0x9f   :  { %s5543_s17 = scalar_lea.hbm %s6732_s6, 16 }
  0xa0   :  { %p5544_p2 = scmp.ne.s32.totalorder %s6732_s6, %s5543_s17  ;;  %p5547_p3 = scmp.lt.u32.totalorder %s5543_s17, %s6732_s6 }
  0xa2   :  { %p5549_p4 = pnand %p5547_p3, %p5544_p2 }
  0xa4   :  { %5552 = shalt.err (!%p5549_p4)
}
  0xa5   :  { %s5553_s22 = scalar_lea.vmem %s106_s23, 16  ;;  %s5557_s24 = scalar_lea.vmem %s106_s23, 32 }
  0xa6   :  { %p5554_p5 = scmp.ne.s32.totalorder %s106_s23, %s5553_s22  ;;  %p5558_p6 = scmp.lt.s32.totalorder %s106_s23, %s106_s23 }
  0xa7   :  { %p5559_p7 = scmp.lt.s32.totalorder %s5557_s24, %s5553_s22 }
  0xa9   :  { %p5560_p8 = por %p5559_p7, %p5558_p6 }
  0xab   :  { %p5561_p9 = pnand %p5560_p8, %p5554_p5 }
  0xad   :  { %5564 = shalt.err (!%p5561_p9)
}
  0xae   :  { %108 = dma.hbm_to_vmem [thread:$0]  %s6732_s6, 16, %s106_s23, [#allocation14]  }
  0xaf   :  { %s5709_s11 = smov [#allocation18]   ;;  %s5710_s25 = smov [#allocation21]  }
  0xb0   :  { %s126_s18 = sshll.u32 %s5709_s11, 4  ;;  %s148_s26 = sshll.u32 %s5710_s25, 4  ;;  %s127_s18 = int_to_ptr.vmem [resolvable:$true] %s126_s18  ;;  %s5951_s26 = int_to_ptr.vmem [resolvable:$true] %s148_s26 }
  0xb1   :  { %s5565_s2 = scalar_lea.hbm %s6734_s8, 1024 }
  0xb2   :  { %p5566_p10 = scmp.ne.s32.totalorder %s6734_s8, %s5565_s2  ;;  %p5569_p11 = scmp.lt.u32.totalorder %s5565_s2, %s6734_s8 }
  0xb4   :  { %p5571_p12 = pnand %p5569_p11, %p5566_p10 }
  0xb6   :  { %5574 = shalt.err (!%p5571_p12)
}
  0xb7   :  { %s5575_s6 = scalar_lea.vmem %s127_s18, 1024  ;;  %p5580_p0 = scmp.lt.s32.totalorder %s127_s18, %s127_s18 }
  0xb8   :  { %p5576_p13 = scmp.ne.s32.totalorder %s127_s18, %s5575_s6  ;;  %p5581_p1 = scmp.lt.s32.totalorder %s5575_s6, %s5575_s6 }
  0xba   :  { %p5582_p2 = por %p5581_p1, %p5580_p0 }
  0xbc   :  { %p5583_p3 = pnand %p5582_p2, %p5576_p13 }
  0xbe   :  { %5586 = shalt.err (!%p5583_p3)
}
  0xbf   :  { %132 = dma.hbm_to_vmem [thread:$0]  %s6734_s8, 1024, %s127_s18, [#allocation17], %s5697_s1, %s5697_s1, %s5698_s21  }
  0xc0   :  { %s5587_s28 = scalar_lea.hbm %s6736_s10, 1024 }
  0xc1   :  { %p5588_p4 = scmp.ne.s32.totalorder %s6736_s10, %s5587_s28  ;;  %p5591_p5 = scmp.lt.u32.totalorder %s5587_s28, %s6736_s10 }
  0xc3   :  { %p5593_p6 = pnand %p5591_p5, %p5588_p4 }
  0xc5   :  { %5596 = shalt.err (!%p5593_p6)
}
  0xc6   :  { %s5597_s16 = scalar_lea.vmem %s5951_s26, 1024  ;;  %p5602_p8 = scmp.lt.s32.totalorder %s5951_s26, %s5951_s26 }
  0xc7   :  { %p5598_p7 = scmp.ne.s32.totalorder %s5951_s26, %s5597_s16  ;;  %p5603_p9 = scmp.lt.s32.totalorder %s5597_s16, %s5597_s16 }
  0xc9   :  { %p5604_p10 = por %p5603_p9, %p5602_p8 }
  0xcb   :  { %p5605_p11 = pnand %p5604_p10, %p5598_p7 }
  0xcd   :  { %5608 = shalt.err (!%p5605_p11)
}
  0xce   :  { %154 = dma.hbm_to_vmem [thread:$0]  %s6736_s10, 1024, %s5951_s26, [#allocation20], %s5697_s1, %s5697_s1, %s5698_s21  }
  0xcf   :  { %s5711_s18 = smov [#allocation24]   ;;  %s5712_s9 = smov [#allocation25]  }
  0xd0   :  { %s173_s25 = sshll.u32 %s5711_s18, 4  ;;  %s183_s29 = sshll.u32 %s5712_s9, 4  ;;  %s174_s25 = int_to_ptr.vmem [resolvable:$true] %s173_s25  ;;  %s184_s29 = int_to_ptr.vmem [resolvable:$true] %s183_s29 }
  0xd1   :  { %s5609_s14 = scalar_lea.hbm %s6738_s12, 32 }
  0xd2   :  { %p5610_p12 = scmp.ne.s32.totalorder %s6738_s12, %s5609_s14  ;;  %p5613_p13 = scmp.lt.u32.totalorder %s5609_s14, %s6738_s12 }
  0xd4   :  { %p5615_p0 = pnand %p5613_p13, %p5610_p12 }
  0xd6   :  { %5618 = shalt.err (!%p5615_p0)
}
  0xd7   :  { %s5619_s10 = scalar_lea.vmem %s174_s25, 32  ;;  %p5624_p2 = scmp.lt.s32.totalorder %s174_s25, %s174_s25 }
  0xd8   :  { %p5620_p1 = scmp.ne.s32.totalorder %s174_s25, %s5619_s10  ;;  %p5625_p3 = scmp.lt.s32.totalorder %s5619_s10, %s5619_s10 }
  0xda   :  { %p5626_p4 = por %p5625_p3, %p5624_p2 }
  0xdc   :  { %p5627_p5 = pnand %p5626_p4, %p5620_p1 }
  0xde   :  { %5630 = shalt.err (!%p5627_p5)
}
  0xdf   :  { %176 = dma.hbm_to_vmem [thread:$0]  %s6738_s12, 32, %s174_s25, [#allocation23]  }
  0xe0   :  { %s5631_s3 = scalar_lea.hbm %s6739_s13, 16 }
  0xe1   :  { %p5632_p6 = scmp.ne.s32.totalorder %s6739_s13, %s5631_s3  ;;  %p5635_p7 = scmp.lt.u32.totalorder %s5631_s3, %s6739_s13 }
  0xe3   :  { %p5637_p8 = pnand %p5635_p7, %p5632_p6 }
  0xe5   :  { %5640 = shalt.err (!%p5637_p8)
}
  0xe6   :  { %s5641_s24 = scalar_lea.vmem %s184_s29, 16  ;;  %s5645_s4 = scalar_lea.vmem %s184_s29, 32 }
  0xe7   :  { %p5642_p9 = scmp.ne.s32.totalorder %s184_s29, %s5641_s24  ;;  %p5646_p10 = scmp.lt.s32.totalorder %s184_s29, %s184_s29 }
  0xe8   :  { %p5647_p11 = scmp.lt.s32.totalorder %s5645_s4, %s5641_s24 }
  0xea   :  { %p5648_p12 = por %p5647_p11, %p5646_p10 }
  0xec   :  { %p5649_p13 = pnand %p5648_p12, %p5642_p9 }
  0xee   :  { %5652 = shalt.err (!%p5649_p13)
}
  0xef   :  { %186 = dma.hbm_to_vmem [thread:$0]  %s6739_s13, 16, %s184_s29, [#allocation26]  }
  0xf0   :  { %5675 = dma.done.wait [#allocation5], 128  }
  0xf1   :  { %5676 = vsyncadd [#allocation5], 4294967168 }
  0xf2   :  { %5677 = dma.done.wait [#allocation8], 4736  }
  0xf3   :  { %5678 = vsyncadd [#allocation8], 4294962560 }
  0xf4   :  { %5679 = dma.done.wait [#allocation11], 9248  }
  0xf5   :  { %5680 = vsyncadd [#allocation11], 4294958048 }
  0xf6   :  { %5681 = dma.done.wait [#allocation14], 1808  }
  0xf7   :  { %5682 = vsyncadd [#allocation14], 4294965488 }
  0xf8   :  { %5683 = dma.done.wait [#allocation17], 3072  }
  0xf9   :  { %5684 = vsyncadd [#allocation17], 4294964224 }
  0xfa   :  { %5685 = dma.done.wait [#allocation20], 1056  }
  0xfb   :  { %5686 = vsyncadd [#allocation20], 4294966240 }
  0xfc   :  { %5687 = dma.done.wait [#allocation23], 1056  }
  0xfd   :  { %5688 = vsyncadd [#allocation23], 4294966240 }
  0xfe   :  { %5689 = dma.done.wait [#allocation26], 16  }
  0xff   :  { %5690 = vsyncadd [#allocation26], 4294967280  ;;  %v5713_v1 = vmov 0   ;;  %v234_v2 = vld [vmem:[#allocation7] sm:$0xff]  ;;  %v235_v4 = vld [vmem:[#allocation7 + $0x8] sm:$0xff]  ;;  %vm459_vm0 = vcmask 1042432  }
 0x100   :  { %559 = vmatprep.mubr.bf16.mxu1 %v5713_v1  ;;  %516 = vmatprep.mubr.bf16.mxu0 %v5713_v1  ;;  %v238_v3 = vld [vmem:[#allocation7 + $0x20] sm:$0xff]  ;;  %v239_v6 = vld [vmem:[#allocation7 + $0x28] sm:$0xff]  ;;  %v236_v35 = vld [vmem:[#allocation7 + $0x10] sm:$0xff]  ;;  %vm455_vm1 = vcmask 572416   ;;  %vm782_vm4 = vcmask 261120   ;;  %vm1280_vm5 = vcmask 523264  }
 0x101   :  { %4860 = vset.pattern.permute.xlu1 %v5713_v1  ;;  %4861 = vset.pattern.permute.xlu0 %v5713_v1  ;;  %v4534_v5 = vcombine.high %v234_v2, %v238_v3  ;;  %v4533_v7 = vcombine.low %v234_v2, %v238_v3  ;;  %v242_v8 = vld [vmem:[#allocation7 + $0x40] sm:$0xff]  ;;  %v4536_v10 = vcombine.high %v235_v4, %v239_v6  ;;  %v243_v13 = vld [vmem:[#allocation7 + $0x48] sm:$0xff]  ;;  %v240_v36 = vld [vmem:[#allocation7 + $0x30] sm:$0xff]  ;;  %vm1590_vm6 = vcmask 785408   ;;  %s5717_s13 = smov [#allocation27]  }
 0x102   :  { %v246_v9 = vld [vmem:[#allocation7 + $0x60] sm:$0xff]  ;;  %v4535_v11 = vcombine.low %v235_v4, %v239_v6  ;;  %v247_v14 = vld [vmem:[#allocation7 + $0x68] sm:$0xff]  ;;  %v237_v40 = vld [vmem:[#allocation7 + $0x18] sm:$0xff]  ;;  %v4538_v48 = vcombine.high %v236_v35, %v240_v36  ;;  %v4537_v53 = vcombine.low %v236_v35, %v240_v36  ;;  %vm2020_vm7 = vcmask 1041409  }
 0x103   :  { %v4542_v12 = vcombine.high %v242_v8, %v246_v9  ;;  %v250_v15 = vld [vmem:[#allocation7 + $0x80] sm:$0xff]  ;;  %484 = vmatprep.subr.bf16.mxu0 %v4534_v5  ;;  %v4544_v16 = vcombine.high %v243_v13, %v247_v14  ;;  %v251_v18 = vld [vmem:[#allocation7 + $0x88] sm:$0xff]  ;;  %527 = vmatprep.subr.bf16.mxu1 %v4536_v10  ;;  %v4541_v20 = vcombine.low %v242_v8, %v246_v9  ;;  %v241_v41 = vld [vmem:[#allocation7 + $0x38] sm:$0xff]  ;;  %vm2040_vm8 = vcmask 516096  }
 0x104   :  { %v254_v17 = vld [vmem:[#allocation7 + $0xa0] sm:$0xff]  ;;  %v255_v19 = vld [vmem:[#allocation7 + $0xa8] sm:$0xff]  ;;  %485 = vmatpush1.bf16.msra.mxu0 %v4533_v7  ;;  %528 = vmatpush1.bf16.msra.mxu1 %v4535_v11  ;;  %v4543_v21 = vcombine.low %v243_v13, %v247_v14  ;;  %v244_v44 = vld [vmem:[#allocation7 + $0x50] sm:$0xff]  ;;  %v4540_v52 = vcombine.high %v237_v40, %v241_v41  ;;  %v4539_v56 = vcombine.low %v237_v40, %v241_v41  ;;  %vm3815_vm9 = vcmask 517120  }
 0x105   :  { %486 = vmatprep.subr.bf16.mxu0 %v4542_v12  ;;  %v4550_v22 = vcombine.high %v250_v15, %v254_v17  ;;  %v258_v23 = vld [vmem:[#allocation7 + $0xc0] sm:$0xff]  ;;  %529 = vmatprep.subr.bf16.mxu1 %v4544_v16  ;;  %v4552_v24 = vcombine.high %v251_v18, %v255_v19  ;;  %v259_v26 = vld [vmem:[#allocation7 + $0xc8] sm:$0xff]  ;;  %v4549_v28 = vcombine.low %v250_v15, %v254_v17  ;;  %v248_v45 = vld [vmem:[#allocation7 + $0x70] sm:$0xff]  ;;  %vm4477_vm10 = vcmask 7168  }
 0x106   :  { %v262_v25 = vld [vmem:[#allocation7 + $0xe0] sm:$0xff]  ;;  %v263_v27 = vld [vmem:[#allocation7 + $0xe8] sm:$0xff]  ;;  %v4551_v29 = vcombine.low %v251_v18, %v255_v19  ;;  %v6018_v47 = vld [vmem:[#allocation4] sm:$0xff]   ;;  %v4546_v57 = vcombine.high %v244_v44, %v248_v45  ;;  %v4545_v61 = vcombine.low %v244_v44, %v248_v45  ;;  %vm4479_vm11 = vcmask 15360  }
 0x107   :  { %v4558_v30 = vcombine.high %v258_v23, %v262_v25  ;;  %v4560_v31 = vcombine.high %v259_v26, %v263_v27  ;;  %v266_v32 = vld [vmem:[#allocation7 + $0x100] sm:$0x77]  ;;  %v267_v33 = vld [vmem:[#allocation7 + $0x108] sm:$0x77]  ;;  %v4557_v34 = vcombine.low %v258_v23, %v262_v25  ;;  %v4559_v37 = vcombine.low %v259_v26, %v263_v27  ;;  %v245_v49 = vld [vmem:[#allocation7 + $0x58] sm:$0xff] }
 0x108   :  { %487 = vmatpush1.bf16.msra.mxu0 %v4541_v20  ;;  %530 = vmatpush1.bf16.msra.mxu1 %v4543_v21  ;;  %v4566_v38 = vcombine.high %v266_v32, %v266_v32  ;;  %v4565_v39 = vcombine.low %v266_v32, %v266_v32  ;;  %v4568_v42 = vcombine.high %v267_v33, %v267_v33  ;;  %v249_v50 = vld [vmem:[#allocation7 + $0x78] sm:$0xff]  ;;  %v252_v54 = vld [vmem:[#allocation7 + $0x90] sm:$0xff]  ;;  %vm4481_vm12 = vcmask 23552  }
 0x109   :  { %488 = vmatprep.subr.bf16.mxu0 %v4550_v22  ;;  %531 = vmatprep.subr.bf16.mxu1 %v4552_v24  ;;  %v4567_v43 = vcombine.low %v267_v33, %v267_v33  ;;  %v256_v55 = vld [vmem:[#allocation7 + $0xb0] sm:$0xff]  ;;  %v253_v58 = vld [vmem:[#allocation7 + $0x98] sm:$0xff]  ;;  %v4548_v60 = vcombine.high %v245_v49, %v249_v50  ;;  %v4547_v0 = vcombine.low %v245_v49, %v249_v50  ;;  %vm4483_vm13 = vcmask 31744  }
 0x10a   :  { %v461_v46 = vsel %vm459_vm0, %v4565_v39, 0  ;;  %v257_v59 = vld [vmem:[#allocation7 + $0xb8] sm:$0xff]  ;;  %v260_v62 = vld [vmem:[#allocation7 + $0xd0] sm:$0xff]  ;;  %v4554_v2 = vcombine.high %v252_v54, %v256_v55  ;;  %v4553_v8 = vcombine.low %v252_v54, %v256_v55  ;;  %vm4485_vm14 = vcmask 39936  }
 0x10b   :  { %v467_v51 = vsel %vm459_vm0, %v4567_v43, 0  ;;  %v264_v63 = vld [vmem:[#allocation7 + $0xf0] sm:$0xff]  ;;  %v261_v3 = vld [vmem:[#allocation7 + $0xd8] sm:$0xff]  ;;  %v4556_v5 = vcombine.high %v253_v58, %v257_v59  ;;  %v4555_v9 = vcombine.low %v253_v58, %v257_v59  ;;  %vm4487_vm15 = vcmask 48128  }
 0x10c   :  { %489 = vmatpush1.bf16.msra.mxu0 %v4549_v28  ;;  %532 = vmatpush1.bf16.msra.mxu1 %v4551_v29  ;;  %v265_v4 = vld [vmem:[#allocation7 + $0xf8] sm:$0xff]  ;;  %v268_v6 = vld [vmem:[#allocation7 + $0x110] sm:$0x77]  ;;  %v4562_v10 = vcombine.high %v260_v62, %v264_v63  ;;  %v4561_v12 = vcombine.low %v260_v62, %v264_v63 }
 0x10d   :  { %490 = vmatprep.subr.bf16.mxu0 %v4558_v30  ;;  %533 = vmatprep.subr.bf16.mxu1 %v4560_v31  ;;  %v269_v7 = vld [vmem:[#allocation7 + $0x118] sm:$0x77]  ;;  %v4564_v11 = vcombine.high %v261_v3, %v265_v4  ;;  %v4569_v13 = vcombine.low %v268_v6, %v268_v6  ;;  %v4563_v15 = vcombine.low %v261_v3, %v265_v4  ;;  %v4871_v20 = vld [vmem:[#allocation10] ss:$8 sps:$4 sm:$0xff]   ;;  %v4873_v21 = vld [vmem:[#allocation10 + $0x4] ss:$8 sps:$4 sm:$0xff]  }
 0x10e   :  { %v4571_v14 = vcombine.low %v269_v7, %v269_v7  ;;  %v4570_v16 = vcombine.high %v268_v6, %v268_v6  ;;  %v4572_v17 = vcombine.high %v269_v7, %v269_v7  ;;  %v4876_v22 = vld [vmem:[#allocation10 + $0x14] ss:$8 sps:$4 sm:$0xff]   ;;  %v4874_v23 = vld [vmem:[#allocation10 + $0x10] ss:$8 sps:$4 sm:$0xff]   ;;  %v4879_v24 = vld [vmem:[#allocation10 + $0x24] ss:$8 sps:$4 sm:$0xff]  }
 0x10f   :  { %v473_v18 = vsel %vm459_vm0, %v4569_v13, 0  ;;  %v4877_v25 = vld [vmem:[#allocation10 + $0x20] ss:$8 sps:$4 sm:$0xff]   ;;  %v4882_v26 = vld [vmem:[#allocation10 + $0x34] ss:$8 sps:$4 sm:$0xff]  }
 0x110   :  { %491 = vmatpush1.bf16.msra.mxu0 %v4557_v34  ;;  %534 = vmatpush1.bf16.msra.mxu1 %v4559_v37  ;;  %v479_v19 = vsel %vm459_vm0, %v4571_v14, 0  ;;  %v4880_v27 = vld [vmem:[#allocation10 + $0x30] ss:$8 sps:$4 sm:$0xff]   ;;  %v4885_v28 = vld [vmem:[#allocation10 + $0x44] ss:$8 sps:$4 sm:$0xff]  }
 0x111   :  { %4573 = vmatprep.subr.msk.bf16.mxu0 %vm459_vm0, %v4566_v38  ;;  %4575 = vmatprep.subr.msk.bf16.mxu1 %vm459_vm0, %v4568_v42  ;;  %v4883_v29 = vld [vmem:[#allocation10 + $0x40] ss:$8 sps:$4 sm:$0xff]   ;;  %v4888_v30 = vld [vmem:[#allocation10 + $0x54] ss:$8 sps:$4 sm:$0xff]   ;;  %v4886_v31 = vld [vmem:[#allocation10 + $0x50] ss:$8 sps:$4 sm:$0xff]  }
 0x112   :  { %v4891_v32 = vld [vmem:[#allocation10 + $0x64] ss:$8 sps:$4 sm:$0xff]   ;;  %v4889_v33 = vld [vmem:[#allocation10 + $0x60] ss:$8 sps:$4 sm:$0xff]   ;;  %v4894_v34 = vld [vmem:[#allocation10 + $0x74] ss:$8 sps:$4 sm:$0xff]  }
 0x113   :  { %v4892_v35 = vld [vmem:[#allocation10 + $0x70] ss:$8 sps:$4 sm:$0xff]   ;;  %v4897_v36 = vld [vmem:[#allocation10 + $0x84] ss:$8 sps:$4 sm:$0xff]   ;;  %v4895_v37 = vld [vmem:[#allocation10 + $0x80] ss:$8 sps:$4 sm:$0xff]  }
 0x114   :  { %493 = vmatpush1.bf16.msra.mxu0 %v461_v46  ;;  %536 = vmatpush1.bf16.msra.mxu1 %v467_v51  ;;  %v4900_v38 = vld [vmem:[#allocation10 + $0x94] ss:$8 sps:$4 sm:$0xff]   ;;  %v4898_v39 = vld [vmem:[#allocation10 + $0x90] ss:$8 sps:$4 sm:$0xff]   ;;  %v4903_v40 = vld [vmem:[#allocation10 + $0xa4] ss:$8 sps:$4 sm:$0xff]  }
 0x115   :  { %570 = vmatprep.subr.bf16.mxu0 %v4538_v48  ;;  %613 = vmatprep.subr.bf16.mxu1 %v4540_v52  ;;  %v4901_v41 = vld [vmem:[#allocation10 + $0xa0] ss:$8 sps:$4 sm:$0xff]   ;;  %v4906_v42 = vld [vmem:[#allocation10 + $0xb4] ss:$8 sps:$4 sm:$0xff]   ;;  %v4904_v43 = vld [vmem:[#allocation10 + $0xb0] ss:$8 sps:$4 sm:$0xff]   ;;  %v658_v48 = vlaneseq }
 0x116   :  { %v4909_v44 = vld [vmem:[#allocation10 + $0xc4] ss:$8 sps:$4 sm:$0xff]   ;;  %v4907_v45 = vld [vmem:[#allocation10 + $0xc0] ss:$8 sps:$4 sm:$0xff]   ;;  %v4912_v46 = vld [vmem:[#allocation10 + $0xd4] ss:$8 sps:$4 sm:$0xff]  }
 0x117   :  { %4574 = vmatmul.mubr.msk.bf16.vlgmr.msra.gmra.mrb[0].mxu0 %vm455_vm1, %v6018_v47  ;;  %4576 = vmatmul.mubr.msk.bf16.vlgmr.msra.gmra.mrb[0].mxu1 %vm455_vm1, %v6018_v47 }
 0x118   :  { %571 = vmatpush1.bf16.msra.mxu0 %v4537_v53  ;;  %614 = vmatpush1.bf16.msra.mxu1 %v4539_v56  ;;  %v6037_v56 = vshrl.u32 %v658_v48, 7 }
 0x119   :  { %572 = vmatprep.subr.bf16.mxu0 %v4546_v57  ;;  %615 = vmatprep.subr.bf16.mxu1 %v4548_v60  ;;  %v656_v60 = vld [vmem:[#allocation9] sm:$0xff] }
 0x11a   :  { %602 = vmatprep.mubr.bf16.mxu0 %v5713_v1  ;;  %645 = vmatprep.mubr.bf16.mxu1 %v5713_v1  ;;  %v668_v58 = vsub.s32 2, %v6037_v56  ;;  %v6041_v59 = vsub.s32 0, %v6037_v56  ;;  %v6045_v62 = vsub.s32 1, %v6037_v56  ;;  %v676_v4 = vsub.s32 4, %v6037_v56 }
 0x11b   :  { %v680_v6 = vsub.s32 5, %v6037_v56  ;;  %v688_v7 = vsub.s32 7, %v6037_v56 }
 0x11c   :  { %573 = vmatpush1.bf16.msra.mxu0 %v4545_v61  ;;  %616 = vmatpush1.bf16.msra.mxu1 %v4547_v0  ;;  %v672_v61 = vsub.s32 3, %v6037_v56  ;;  %v669_v63 = vrot.slane %v656_v60, %v668_v58  ;;  %v661_v0 = vrot.slane %v656_v60, %v6041_v59  ;;  %v665_v3 = vrot.slane %v656_v60, %v6045_v62 }
 0x11d   :  { %574 = vmatprep.subr.bf16.mxu0 %v4554_v2  ;;  %617 = vmatprep.subr.bf16.mxu1 %v4556_v5  ;;  %v684_v5 = vsub.s32 6, %v6037_v56  ;;  %v677_v13 = vrot.slane %v656_v60, %v676_v4 }
 0x11e   :  { %v673_v2 = vrot.slane %v656_v60, %v672_v61 }
 0x120   :  { %575 = vmatpush1.bf16.msra.mxu0 %v4553_v8  ;;  %618 = vmatpush1.bf16.msra.mxu1 %v4555_v9 }
 0x121   :  { %576 = vmatprep.subr.bf16.mxu0 %v4562_v10  ;;  %619 = vmatprep.subr.bf16.mxu1 %v4564_v11 }
 0x124   :  { %577 = vmatpush1.bf16.msra.mxu0 %v4561_v12  ;;  %620 = vmatpush1.bf16.msra.mxu1 %v4563_v15 }
 0x125   :  { %4577 = vmatprep.subr.msk.bf16.mxu0 %vm459_vm0, %v4570_v16  ;;  %4579 = vmatprep.subr.msk.bf16.mxu1 %vm459_vm0, %v4572_v17  ;;  %v685_v16 = vrot.slane %v656_v60, %v684_v5  ;;  %v681_v17 = vrot.slane %v656_v60, %v680_v6  ;;  %vm4489_vm0 = vcmask 56320  }
 0x128   :  { %579 = vmatpush1.bf16.msra.mxu0 %v473_v18  ;;  %622 = vmatpush1.bf16.msra.mxu1 %v479_v19  ;;  %v689_v19 = vrot.slane %v656_v60, %v688_v7 }
 0x129   :  { %1594 = vmatprep.subr.bf16.mxu1 %v5713_v1  ;;  %1284 = vmatprep.subr.bf16.mxu0 %v4873_v21 }
 0x12b   :  { %4578 = vmatmul.mubr.msk.bf16.vlgmr.msra.gmra.mrb[4].mxu0 %vm455_vm1, %v6018_v47  ;;  %4580 = vmatmul.mubr.msk.bf16.vlgmr.msra.gmra.mrb[4].mxu1 %vm455_vm1, %v6018_v47  ;;  %v4910_v47 = vld [vmem:[#allocation10 + $0xd0] ss:$8 sps:$4 sm:$0xff]   ;;  %vm4508_vm1 = vcmask 58368  }
 0x12c   :  { %1285 = vmatpush1.bf16.msra.mxu0 %v4871_v20  ;;  %v4915_v20 = vld [vmem:[#allocation10 + $0xe4] ss:$8 sps:$4 sm:$0xff]  }
 0x12d   :  { %1286 = vmatprep.subr.bf16.mxu0 %v4876_v22 }
 0x130   :  { %1287 = vmatpush1.bf16.msra.mxu0 %v4874_v23 }
 0x131   :  { %1288 = vmatprep.subr.bf16.mxu0 %v4879_v24  ;;  %v6054_v24 = vadd.s32 1, %v6037_v56 }
 0x133   :  { %vm760_vm2 = vcmp.lt.s32.totalorder %v6054_v24, 8 }
 0x134   :  { %1289 = vmatpush1.bf16.msra.mxu0 %v4877_v25  ;;  %v4913_v25 = vld [vmem:[#allocation10 + $0xe0] ss:$8 sps:$4 sm:$0xff]  }
 0x135   :  { %1290 = vmatprep.subr.bf16.mxu0 %v4882_v26 }
 0x138   :  { %1291 = vmatpush1.bf16.msra.mxu0 %v4880_v27 }
 0x139   :  { %1292 = vmatprep.subr.bf16.mxu0 %v4885_v28 }
 0x13c   :  { %1293 = vmatpush1.bf16.msra.mxu0 %v4883_v29 }
 0x13d   :  { %1294 = vmatprep.subr.bf16.mxu0 %v4888_v30 }
 0x140   :  { %1295 = vmatpush1.bf16.msra.mxu0 %v4886_v31 }
 0x141   :  { %1296 = vmatprep.subr.bf16.mxu0 %v4891_v32 }
 0x144   :  { %1297 = vmatpush1.bf16.msra.mxu0 %v4889_v33 }
 0x145   :  { %1298 = vmatprep.subr.bf16.mxu0 %v4894_v34 }
 0x148   :  { %1299 = vmatpush1.bf16.msra.mxu0 %v4892_v35 }
 0x149   :  { %1300 = vmatprep.subr.bf16.mxu0 %v4897_v36 }
 0x14c   :  { %1301 = vmatpush1.bf16.msra.mxu0 %v4895_v37 }
 0x14d   :  { %1302 = vmatprep.subr.bf16.mxu0 %v4900_v38 }
 0x150   :  { %1303 = vmatpush1.bf16.msra.mxu0 %v4898_v39 }
 0x151   :  { %1304 = vmatprep.subr.bf16.mxu0 %v4903_v40 }
 0x154   :  { %1305 = vmatpush1.bf16.msra.mxu0 %v4901_v41 }
 0x155   :  { %1306 = vmatprep.subr.bf16.mxu0 %v4906_v42 }
 0x158   :  { %1307 = vmatpush1.bf16.msra.mxu0 %v4904_v43 }
 0x159   :  { %1308 = vmatprep.subr.bf16.mxu0 %v4909_v44  ;;  %v4918_v44 = vld [vmem:[#allocation10 + $0xf4] ss:$8 sps:$4 sm:$0xff]  }
 0x15c   :  { %1309 = vmatpush1.bf16.msra.mxu0 %v4907_v45 }
 0x15d   :  { %1310 = vmatprep.subr.bf16.mxu0 %v4912_v46 }
 0x160   :  { %1311 = vmatpush1.bf16.msra.mxu0 %v4910_v47 }
 0x161   :  { %1312 = vmatprep.subr.bf16.mxu0 %v4915_v20 }
 0x164   :  { %1313 = vmatpush1.bf16.msra.mxu0 %v4913_v25 }
 0x165   :  { %1314 = vmatprep.subr.bf16.mxu0 %v4918_v44 }
 0x1ea   :  { %v518_v49 = vpop.f32.mrb[0].mxu0  ;;  %v561_v50 = vpop.f32.mrb[0].mxu1 }
 0x1eb   :  { %v520_v51 = vpop.f32.mrb[1].mxu0  ;;  %v563_v52 = vpop.f32.mrb[1].mxu1  ;;  %v700_v8 = vadd.f32 %v669_v63, %v561_v50  ;;  %v698_v9 = vadd.f32 %v661_v0, %v518_v49  ;;  %v4916_v50 = vld [vmem:[#allocation10 + $0xf0] ss:$8 sps:$4 sm:$0xff]  }
 0x1ec   :  { %v522_v53 = vpop.f32.mrb[2].mxu0  ;;  %v565_v54 = vpop.f32.mrb[2].mxu1  ;;  %v701_v10 = vadd.f32 %v673_v2, %v563_v52  ;;  %v699_v11 = vadd.f32 %v665_v3, %v520_v51  ;;  %1315 = vmatpush1.bf16.msra.mxu0 %v4916_v50 }
 0x1ed   :  { %v524_v55 = vpop.f32.mrb[3].mxu0  ;;  %v567_v57 = vpop.f32.mrb[3].mxu1  ;;  %v706_v12 = vadd.f32 %v661_v0, %v522_v53  ;;  %v708_v14 = vadd.f32 %v669_v63, %v565_v54  ;;  %v716_v21 = vmax.f32 %v700_v8, 0.0  ;;  %v714_v22 = vmax.f32 %v698_v9, 0.0 }
 0x1ee   :  { %v707_v15 = vadd.f32 %v665_v3, %v524_v55  ;;  %v709_v18 = vadd.f32 %v673_v2, %v567_v57  ;;  %v717_v26 = vmax.f32 %v701_v10, 0.0  ;;  %v715_v27 = vmax.f32 %v699_v11, 0.0  ;;  %v4921_v3 = vld [vmem:[#allocation10 + $0x104] ss:$8 sps:$4 sm:$0xff]  }
 0x1ef   :  { %v722_v28 = vmax.f32 %v706_v12, 0.0  ;;  %v724_v32 = vmax.f32 %v708_v14, 0.0  ;;  %1327 = vmatprep.subr.bf16.mxu0 %v4921_v3  ;;  %v4937_v3 = vld [vmem:[#allocation10 + $0x160] ss:$8 sps:$4 sm:$0xff]  }
 0x1f0   :  { %v723_v33 = vmax.f32 %v707_v15, 0.0  ;;  %v725_v38 = vmax.f32 %v709_v18, 0.0  ;;  %v6067_v15 = vadd.s32 4294967295, %v6037_v56 }
 0x1f2   :  { %vm751_vm3 = vcmp.ge.s32.totalorder %v6067_v15, 0  ;;  %v5001_v15 = vld [vmem:[#allocation16 + $0x24] ss:$8 sps:$4 sm:$0xff]  }
 0x1fe   :  { %v604_v23 = vpop.f32.mrb[4].mxu0  ;;  %v647_v30 = vpop.f32.mrb[4].mxu1 }
 0x1ff   :  { %v702_v29 = vadd.f32 %v677_v13, %v604_v23  ;;  %v606_v31 = vpop.f32.mrb[5].mxu0  ;;  %v704_v34 = vadd.f32 %v685_v16, %v647_v30  ;;  %v649_v36 = vpop.f32.mrb[5].mxu1 }
 0x200   :  { %v703_v35 = vadd.f32 %v681_v17, %v606_v31  ;;  %v608_v37 = vpop.f32.mrb[6].mxu0  ;;  %v705_v40 = vadd.f32 %v689_v19, %v649_v36  ;;  %v651_v42 = vpop.f32.mrb[6].mxu1 }
 0x201   :  { %v718_v39 = vmax.f32 %v702_v29, 0.0  ;;  %v710_v41 = vadd.f32 %v677_v13, %v608_v37  ;;  %v610_v43 = vpop.f32.mrb[7].mxu0  ;;  %v720_v45 = vmax.f32 %v704_v34, 0.0  ;;  %v712_v47 = vadd.f32 %v685_v16, %v651_v42  ;;  %v653_v49 = vpop.f32.mrb[7].mxu1 }
 0x202   :  { %v719_v46 = vmax.f32 %v703_v35, 0.0  ;;  %v711_v48 = vadd.f32 %v681_v17, %v610_v43  ;;  %v721_v52 = vmax.f32 %v705_v40, 0.0  ;;  %v713_v54 = vadd.f32 %v689_v19, %v653_v49 }
 0x203   :  { %v730_v51 = vmax.f32 %v714_v22, %v718_v39  ;;  %v726_v53 = vmax.f32 %v710_v41, 0.0  ;;  %v732_v55 = vmax.f32 %v716_v21, %v720_v45  ;;  %v728_v58 = vmax.f32 %v712_v47, 0.0  ;;  %v4919_v45 = vld [vmem:[#allocation10 + $0x100] ss:$8 sps:$4 sm:$0xff]  }
 0x204   :  { %v731_v57 = vmax.f32 %v715_v27, %v719_v46  ;;  %v727_v60 = vmax.f32 %v711_v48, 0.0  ;;  %v729_v61 = vmax.f32 %v713_v54, 0.0  ;;  %v733_v63 = vmax.f32 %v717_v26, %v721_v52  ;;  %v4924_v48 = vld [vmem:[#allocation10 + $0x114] ss:$8 sps:$4 sm:$0xff]   ;;  %v4927_v54 = vld [vmem:[#allocation10 + $0x124] ss:$8 sps:$4 sm:$0xff]  }
 0x205   :  { %v734_v0 = vmax.f32 %v722_v28, %v726_v53  ;;  %v756_v2 = vrot.slane %v730_v51, 1  ;;  %v736_v4 = vmax.f32 %v724_v32, %v728_v58  ;;  %v4922_v53 = vld [vmem:[#allocation10 + $0x110] ss:$8 sps:$4 sm:$0xff]  }
 0x206   :  { %v735_v5 = vmax.f32 %v723_v33, %v727_v60  ;;  %v4830_v6 = vpack.i.bf16 %v731_v57, %v730_v51  ;;  %v737_v7 = vmax.f32 %v725_v38, %v729_v61  ;;  %v4930_v57 = vld [vmem:[#allocation10 + $0x134] ss:$8 sps:$4 sm:$0xff]   ;;  %v4928_v58 = vld [vmem:[#allocation10 + $0x130] ss:$8 sps:$4 sm:$0xff]   ;;  %v4933_v60 = vld [vmem:[#allocation10 + $0x144] ss:$8 sps:$4 sm:$0xff]  }
 0x207   :  { %v757_v8 = vrot.slane %v734_v0, 1  ;;  %v4840_v10 = vpack.i.bf16 %v736_v4, %v732_v55  ;;  %v762_v12 = vsel %vm760_vm2, %v756_v2, 0.0  ;;  %v4925_v55 = vld [vmem:[#allocation10 + $0x120] ss:$8 sps:$4 sm:$0xff]   ;;  %v4939_v2 = vld [vmem:[#allocation10 + $0x164] ss:$8 sps:$4 sm:$0xff]  }
 0x208   :  { %v4835_v9 = vpack.i.bf16 %v735_v5, %v734_v0  ;;  %v4825_v11 = vpack.i.bf16 %v737_v7, %v733_v63  ;;  %v4931_v61 = vld [vmem:[#allocation10 + $0x140] ss:$8 sps:$4 sm:$0xff]   ;;  %v4936_v63 = vld [vmem:[#allocation10 + $0x154] ss:$8 sps:$4 sm:$0xff]   ;;  %v4934_v0 = vld [vmem:[#allocation10 + $0x150] ss:$8 sps:$4 sm:$0xff]  }
 0x209   :  { %v763_v13 = vsel %vm760_vm2, %v757_v8, 0.0  ;;  %v4942_v4 = vld [vmem:[#allocation10 + $0x174] ss:$8 sps:$4 sm:$0xff]   ;;  %v4940_v5 = vld [vmem:[#allocation10 + $0x170] ss:$8 sps:$4 sm:$0xff]  }
 0x20a   :  { %4836 = vrot.lane.b32.xlu1 %v4835_v9, %s5695_s30  ;;  %v4845_v14 = vpack.i.bf16 %v763_v13, %v762_v12  ;;  %4826 = vrot.lane.b32.xlu0 %v4825_v11, %s5695_s30  ;;  %v4943_v7 = vld [vmem:[#allocation10 + $0x180] ss:$8 sps:$4 sm:$0xff]   ;;  %v4948_v8 = vld [vmem:[#allocation10 + $0x194] ss:$8 sps:$4 sm:$0xff]   ;;  %v4946_v9 = vld [vmem:[#allocation10 + $0x190] ss:$8 sps:$4 sm:$0xff]  }
 0x20b   :  { %v4949_v11 = vld [vmem:[#allocation10 + $0x1a0] ss:$8 sps:$4 sm:$0xff]   ;;  %v4954_v12 = vld [vmem:[#allocation10 + $0x1b4] ss:$8 sps:$4 sm:$0xff]   ;;  %v4952_v13 = vld [vmem:[#allocation10 + $0x1b0] ss:$8 sps:$4 sm:$0xff]  }
 0x20e   :  { %4841 = vrot.lane.b32.xlu1 %v4840_v10, %s5695_s30  ;;  %4831 = vrot.lane.b32.xlu0 %v4830_v6, %s5695_s30  ;;  %v4945_v6 = vld [vmem:[#allocation10 + $0x184] ss:$8 sps:$4 sm:$0xff]  }
 0x20f   :  { %v4951_v10 = vld [vmem:[#allocation10 + $0x1a4] ss:$8 sps:$4 sm:$0xff]  }
 0x212   :  { %4846 = vrot.lane.b32.xlu0 %v4845_v14, %s5695_s30  ;;  %v4957_v14 = vld [vmem:[#allocation10 + $0x1c4] ss:$8 sps:$4 sm:$0xff]  }
 0x27c   :  { %v4837_v16 = vpop.permute.xlu1 %4836  ;;  %v4827_v17 = vpop.permute.xlu0 %4826 }
 0x27d   :  { %v4829_v18 = vunpack.i.h.bf16 %v4827_v17  ;;  %v4828_v19 = vunpack.i.l.bf16 %v4827_v17  ;;  %v4839_v20 = vunpack.i.h.bf16 %v4837_v16  ;;  %v4838_v21 = vunpack.i.l.bf16 %v4837_v16  ;;  %v4955_v16 = vld [vmem:[#allocation10 + $0x1c0] ss:$8 sps:$4 sm:$0xff]   ;;  %v4960_v17 = vld [vmem:[#allocation10 + $0x1d4] ss:$8 sps:$4 sm:$0xff]  }
 0x27f   :  { %v747_v22 = vrot.slane %v4829_v18, 7  ;;  %v746_v23 = vrot.slane %v4828_v19, 7  ;;  %v786_v35 = vsel %vm782_vm4, %v4838_v21, %v4839_v20 }
 0x280   :  { %v4842_v25 = vpop.permute.xlu1 %4841  ;;  %v4832_v26 = vpop.permute.xlu0 %4831 }
 0x281   :  { %v4844_v27 = vunpack.i.h.bf16 %v4842_v25  ;;  %v4843_v28 = vunpack.i.l.bf16 %v4842_v25  ;;  %v755_v29 = vsel %vm751_vm3, %v747_v22, 0.0  ;;  %v754_v30 = vsel %vm751_vm3, %v746_v23, 0.0  ;;  %v4964_v22 = vld [vmem:[#allocation10 + $0x1f0] ss:$8 sps:$4 sm:$0xff]   ;;  %v4969_v23 = vld [vmem:[#allocation10 + $0x204] ss:$8 sps:$4 sm:$0xff]  }
 0x282   :  { %v4834_v31 = vunpack.i.h.bf16 %v4832_v26  ;;  %v4833_v32 = vunpack.i.l.bf16 %v4832_v26  ;;  %v806_v33 = vsel %vm782_vm4, %v755_v29, %v4838_v21  ;;  %v4966_v21 = vld [vmem:[#allocation10 + $0x1f4] ss:$8 sps:$4 sm:$0xff]   ;;  %v4967_v25 = vld [vmem:[#allocation10 + $0x200] ss:$8 sps:$4 sm:$0xff]  }
 0x283   :  { %v6076_v34 = vsel %vm782_vm4, %v4839_v20, %v4844_v27  ;;  %v785_v36 = vsel %vm782_vm4, %v4843_v28, %v4828_v19  ;;  %v788_v40 = vsel %vm782_vm4, %v4844_v27, %v4829_v18  ;;  %v4961_v20 = vld [vmem:[#allocation10 + $0x1e0] ss:$8 sps:$4 sm:$0xff]   ;;  %v4972_v26 = vld [vmem:[#allocation10 + $0x214] ss:$8 sps:$4 sm:$0xff]   ;;  %v4970_v27 = vld [vmem:[#allocation10 + $0x210] ss:$8 sps:$4 sm:$0xff]  }
 0x284   :  { %v805_v37 = vsel %vm782_vm4, %v754_v30, %v4833_v32  ;;  %v6082_v38 = vsel %vm782_vm4, %v4834_v31, %v4843_v28  ;;  %v783_v39 = vsel %vm782_vm4, %v4833_v32, %v4834_v31  ;;  %v4847_v43 = vpop.permute.xlu0 %4846  ;;  %v4787_v49 = vpack.c.bf16 %v788_v40, %v785_v36  ;;  %v4975_v28 = vld [vmem:[#allocation10 + $0x224] ss:$8 sps:$4 sm:$0xff]   ;;  %v4973_v29 = vld [vmem:[#allocation10 + $0x220] ss:$8 sps:$4 sm:$0xff]   ;;  %v4978_v30 = vld [vmem:[#allocation10 + $0x234] ss:$8 sps:$4 sm:$0xff]  }
 0x285   :  { %v4784_v41 = vpack.c.bf16 %v806_v33, %v805_v37  ;;  %v4786_v42 = vpack.c.bf16 %v6076_v34, %v6082_v38  ;;  %v4785_v44 = vpack.c.bf16 %v786_v35, %v783_v39  ;;  %v4849_v46 = vunpack.i.h.bf16 %v4847_v43  ;;  %v4976_v31 = vld [vmem:[#allocation10 + $0x230] ss:$8 sps:$4 sm:$0xff]   ;;  %v4979_v32 = vld [vmem:[#allocation13] sm:$0xff]  }
 0x286   :  { %v4848_v47 = vunpack.i.l.bf16 %v4847_v43  ;;  %1595 = vmatpush1.bf16.msra.mxu1 %v4979_v32  ;;  %v4980_v33 = vld [vmem:[#allocation13 + $0x8] sm:$0xff]   ;;  %v4981_v34 = vld [vmem:[#allocation13 + $0x10] sm:$0xff]   ;;  %v4982_v35 = vld [vmem:[#allocation13 + $0x18] sm:$0xff]  }
 0x287   :  { %1316 = vmatprep.mubr.bf16.mxu0 %v4785_v44  ;;  %v6089_v50 = vsel %vm782_vm4, %v4829_v18, %v4849_v46  ;;  %v4958_v18 = vld [vmem:[#allocation10 + $0x1d0] ss:$8 sps:$4 sm:$0xff]   ;;  %1596 = vmatprep.subr.bf16.mxu1 %v5713_v1  ;;  %v4983_v36 = vld [vmem:[#allocation13 + $0x20] sm:$0xff]   ;;  %v1413_v44 = vld [vmem:[#allocation12] sm:$0x3] }
 0x288   :  { %v6092_v51 = vsel %vm782_vm4, %v4828_v19, %v4848_v47  ;;  %1317 = vmatmul.mubr.bf16.vlgmr.msra.gmra.mrb[8].mxu0 %v4784_v41  ;;  %v4963_v19 = vld [vmem:[#allocation10 + $0x1e4] ss:$8 sps:$4 sm:$0xff]   ;;  %v4985_v38 = vld [vmem:[#allocation13 + $0x30] sm:$0xff]   ;;  %v4986_v39 = vld [vmem:[#allocation13 + $0x38] sm:$0xff]   ;;  %v1422_v46 = vrot.slane %v1413_v44, %v6045_v62 }
 0x289   :  { %v4788_v52 = vpack.c.bf16 %v6089_v50, %v6092_v51  ;;  %1328 = vmatpush1.bf16.msra.mxu0 %v4919_v45  ;;  %1359 = vmatprep.mubr.bf16.mxu0 %v4787_v49  ;;  %v4984_v37 = vld [vmem:[#allocation13 + $0x28] sm:$0xff]   ;;  %v4987_v40 = vld [vmem:[#allocation13 + $0x40] sm:$0xff]   ;;  %v4990_v43 = vld [vmem:[#allocation13 + $0x58] sm:$0xff]   ;;  %v1418_v45 = vrot.slane %v1413_v44, %v6041_v59 }
 0x28a   :  { %1329 = vmatprep.subr.bf16.mxu0 %v4924_v48  ;;  %1597 = vmatpush1.bf16.msra.mxu1 %v4980_v33  ;;  %v4988_v41 = vld [vmem:[#allocation13 + $0x48] sm:$0xff]   ;;  %v4991_v47 = vld [vmem:[#allocation13 + $0x60] sm:$0xff]  }
 0x28b   :  { %1598 = vmatprep.subr.bf16.mxu1 %v5713_v1  ;;  %v5002_v32 = vld [vmem:[#allocation16 + $0x30] ss:$8 sps:$4 sm:$0xff]   ;;  %v5007_v33 = vld [vmem:[#allocation16 + $0x44] ss:$8 sps:$4 sm:$0xff]  }
 0x28c   :  { %v6144_v44 = vld [vmem:[#allocation18 + $0x10] ss:$8 sps:$4 sm:$0xff]  }
 0x28d   :  { %1330 = vmatpush1.bf16.msra.mxu0 %v4922_v53 }
 0x28e   :  { %1331 = vmatprep.subr.bf16.mxu0 %v4927_v54  ;;  %1599 = vmatpush1.bf16.msra.mxu1 %v4981_v34  ;;  %v5005_v34 = vld [vmem:[#allocation16 + $0x40] ss:$8 sps:$4 sm:$0xff]  }
 0x28f   :  { %1600 = vmatprep.subr.bf16.mxu1 %v5713_v1 }
 0x291   :  { %1332 = vmatpush1.bf16.msra.mxu0 %v4925_v55 }
 0x292   :  { %1333 = vmatprep.subr.bf16.mxu0 %v4930_v57  ;;  %1601 = vmatpush1.bf16.msra.mxu1 %v4982_v35  ;;  %v4992_v57 = vld [vmem:[#allocation13 + $0x68] sm:$0xff]  }
 0x293   :  { %1602 = vmatprep.subr.bf16.mxu1 %v5713_v1  ;;  %v5010_v35 = vld [vmem:[#allocation16 + $0x54] ss:$8 sps:$4 sm:$0xff]  }
 0x295   :  { %1334 = vmatpush1.bf16.msra.mxu0 %v4928_v58 }
 0x296   :  { %1335 = vmatprep.subr.bf16.mxu0 %v4933_v60  ;;  %1603 = vmatpush1.bf16.msra.mxu1 %v4983_v36  ;;  %v5008_v36 = vld [vmem:[#allocation16 + $0x50] ss:$8 sps:$4 sm:$0xff]  }
 0x297   :  { %1604 = vmatprep.subr.bf16.mxu1 %v5713_v1 }
 0x299   :  { %1336 = vmatpush1.bf16.msra.mxu0 %v4931_v61 }
 0x29a   :  { %1337 = vmatprep.subr.bf16.mxu0 %v4936_v63  ;;  %1605 = vmatpush1.bf16.msra.mxu1 %v4984_v37  ;;  %v5013_v37 = vld [vmem:[#allocation16 + $0x64] ss:$8 sps:$4 sm:$0xff]  }
 0x29b   :  { %1606 = vmatprep.subr.bf16.mxu1 %v5713_v1 }
 0x29d   :  { %1338 = vmatpush1.bf16.msra.mxu0 %v4934_v0 }
 0x29e   :  { %1339 = vmatprep.subr.bf16.mxu0 %v4939_v2  ;;  %1607 = vmatpush1.bf16.msra.mxu1 %v4985_v38  ;;  %v5011_v38 = vld [vmem:[#allocation16 + $0x60] ss:$8 sps:$4 sm:$0xff]  }
 0x29f   :  { %1608 = vmatprep.subr.bf16.mxu1 %v5713_v1 }
 0x2a1   :  { %1340 = vmatpush1.bf16.msra.mxu0 %v4937_v3 }
 0x2a2   :  { %1341 = vmatprep.subr.bf16.mxu0 %v4942_v4  ;;  %1609 = vmatpush1.bf16.msra.mxu1 %v4986_v39  ;;  %v4995_v4 = vld [vmem:[#allocation16 + $0x4] ss:$8 sps:$4 sm:$0xff]   ;;  %v5016_v39 = vld [vmem:[#allocation16 + $0x74] ss:$8 sps:$4 sm:$0xff]  }
 0x2a3   :  { %1610 = vmatprep.subr.bf16.mxu1 %v5713_v1 }
 0x2a5   :  { %1342 = vmatpush1.bf16.msra.mxu0 %v4940_v5 }
 0x2a6   :  { %1343 = vmatprep.subr.bf16.mxu0 %v4945_v6  ;;  %1611 = vmatpush1.bf16.msra.mxu1 %v4987_v40  ;;  %v5014_v40 = vld [vmem:[#allocation16 + $0x70] ss:$8 sps:$4 sm:$0xff]  }
 0x2a7   :  { %1612 = vmatprep.subr.bf16.mxu1 %v5713_v1 }
 0x2a9   :  { %1344 = vmatpush1.bf16.msra.mxu0 %v4943_v7 }
 0x2aa   :  { %1345 = vmatprep.subr.bf16.mxu0 %v4948_v8  ;;  %1613 = vmatpush1.bf16.msra.mxu1 %v4988_v41  ;;  %v6135_v41 = vld [vmem:[#allocation18 + $0x4] ss:$8 sps:$4 sm:$0xff]  }
 0x2ab   :  { %1614 = vmatprep.subr.bf16.mxu1 %v5713_v1 }
 0x2ad   :  { %1346 = vmatpush1.bf16.msra.mxu0 %v4946_v9 }
 0x2ae   :  { %1347 = vmatprep.subr.bf16.mxu0 %v4951_v10 }
 0x2b1   :  { %1348 = vmatpush1.bf16.msra.mxu0 %v4949_v11 }
 0x2b2   :  { %1349 = vmatprep.subr.bf16.mxu0 %v4954_v12 }
 0x2b5   :  { %1350 = vmatpush1.bf16.msra.mxu0 %v4952_v13 }
 0x2b6   :  { %1351 = vmatprep.subr.bf16.mxu0 %v4957_v14 }
 0x2b9   :  { %1352 = vmatpush1.bf16.msra.mxu0 %v4955_v16 }
 0x2ba   :  { %1353 = vmatprep.subr.bf16.mxu0 %v4960_v17 }
 0x2bd   :  { %1354 = vmatpush1.bf16.msra.mxu0 %v4958_v18 }
 0x2be   :  { %1355 = vmatprep.subr.bf16.mxu0 %v4963_v19 }
 0x2c1   :  { %1356 = vmatpush1.bf16.msra.mxu0 %v4961_v20 }
 0x2c2   :  { %1357 = vmatprep.subr.bf16.mxu0 %v4966_v21 }
 0x2c5   :  { %1358 = vmatpush1.bf16.msra.mxu0 %v4964_v22 }
 0x2c6   :  { %1370 = vmatprep.subr.bf16.mxu0 %v4969_v23 }
 0x2c8   :  { %1360 = vmatmul.mubr.bf16.vlgmr.msra.gmra.mrb[8].mxu0 %v4786_v42  ;;  %v4989_v42 = vld [vmem:[#allocation13 + $0x50] sm:$0xff]  }
 0x2c9   :  { %1371 = vmatpush1.bf16.msra.mxu0 %v4967_v25  ;;  %1402 = vmatprep.mubr.bf16.mxu0 %v5713_v1 }
 0x2ca   :  { %1372 = vmatprep.subr.bf16.mxu0 %v4972_v26  ;;  %1615 = vmatpush1.bf16.msra.mxu1 %v4989_v42  ;;  %v6137_v42 = vld [vmem:[#allocation18] ss:$8 sps:$4 sm:$0xff]  }
 0x2cb   :  { %1616 = vmatprep.subr.bf16.mxu1 %v5713_v1 }
 0x2cd   :  { %1373 = vmatpush1.bf16.msra.mxu0 %v4970_v27  ;;  %v4993_v27 = vld [vmem:[#allocation16] ss:$8 sps:$4 sm:$0xff]  }
 0x2ce   :  { %1374 = vmatprep.subr.bf16.mxu0 %v4975_v28  ;;  %1617 = vmatpush1.bf16.msra.mxu1 %v4990_v43  ;;  %v4998_v28 = vld [vmem:[#allocation16 + $0x14] ss:$8 sps:$4 sm:$0xff]  }
 0x2cf   :  { %1618 = vmatprep.subr.bf16.mxu1 %v5713_v1  ;;  %v6142_v43 = vld [vmem:[#allocation18 + $0x14] ss:$8 sps:$4 sm:$0xff]  }
 0x2d1   :  { %1375 = vmatpush1.bf16.msra.mxu0 %v4973_v29  ;;  %v4996_v29 = vld [vmem:[#allocation16 + $0x10] ss:$8 sps:$4 sm:$0xff]  }
 0x2d2   :  { %1376 = vmatprep.subr.bf16.mxu0 %v4978_v30  ;;  %1619 = vmatpush1.bf16.msra.mxu1 %v4991_v47  ;;  %v4999_v30 = vld [vmem:[#allocation16 + $0x20] ss:$8 sps:$4 sm:$0xff]   ;;  %v6154_v47 = vld [vmem:[#allocation18 + $0x34] ss:$8 sps:$4 sm:$0xff]  }
 0x2d3   :  { %1620 = vmatprep.subr.bf16.mxu1 %v5713_v1 }
 0x2d5   :  { %1377 = vmatpush1.bf16.msra.mxu0 %v4976_v31  ;;  %v5004_v31 = vld [vmem:[#allocation16 + $0x34] ss:$8 sps:$4 sm:$0xff]  }
 0x2d6   :  { %1621 = vmatpush1.bf16.msra.mxu1 %v4992_v57  ;;  %2653 = vmatprep.subr.bf16.mxu0 %v6135_v41 }
 0x2d7   :  { %1750 = vmatprep.subr.bf16.mxu1 %v4995_v4 }
 0x2d8   :  { %4658 = vmatmul.mubr.msk.bf16.vlgmr.msra.gmra.mrb[8].mxu0 %vm1280_vm5, %v4788_v52 }
 0x2d9   :  { %2685 = vmatprep.mubr.bf16.mxu0 %v5713_v1  ;;  %2654 = vmatpush1.bf16.msra.mxu0 %v6137_v42 }
 0x2da   :  { %2655 = vmatprep.subr.bf16.mxu0 %v6142_v43 }
 0x2dd   :  { %2656 = vmatpush1.bf16.msra.mxu0 %v6144_v44 }
 0x3ab   :  { %v1404_v48 = vpop.f32.mrb[8].mxu0 }
 0x3ac   :  { %v1425_v49 = vadd.f32 %v1418_v45, %v1404_v48  ;;  %v1406_v50 = vpop.f32.mrb[9].mxu0  ;;  %v6156_v48 = vld [vmem:[#allocation18 + $0x30] ss:$8 sps:$4 sm:$0xff]  }
 0x3ad   :  { %v1426_v51 = vadd.f32 %v1422_v46, %v1406_v50  ;;  %v1408_v52 = vpop.f32.mrb[10].mxu0 }
 0x3ae   :  { %v1429_v53 = vmax.f32 %v1425_v49, 0.0  ;;  %v1427_v54 = vadd.f32 %v1418_v45, %v1408_v52  ;;  %v1410_v55 = vpop.f32.mrb[11].mxu0  ;;  %v6148_v45 = vld [vmem:[#allocation18 + $0x24] ss:$8 sps:$4 sm:$0xff]   ;;  %v4676_v49 = vld [vmem:[#allocation15] ss:$0 sm:$0xff] }
 0x3af   :  { %v1430_v58 = vmax.f32 %v1426_v51, 0.0  ;;  %v1428_v60 = vadd.f32 %v1422_v46, %v1410_v55  ;;  %v6150_v46 = vld [vmem:[#allocation18 + $0x20] ss:$8 sps:$4 sm:$0xff]   ;;  %2657 = vmatprep.subr.bf16.mxu0 %v6148_v45 }
 0x3b0   :  { %v1431_v61 = vmax.f32 %v1427_v54, 0.0  ;;  %2658 = vmatpush1.bf16.msra.mxu0 %v6150_v46 }
 0x3b1   :  { %v1433_v63 = vmax.f32 %v1429_v53, %v1430_v58  ;;  %v1432_v0 = vmax.f32 %v1428_v60, 0.0  ;;  %2659 = vmatprep.subr.bf16.mxu0 %v6154_v47 }
 0x3b3   :  { %v1434_v2 = vmax.f32 %v1431_v61, %v1432_v0  ;;  %v1447_v3 = vrot.slane %v1433_v63, 1 }
 0x3b4   :  { %2660 = vmatpush1.bf16.msra.mxu0 %v6156_v48 }
 0x3b5   :  { %v4850_v5 = vpack.i.bf16 %v1434_v2, %v1433_v63  ;;  %v1448_v6 = vrot.slane %v1434_v2, 1  ;;  %v1449_v7 = vsel %vm760_vm2, %v1447_v3, 0.0  ;;  %3057 = vmatprep.subr.bf16.mxu0 %v6135_v41  ;;  %v1793_v3 = vld [vmem:[#allocation19] sm:$0x3] }
 0x3b6   :  { %v1798_v4 = vrot.slane %v1793_v3, %v6041_v59 }
 0x3b7   :  { %4851 = vrot.lane.b32.xlu1 %v4850_v5, %s5695_s30  ;;  %v1450_v8 = vsel %vm760_vm2, %v1448_v6, 0.0 }
 0x3b8   :  { %v4855_v9 = vpack.i.bf16 %v1450_v8, %v1449_v7 }
 0x3ba   :  { %4856 = vrot.lane.b32.xlu0 %v4855_v9, %s5695_s30  ;;  %s4516_s30 = sshll.u32 %s5717_s13, 4  ;;  %s4517_s30 = int_to_ptr.vmem [resolvable:$true] %s4516_s30 }
 0x3bb   :  { %p5658_p1 = scmp.lt.s32.totalorder %s4517_s30, %s4517_s30 }
 0x429   :  { %v4852_v10 = vpop.permute.xlu1 %4851 }
 0x42a   :  { %v4854_v11 = vunpack.i.h.bf16 %v4852_v10  ;;  %v4853_v12 = vunpack.i.l.bf16 %v4852_v10 }
 0x42c   :  { %v1444_v13 = vrot.slane %v4854_v11, 7  ;;  %v1443_v14 = vrot.slane %v4853_v12, 7  ;;  %v4857_v16 = vpop.permute.xlu0 %4856 }
 0x42d   :  { %v4859_v17 = vunpack.i.h.bf16 %v4857_v16  ;;  %v4858_v18 = vunpack.i.l.bf16 %v4857_v16 }
 0x42e   :  { %v1446_v19 = vsel %vm751_vm3, %v1444_v13, 0.0  ;;  %v1445_v20 = vsel %vm751_vm3, %v1443_v14, 0.0 }
 0x42f   :  { %v1460_v24 = vsel %vm782_vm4, %v1446_v19, %v4854_v11  ;;  %v1459_v21 = vsel %vm782_vm4, %v1445_v20, %v4853_v12  ;;  %v1462_v22 = vsel %vm782_vm4, %v4854_v11, %v4859_v17  ;;  %v1461_v23 = vsel %vm782_vm4, %v4853_v12, %v4858_v18 }
 0x430   :  { %v4789_v25 = vpack.c.bf16 %v1460_v24, %v1459_v21  ;;  %v4790_v26 = vpack.c.bf16 %v1462_v22, %v1461_v23  ;;  %v1802_v17 = vrot.slane %v1793_v3, %v6045_v62 }
 0x432   :  { %4675 = vmatprep.mubr.msk.bf16.mxu1 %vm1590_vm6, %v4790_v26 }
 0x433   :  { %1627 = vmatmul.mubr.bf16.vlgmr.msra.gmra.mrb[8].mxu1 %v4789_v25 }
 0x434   :  { %1751 = vmatpush1.bf16.msra.mxu1 %v4993_v27  ;;  %1782 = vmatprep.mubr.bf16.mxu1 %v5713_v1 }
 0x435   :  { %1752 = vmatprep.subr.bf16.mxu1 %v4998_v28 }
 0x438   :  { %1753 = vmatpush1.bf16.msra.mxu1 %v4996_v29 }
 0x439   :  { %1754 = vmatprep.subr.bf16.mxu1 %v5001_v15 }
 0x43c   :  { %1755 = vmatpush1.bf16.msra.mxu1 %v4999_v30 }
 0x43d   :  { %1756 = vmatprep.subr.bf16.mxu1 %v5004_v31 }
 0x440   :  { %1757 = vmatpush1.bf16.msra.mxu1 %v5002_v32 }
 0x441   :  { %1758 = vmatprep.subr.bf16.mxu1 %v5007_v33 }
 0x444   :  { %1759 = vmatpush1.bf16.msra.mxu1 %v5005_v34 }
 0x445   :  { %1760 = vmatprep.subr.bf16.mxu1 %v5010_v35 }
 0x448   :  { %1761 = vmatpush1.bf16.msra.mxu1 %v5008_v36 }
 0x449   :  { %1762 = vmatprep.subr.bf16.mxu1 %v5013_v37 }
 0x44c   :  { %1763 = vmatpush1.bf16.msra.mxu1 %v5011_v38 }
 0x44d   :  { %1764 = vmatprep.subr.bf16.mxu1 %v5016_v39 }
 0x450   :  { %1765 = vmatpush1.bf16.msra.mxu1 %v5014_v40 }
 0x451   :  { %1860 = vmatprep.subr.bf16.mxu1 %v6135_v41 }
 0x506   :  { %v1628_v50 = vpop.f32.mrb[8].mxu1 }
 0x507   :  { %v1642_v51 = vadd.f32 %v4676_v49, %v1628_v50  ;;  %v1630_v52 = vpop.f32.mrb[9].mxu1 }
 0x508   :  { %v1631_v53 = vpop.f32.mrb[10].mxu1  ;;  %v5714_v52 = vmov 1966171168  }
 0x509   :  { %v1643_v54 = vadd.f32 %v4676_v49, %v1631_v53  ;;  %v1633_v55 = vpop.f32.mrb[11].mxu1  ;;  %v1644_v57 = vmax.f32 %v1642_v51, 0.0  ;;  %v1962_v53 = vunpack.c.l.s4 %v5714_v52 }
 0x50a   :  { %v5715_v55 = vmov 1935823168  }
 0x50b   :  { %v1645_v58 = vmax.f32 %v1643_v54, 0.0  ;;  %v1963_v54 = vunpack.c.0.s8 %v1962_v53 }
 0x50d   :  { %v4791_v60 = vpack.c.bf16 %v1645_v58, %v1644_v57  ;;  %v1990_v57 = vunpack.c.l.s4 %v5715_v55 }
 0x50f   :  { %1783 = vmatmul.mubr.bf16.vlgmr.msra.gmra.mrb[12].mxu1 %v4791_v60 }
 0x510   :  { %1861 = vmatpush1.bf16.msra.mxu1 %v6137_v42  ;;  %1892 = vmatprep.mubr.bf16.mxu1 %v5713_v1 }
 0x511   :  { %1862 = vmatprep.subr.bf16.mxu1 %v6142_v43 }
 0x514   :  { %1863 = vmatpush1.bf16.msra.mxu1 %v6144_v44 }
 0x515   :  { %1864 = vmatprep.subr.bf16.mxu1 %v6148_v45 }
 0x518   :  { %1865 = vmatpush1.bf16.msra.mxu1 %v6150_v46 }
 0x519   :  { %1866 = vmatprep.subr.bf16.mxu1 %v6154_v47 }
 0x51c   :  { %1867 = vmatpush1.bf16.msra.mxu1 %v6156_v48 }
 0x51d   :  { %2052 = vmatprep.subr.bf16.mxu1 %v6135_v41 }
 0x51f   :  { %1893 = vmatmul.mubr.bf16.vlgmr.msra.gmra.mrb[16].mxu1 %v5713_v1 }
 0x520   :  { %2053 = vmatpush1.bf16.msra.mxu1 %v6137_v42  ;;  %2084 = vmatprep.mubr.bf16.mxu1 %v5713_v1 }
 0x521   :  { %2054 = vmatprep.subr.bf16.mxu1 %v6142_v43 }
 0x524   :  { %2055 = vmatpush1.bf16.msra.mxu1 %v6144_v44 }
 0x525   :  { %2056 = vmatprep.subr.bf16.mxu1 %v6148_v45 }
 0x528   :  { %2057 = vmatpush1.bf16.msra.mxu1 %v6150_v46 }
 0x529   :  { %2058 = vmatprep.subr.bf16.mxu1 %v6154_v47 }
 0x52c   :  { %2059 = vmatpush1.bf16.msra.mxu1 %v6156_v48 }
 0x52d   :  { %2249 = vmatprep.subr.bf16.mxu1 %v6135_v41 }
 0x5e2   :  { %v1784_v61 = vpop.f32.mrb[12].mxu1 }
 0x5e3   :  { %v1786_v63 = vpop.f32.mrb[13].mxu1  ;;  %v6181_v5 = vadd.f32 %v1798_v4, %v1784_v61 }
 0x5e4   :  { %v1788_v0 = vpop.f32.mrb[14].mxu1  ;;  %v6188_v18 = vadd.f32 %v1802_v17, %v1786_v63 }
 0x5e5   :  { %v1790_v2 = vpop.f32.mrb[15].mxu1  ;;  %v6183_v7 = vadd.f32 %v1798_v4, %v1788_v0  ;;  %v6203_v0 = vsub.s32 %v1963_v54, %v6037_v56 }
 0x5e6   :  { %v6190_v20 = vadd.f32 %v1802_v17, %v1790_v2  ;;  %v1991_v2 = vunpack.c.0.s8 %v1990_v57 }
 0x5f2   :  { %v1894_v6 = vpop.f32.mrb[16].mxu1 }
 0x5f3   :  { %v1903_v8 = vrot.slane %v1894_v6, 1  ;;  %v1909_v9 = vadd.f32 %v1894_v6, %v6181_v5  ;;  %v1896_v10 = vpop.f32.mrb[17].mxu1 }
 0x5f4   :  { %v1898_v11 = vpop.f32.mrb[18].mxu1  ;;  %v1904_v19 = vrot.slane %v1896_v10, 1  ;;  %v1910_v24 = vadd.f32 %v1896_v10, %v6188_v18  ;;  %v6207_v10 = vsub.s32 %v1991_v2, %v6037_v56 }
 0x5f5   :  { %v1911_v12 = vadd.f32 %v1903_v8, %v6183_v7  ;;  %v4702_v13 = vmul.f32 -1.442695, %v1909_v9  ;;  %v1899_v14 = vpop.f32.mrb[19].mxu1 }
 0x5f6   :  { %v1912_v22 = vadd.f32 %v1904_v19, %v6190_v20  ;;  %v4704_v32 = vmul.f32 -1.442695, %v1910_v24 }
 0x5f7   :  { %5053 = vpow2.f32 %v4702_v13  ;;  %v4703_v16 = vmul.f32 -1.442695, %v1911_v12 }
 0x5f8   :  { %v4705_v33 = vmul.f32 -1.442695, %v1912_v22 }
 0x5f9   :  { %5055 = vpow2.f32 %v4703_v16 }
 0x5fa   :  { %5057 = vtanh.f32 %v1910_v24 }
 0x601   :  { %v5054_v21 = vpop.eup %5053 }
 0x602   :  { %v1919_v23 = vadd.f32 1.0, %v5054_v21 }
 0x603   :  { %v5056_v25 = vpop.eup %5055 }
 0x604   :  { %v1920_v26 = vadd.f32 1.0, %v5056_v25  ;;  %5059 = vrcp.f32 %v1919_v23  ;;  %v5058_v27 = vpop.eup %5057 }
 0x605   :  { %5061 = vtanh.f32 %v1912_v22 }
 0x606   :  { %5063 = vrcp.f32 %v1920_v26 }
 0x607   :  { %5065 = vpow2.f32 %v4704_v32 }
 0x608   :  { %5067 = vpow2.f32 %v4705_v33 }
 0x60e   :  { %v5060_v28 = vpop.eup %5059 }
 0x60f   :  { %v5062_v29 = vpop.eup %5061  ;;  %v1941_v15 = vmul.f32 %v5060_v28, %v5058_v27  ;;  %v1939_v37 = vmul.f32 0.0, %v5060_v28 }
 0x610   :  { %v5064_v30 = vpop.eup %5063 }
 0x611   :  { %1945 = vrot.lane.b32.xlu0 %v1941_v15, %s5701_s19  ;;  %v1942_v31 = vmul.f32 %v5064_v30, %v5062_v29  ;;  %v5066_v34 = vpop.eup %5065  ;;  %v1940_v49 = vmul.f32 0.0, %v5064_v30 }
 0x612   :  { %v5068_v35 = vpop.eup %5067  ;;  %v1933_v36 = vadd.f32 1.0, %v5066_v34 }
 0x613   :  { %1947 = vrot.lane.b32.xlu1 %v1942_v31, %s5701_s19  ;;  %v1934_v38 = vadd.f32 1.0, %v5068_v35 }
 0x614   :  { %5069 = vrcp.f32 %v1933_v36 }
 0x61e   :  { %v5070_v58 = vpop.eup %5069 }
 0x683   :  { %v1946_v39 = vpop.permute.xlu0 %1945 }
 0x684   :  { %v6196_v40 = vadd.f32 %v1946_v39, %v1939_v37 }
 0x685   :  { %v1948_v50 = vpop.permute.xlu1 %1947 }
 0x686   :  { %5071 = vtanh.f32 %v6196_v40  ;;  %v6199_v51 = vadd.f32 %v1948_v50, %v1940_v49 }
 0x687   :  { %5073 = vrcp.f32 %v1934_v38 }
 0x688   :  { %5075 = vtanh.f32 %v6199_v51 }
 0x690   :  { %v5072_v60 = vpop.eup %5071 }
 0x691   :  { %v5074_v61 = vpop.eup %5073  ;;  %v1955_v63 = vmul.f32 %v5072_v60, %v5070_v58  ;;  %v2134_v58 = vrot.slane %v6199_v51, 7 }
 0x692   :  { %v5076_v3 = vpop.eup %5075 }
 0x693   :  { %v1956_v4 = vmul.f32 %v5076_v3, %v5074_v61  ;;  %v1957_v6 = vpack.c.bf16 %v1955_v63, %v1955_v63  ;;  %v2133_v63 = vrot.slane %v6196_v40, 7 }
 0x695   :  { %v1958_v8 = vpack.c.bf16 %v1956_v4, %v1956_v4  ;;  %v1967_v9 = vrot.slane %v1957_v6, %v6203_v0  ;;  %v2042_v14 = vunpack.c.l.b16 %v1957_v6 }
 0x697   :  { %v1974_v11 = vrot.slane %v1967_v9, %v6203_v0  ;;  %v2043_v12 = vunpack.c.l.b16 %v1958_v8  ;;  %v1981_v13 = vrot.slane %v1958_v8, %v6203_v0 }
 0x699   :  { %v2044_v16 = vrot.slane %v2043_v12, 7  ;;  %v1988_v17 = vrot.slane %v1981_v13, %v6203_v0  ;;  %v1995_v19 = vrot.slane %v1974_v11, %v6207_v10 }
 0x69b   :  { %v2045_v24 = vsel %vm2020_vm7, %v2044_v16, %v2042_v14  ;;  %v2009_v21 = vrot.slane %v1988_v17, %v6207_v10  ;;  %v2002_v23 = vrot.slane %v1995_v19, %v6207_v10 }
 0x69c   :  { %v2046_v22 = vpack.c.b16 %v2045_v24, %v2045_v24 }
 0x69d   :  { %v2016_v25 = vrot.slane %v2009_v21, %v6207_v10  ;;  %v2017_v27 = vunpack.c.l.b16 %v2002_v23 }
 0x69e   :  { %2047 = vrot.lane.b32.xlu1 %v2046_v22, %s5701_s19 }
 0x69f   :  { %v2018_v26 = vunpack.c.l.b16 %v2016_v25 }
 0x6a1   :  { %v2019_v28 = vrot.slane %v2018_v26, 7 }
 0x6a3   :  { %v6219_v29 = vsel %vm2020_vm7, %v2019_v28, %v2017_v27 }
 0x710   :  { %v2048_v15 = vpop.permute.xlu1 %2047 }
 0x711   :  { %4706 = vmatmul.mubr.msk.bf16.vlgmr.msra.gmra.mrb[20].mxu1 %vm1280_vm5, %v2048_v15 }
 0x712   :  { %2250 = vmatpush1.bf16.msra.mxu1 %v6137_v42  ;;  %2281 = vmatprep.mubr.bf16.mxu1 %v5713_v1 }
 0x713   :  { %2251 = vmatprep.subr.bf16.mxu1 %v6142_v43 }
 0x716   :  { %2252 = vmatpush1.bf16.msra.mxu1 %v6144_v44 }
 0x717   :  { %2253 = vmatprep.subr.bf16.mxu1 %v6148_v45 }
 0x71a   :  { %2254 = vmatpush1.bf16.msra.mxu1 %v6150_v46 }
 0x71b   :  { %2255 = vmatprep.subr.bf16.mxu1 %v6154_v47 }
 0x71e   :  { %2256 = vmatpush1.bf16.msra.mxu1 %v6156_v48 }
 0x71f   :  { %2451 = vmatprep.subr.bf16.mxu1 %v6135_v41 }
 0x7e4   :  { %v2086_v30 = vpop.f32.mrb[20].mxu1 }
 0x7e5   :  { %v2095_v31 = vrot.slane %v2086_v30, 7  ;;  %v2103_v32 = vadd.f32 %v2086_v30, %v6183_v7  ;;  %v2088_v33 = vpop.f32.mrb[21].mxu1 }
 0x7e6   :  { %v2090_v34 = vpop.f32.mrb[22].mxu1  ;;  %v2096_v39 = vrot.slane %v2088_v33, 7  ;;  %v2104_v49 = vadd.f32 %v2088_v33, %v6190_v20 }
 0x7e7   :  { %v2101_v35 = vadd.f32 %v2095_v31, %v6181_v5  ;;  %v4708_v36 = vmul.f32 -1.442695, %v2103_v32  ;;  %v2091_v37 = vpop.f32.mrb[23].mxu1 }
 0x7e8   :  { %v2102_v52 = vadd.f32 %v2096_v39, %v6188_v18  ;;  %v4710_v9 = vmul.f32 -1.442695, %v2104_v49 }
 0x7e9   :  { %v4707_v38 = vmul.f32 -1.442695, %v2101_v35  ;;  %5077 = vpow2.f32 %v4708_v36 }
 0x7ea   :  { %v4709_v11 = vmul.f32 -1.442695, %v2102_v52 }
 0x7eb   :  { %5079 = vpow2.f32 %v4707_v38 }
 0x7ec   :  { %5081 = vtanh.f32 %v2104_v49 }
 0x7f3   :  { %v5078_v50 = vpop.eup %5077 }
 0x7f4   :  { %v2112_v53 = vadd.f32 1.0, %v5078_v50 }
 0x7f5   :  { %v5080_v54 = vpop.eup %5079 }
 0x7f6   :  { %v2111_v55 = vadd.f32 1.0, %v5080_v54  ;;  %5083 = vrcp.f32 %v2112_v53  ;;  %v5082_v57 = vpop.eup %5081 }
 0x7f7   :  { %5085 = vtanh.f32 %v2102_v52 }
 0x7f8   :  { %5087 = vrcp.f32 %v2111_v55 }
 0x7f9   :  { %5089 = vpow2.f32 %v4710_v9 }
 0x7fa   :  { %5091 = vpow2.f32 %v4709_v11 }
 0x800   :  { %v5084_v60 = vpop.eup %5083 }
 0x801   :  { %v5086_v61 = vpop.eup %5085  ;;  %v2140_v2 = vmul.f32 %v5084_v60, %v5082_v57  ;;  %v2138_v3 = vmul.f32 %v5084_v60, %v2134_v58 }
 0x802   :  { %v5088_v4 = vpop.eup %5087 }
 0x803   :  { %2145 = vrot.lane.b32.xlu1 %v2140_v2, %s5701_s19  ;;  %v2139_v6 = vmul.f32 %v5088_v4, %v5086_v61  ;;  %v2137_v8 = vmul.f32 %v5088_v4, %v2133_v63  ;;  %v5090_v12 = vpop.eup %5089 }
 0x804   :  { %v5092_v13 = vpop.eup %5091  ;;  %v2126_v51 = vadd.f32 1.0, %v5090_v12 }
 0x805   :  { %2143 = vrot.lane.b32.xlu0 %v2139_v6, %s5701_s19  ;;  %v2125_v14 = vadd.f32 1.0, %v5092_v13 }
 0x806   :  { %5093 = vrcp.f32 %v2126_v51 }
 0x810   :  { %v5094_v24 = vpop.eup %5093 }
 0x875   :  { %v2146_v16 = vpop.permute.xlu1 %2145 }
 0x876   :  { %v6239_v17 = vadd.f32 %v2146_v16, %v2138_v3 }
 0x877   :  { %v2144_v40 = vpop.permute.xlu0 %2143 }
 0x878   :  { %5095 = vtanh.f32 %v6239_v17  ;;  %v6242_v19 = vadd.f32 %v2144_v40, %v2137_v8 }
 0x879   :  { %5097 = vrcp.f32 %v2125_v14 }
 0x87a   :  { %5099 = vtanh.f32 %v6242_v19 }
 0x882   :  { %v5096_v21 = vpop.eup %5095 }
 0x883   :  { %v5098_v22 = vpop.eup %5097  ;;  %v2154_v23 = vmul.f32 %v5096_v21, %v5094_v24 }
 0x884   :  { %v5100_v25 = vpop.eup %5099 }
 0x885   :  { %v2153_v26 = vmul.f32 %v5100_v25, %v5098_v22  ;;  %v2156_v27 = vpack.c.bf16 %v2154_v23, %v2154_v23  ;;  %v2332_v23 = vrot.slane %v6242_v19, 7 }
 0x887   :  { %v2155_v28 = vpack.c.bf16 %v2153_v26, %v2153_v26  ;;  %v2179_v15 = vrot.slane %v2156_v27, %v6203_v0  ;;  %v2240_v33 = vunpack.c.l.b16 %v2156_v27  ;;  %v2333_v26 = vrot.slane %v6239_v17, 7 }
 0x889   :  { %v2186_v30 = vrot.slane %v2179_v15, %v6203_v0  ;;  %v2239_v31 = vunpack.c.l.b16 %v2155_v28  ;;  %v2165_v32 = vrot.slane %v2155_v28, %v6203_v0 }
 0x88b   :  { %v2241_v34 = vrot.slane %v2239_v31, 1  ;;  %v2172_v35 = vrot.slane %v2165_v32, %v6203_v0  ;;  %v2207_v36 = vrot.slane %v2186_v30, %v6207_v10 }
 0x88d   :  { %v2242_v37 = vsel %vm2020_vm7, %v2240_v33, %v2241_v34  ;;  %v2193_v38 = vrot.slane %v2172_v35, %v6207_v10  ;;  %v2214_v50 = vrot.slane %v2207_v36, %v6207_v10 }
 0x88e   :  { %v2243_v39 = vpack.c.b16 %v2242_v37, %v2242_v37 }
 0x88f   :  { %v2200_v49 = vrot.slane %v2193_v38, %v6207_v10  ;;  %v2216_v53 = vunpack.c.l.b16 %v2214_v50 }
 0x890   :  { %2244 = vrot.lane.b32.xlu0 %v2243_v39, %s5701_s19 }
 0x891   :  { %v2215_v52 = vunpack.c.l.b16 %v2200_v49 }
 0x893   :  { %v2217_v54 = vrot.slane %v2215_v52, 1 }
 0x895   :  { %v6256_v55 = vsel %vm2020_vm7, %v2216_v53, %v2217_v54 }
 0x902   :  { %v2245_v57 = vpop.permute.xlu0 %2244 }
 0x903   :  { %4711 = vmatmul.mubr.msk.bf16.vlgmr.msra.gmra.mrb[24].mxu1 %vm1280_vm5, %v2245_v57 }
 0x904   :  { %2452 = vmatpush1.bf16.msra.mxu1 %v6137_v42  ;;  %2483 = vmatprep.mubr.bf16.mxu1 %v5713_v1 }
 0x905   :  { %2453 = vmatprep.subr.bf16.mxu1 %v6142_v43 }
 0x908   :  { %2454 = vmatpush1.bf16.msra.mxu1 %v6144_v44 }
 0x909   :  { %2455 = vmatprep.subr.bf16.mxu1 %v6148_v45 }
 0x90c   :  { %2456 = vmatpush1.bf16.msra.mxu1 %v6150_v46 }
 0x90d   :  { %2457 = vmatprep.subr.bf16.mxu1 %v6154_v47 }
 0x910   :  { %2458 = vmatpush1.bf16.msra.mxu1 %v6156_v48 }
 0x911   :  { %2855 = vmatprep.subr.bf16.mxu1 %v6135_v41 }
 0x9d6   :  { %v2283_v58 = vpop.f32.mrb[24].mxu1 }
 0x9d7   :  { %v2292_v60 = vrot.slane %v2283_v58, 6  ;;  %v2294_v61 = vrot.slane %v2283_v58, 7  ;;  %v2285_v63 = vpop.f32.mrb[25].mxu1 }
 0x9d8   :  { %v2287_v2 = vpop.f32.mrb[26].mxu1  ;;  %v2293_v11 = vrot.slane %v2285_v63, 6  ;;  %v2295_v12 = vrot.slane %v2285_v63, 7 }
 0x9d9   :  { %v2300_v3 = vadd.f32 %v2292_v60, %v6181_v5  ;;  %v2302_v4 = vadd.f32 %v2294_v61, %v6183_v7  ;;  %v2288_v6 = vpop.f32.mrb[27].mxu1 }
 0x9da   :  { %v2301_v13 = vadd.f32 %v2293_v11, %v6188_v18  ;;  %v2303_v51 = vadd.f32 %v2295_v12, %v6190_v20 }
 0x9db   :  { %v4712_v8 = vmul.f32 -1.442695, %v2300_v3  ;;  %v4713_v9 = vmul.f32 -1.442695, %v2302_v4 }
 0x9dc   :  { %v4714_v32 = vmul.f32 -1.442695, %v2301_v13  ;;  %v4715_v33 = vmul.f32 -1.442695, %v2303_v51 }
 0x9dd   :  { %5101 = vpow2.f32 %v4712_v8 }
 0x9de   :  { %5103 = vpow2.f32 %v4713_v9 }
 0x9df   :  { %5105 = vtanh.f32 %v2301_v13 }
 0x9e0   :  { %5107 = vtanh.f32 %v2303_v51 }
 0x9e7   :  { %v5102_v14 = vpop.eup %5101 }
 0x9e8   :  { %v5104_v16 = vpop.eup %5103  ;;  %v2310_v40 = vadd.f32 1.0, %v5102_v14 }
 0x9e9   :  { %v2311_v24 = vadd.f32 1.0, %v5104_v16  ;;  %v5106_v21 = vpop.eup %5105 }
 0x9ea   :  { %5109 = vrcp.f32 %v2310_v40  ;;  %v5108_v22 = vpop.eup %5107 }
 0x9eb   :  { %5111 = vrcp.f32 %v2311_v24 }
 0x9ec   :  { %5113 = vpow2.f32 %v4714_v32 }
 0x9ed   :  { %5115 = vpow2.f32 %v4715_v33 }
 0x9f4   :  { %v5110_v25 = vpop.eup %5109 }
 0x9f5   :  { %v5112_v27 = vpop.eup %5111  ;;  %v2338_v28 = vmul.f32 %v5110_v25, %v5106_v21  ;;  %v2336_v15 = vmul.f32 %v5110_v25, %v2332_v23 }
 0x9f6   :  { %v2339_v30 = vmul.f32 %v5112_v27, %v5108_v22  ;;  %v2337_v31 = vmul.f32 %v5112_v27, %v2333_v26  ;;  %v5114_v34 = vpop.eup %5113 }
 0x9f7   :  { %2342 = vrot.lane.b32.xlu1 %v2338_v28, %s5701_s19  ;;  %v5116_v35 = vpop.eup %5115  ;;  %v2324_v36 = vadd.f32 1.0, %v5114_v34 }
 0x9f8   :  { %2344 = vrot.lane.b32.xlu0 %v2339_v30, %s5701_s19  ;;  %v2325_v19 = vadd.f32 1.0, %v5116_v35 }
 0x9f9   :  { %5117 = vrcp.f32 %v2324_v36 }
 0x9fa   :  { %5119 = vrcp.f32 %v2325_v19 }
 0xa03   :  { %v5118_v49 = vpop.eup %5117 }
 0xa04   :  { %v5120_v50 = vpop.eup %5119 }
 0xa69   :  { %v2343_v37 = vpop.permute.xlu1 %2342 }
 0xa6a   :  { %v2345_v17 = vpop.permute.xlu0 %2344  ;;  %v6276_v38 = vadd.f32 %v2343_v37, %v2336_v15 }
 0xa6b   :  { %v6278_v39 = vadd.f32 %v2345_v17, %v2337_v31 }
 0xa6c   :  { %5121 = vtanh.f32 %v6276_v38 }
 0xa6d   :  { %5123 = vtanh.f32 %v6278_v39 }
 0xa76   :  { %v5122_v52 = vpop.eup %5121 }
 0xa77   :  { %v5124_v53 = vpop.eup %5123  ;;  %v2352_v54 = vmul.f32 %v5122_v52, %v5118_v49 }
 0xa78   :  { %v2353_v57 = vmul.f32 %v5124_v53, %v5120_v50 }
 0xa79   :  { %v2354_v58 = vpack.c.bf16 %v2352_v54, %v2352_v54 }
 0xa7a   :  { %v2355_v60 = vpack.c.bf16 %v2353_v57, %v2353_v57 }
 0xa7b   :  { %v2440_v61 = vunpack.c.l.b16 %v2354_v58  ;;  %v2364_v63 = vrot.slane %v2354_v58, %v6203_v0  ;;  %v2534_v58 = vrot.slane %v6276_v38, 7 }
 0xa7c   :  { %v2379_v2 = vrot.slane %v2355_v60, %v6203_v0  ;;  %v2441_v3 = vunpack.c.l.b16 %v2355_v60 }
 0xa7d   :  { %v2442_v4 = vrot.slane %v2440_v61, 2  ;;  %v2365_v6 = vcombine.high %v2364_v63, %v2364_v63  ;;  %v2535_v61 = vrot.slane %v6278_v39, 7 }
 0xa7e   :  { %v2380_v8 = vcombine.high %v2379_v2, %v2379_v2  ;;  %v2443_v9 = vrot.slane %v2441_v3, 1 }
 0xa7f   :  { %v2372_v11 = vrot.slane %v2365_v6, %v6203_v0 }
 0xa80   :  { %v2387_v12 = vrot.slane %v2380_v8, %v6203_v0  ;;  %v2444_v13 = vsel %vm2020_vm7, %v2443_v9, %v2442_v4 }
 0xa81   :  { %v2445_v51 = vpack.c.b16 %v2444_v13, %v2444_v13  ;;  %v2394_v14 = vrot.slane %v2372_v11, %v6207_v10 }
 0xa82   :  { %v2408_v16 = vrot.slane %v2387_v12, %v6207_v10 }
 0xa83   :  { %2446 = vrot.lane.b32.xlu1 %v2445_v51, %s5701_s19  ;;  %v2401_v40 = vrot.slane %v2394_v14, %v6207_v10 }
 0xa84   :  { %v2415_v24 = vrot.slane %v2408_v16, %v6207_v10 }
 0xa85   :  { %v2416_v22 = vunpack.c.l.b16 %v2401_v40 }
 0xa86   :  { %v2417_v21 = vunpack.c.l.b16 %v2415_v24 }
 0xa88   :  { %v2418_v23 = vrot.slane %v2417_v21, 7 }
 0xa8a   :  { %v6293_v25 = vsel %vm2020_vm7, %v2418_v23, %v2416_v22 }
 0xaf5   :  { %v2447_v26 = vpop.permute.xlu1 %2446 }
 0xaf6   :  { %4716 = vmatmul.mubr.msk.bf16.vlgmr.msra.gmra.mrb[28].mxu1 %vm1280_vm5, %v2447_v26 }
 0xaf7   :  { %2856 = vmatpush1.bf16.msra.mxu1 %v6137_v42  ;;  %2887 = vmatprep.mubr.bf16.mxu1 %v5713_v1 }
 0xaf8   :  { %2857 = vmatprep.subr.bf16.mxu1 %v6142_v43 }
 0xafb   :  { %2858 = vmatpush1.bf16.msra.mxu1 %v6144_v44 }
 0xafc   :  { %2859 = vmatprep.subr.bf16.mxu1 %v6148_v45 }
 0xaff   :  { %2860 = vmatpush1.bf16.msra.mxu1 %v6150_v46 }
 0xb00   :  { %2861 = vmatprep.subr.bf16.mxu1 %v6154_v47 }
 0xb03   :  { %2862 = vmatpush1.bf16.msra.mxu1 %v6156_v48 }
 0xb04   :  { %3261 = vmatprep.subr.bf16.mxu1 %v6135_v41 }
 0xbc9   :  { %v2485_v27 = vpop.f32.mrb[28].mxu1 }
 0xbca   :  { %v2494_v28 = vrot.slane %v2485_v27, 5  ;;  %v2496_v15 = vrot.slane %v2485_v27, 6  ;;  %v2487_v30 = vpop.f32.mrb[29].mxu1 }
 0xbcb   :  { %v2489_v31 = vpop.f32.mrb[30].mxu1  ;;  %v2495_v19 = vrot.slane %v2487_v30, 5  ;;  %v2497_v37 = vrot.slane %v2487_v30, 6 }
 0xbcc   :  { %v2502_v32 = vadd.f32 %v2494_v28, %v6181_v5  ;;  %v2504_v33 = vadd.f32 %v2496_v15, %v6183_v7  ;;  %v2490_v34 = vpop.f32.mrb[31].mxu1 }
 0xbcd   :  { %v2503_v17 = vadd.f32 %v2495_v19, %v6188_v18  ;;  %v2505_v41 = vadd.f32 %v2497_v37, %v6190_v20 }
 0xbce   :  { %v4717_v35 = vmul.f32 -1.442695, %v2502_v32  ;;  %v4718_v36 = vmul.f32 -1.442695, %v2504_v33 }
 0xbcf   :  { %v4719_v8 = vmul.f32 -1.442695, %v2503_v17  ;;  %v4720_v9 = vmul.f32 -1.442695, %v2505_v41 }
 0xbd0   :  { %5125 = vpow2.f32 %v4717_v35 }
 0xbd1   :  { %5127 = vpow2.f32 %v4718_v36 }
 0xbd2   :  { %5129 = vtanh.f32 %v2503_v17 }
 0xbd3   :  { %5131 = vtanh.f32 %v2505_v41 }
 0xbda   :  { %v5126_v49 = vpop.eup %5125 }
 0xbdb   :  { %v5128_v50 = vpop.eup %5127  ;;  %v2512_v52 = vadd.f32 1.0, %v5126_v49 }
 0xbdc   :  { %v2513_v53 = vadd.f32 1.0, %v5128_v50  ;;  %v5130_v54 = vpop.eup %5129 }
 0xbdd   :  { %5133 = vrcp.f32 %v2512_v52  ;;  %v5132_v57 = vpop.eup %5131 }
 0xbde   :  { %5135 = vrcp.f32 %v2513_v53 }
 0xbdf   :  { %5137 = vpow2.f32 %v4719_v8 }
 0xbe0   :  { %5139 = vpow2.f32 %v4720_v9 }
 0xbe7   :  { %v5134_v60 = vpop.eup %5133 }
 0xbe8   :  { %v5136_v63 = vpop.eup %5135  ;;  %v2540_v2 = vmul.f32 %v5134_v60, %v5130_v54  ;;  %v2538_v3 = vmul.f32 %v5134_v60, %v2534_v58 }
 0xbe9   :  { %v2541_v4 = vmul.f32 %v5136_v63, %v5132_v57  ;;  %v2539_v6 = vmul.f32 %v5136_v63, %v2535_v61  ;;  %v5138_v11 = vpop.eup %5137 }
 0xbea   :  { %2544 = vrot.lane.b32.xlu0 %v2540_v2, %s5701_s19  ;;  %v5140_v12 = vpop.eup %5139  ;;  %v2526_v13 = vadd.f32 1.0, %v5138_v11 }
 0xbeb   :  { %2546 = vrot.lane.b32.xlu1 %v2541_v4, %s5701_s19  ;;  %v2527_v38 = vadd.f32 1.0, %v5140_v12 }
 0xbec   :  { %5141 = vrcp.f32 %v2526_v13 }
 0xbed   :  { %5143 = vrcp.f32 %v2527_v38 }
 0xbf6   :  { %v5142_v40 = vpop.eup %5141 }
 0xbf7   :  { %v5144_v24 = vpop.eup %5143 }
 0xc5c   :  { %v2545_v51 = vpop.permute.xlu0 %2544 }
 0xc5d   :  { %v2547_v39 = vpop.permute.xlu1 %2546  ;;  %v6313_v14 = vadd.f32 %v2545_v51, %v2538_v3 }
 0xc5e   :  { %v6315_v16 = vadd.f32 %v2547_v39, %v2539_v6 }
 0xc5f   :  { %5145 = vtanh.f32 %v6313_v14 }
 0xc60   :  { %5147 = vtanh.f32 %v6315_v16 }
 0xc69   :  { %v5146_v21 = vpop.eup %5145 }
 0xc6a   :  { %v5148_v22 = vpop.eup %5147  ;;  %v2554_v23 = vmul.f32 %v5146_v21, %v5142_v40 }
 0xc6b   :  { %v2555_v26 = vmul.f32 %v5148_v22, %v5144_v24 }
 0xc6c   :  { %v2556_v27 = vpack.c.bf16 %v2554_v23, %v2554_v23 }
 0xc6d   :  { %v2557_v28 = vpack.c.bf16 %v2555_v26, %v2555_v26 }
 0xc6e   :  { %v2642_v15 = vunpack.c.l.b16 %v2556_v27  ;;  %v2566_v30 = vrot.slane %v2556_v27, %v6203_v0 }
 0xc6f   :  { %v2581_v31 = vrot.slane %v2557_v28, %v6203_v0  ;;  %v2643_v32 = vunpack.c.l.b16 %v2557_v28  ;;  %v2736_v28 = vrot.slane %v6313_v14, 7 }
 0xc70   :  { %v2644_v33 = vrot.slane %v2642_v15, 3  ;;  %v2567_v34 = vcombine.high %v2566_v30, %v2566_v30  ;;  %v2737_v30 = vrot.slane %v6315_v16, 7 }
 0xc71   :  { %v2582_v35 = vcombine.high %v2581_v31, %v2581_v31  ;;  %v2645_v36 = vrot.slane %v2643_v32, 2 }
 0xc72   :  { %v2574_v19 = vrot.slane %v2567_v34, %v6203_v0 }
 0xc73   :  { %v2589_v37 = vrot.slane %v2582_v35, %v6203_v0  ;;  %v2646_v17 = vsel %vm2020_vm7, %v2645_v36, %v2644_v33 }
 0xc74   :  { %v2647_v41 = vpack.c.b16 %v2646_v17, %v2646_v17  ;;  %v2596_v49 = vrot.slane %v2574_v19, %v6207_v10 }
 0xc75   :  { %v2610_v50 = vrot.slane %v2589_v37, %v6207_v10 }
 0xc76   :  { %2648 = vrot.lane.b32.xlu0 %v2647_v41, %s5701_s19  ;;  %v2603_v52 = vrot.slane %v2596_v49, %v6207_v10 }
 0xc77   :  { %v2617_v53 = vrot.slane %v2610_v50, %v6207_v10 }
 0xc78   :  { %v2618_v54 = vunpack.c.l.b16 %v2603_v52 }
 0xc79   :  { %v2619_v57 = vunpack.c.l.b16 %v2617_v53 }
 0xc7a   :  { %v2620_v58 = vrot.slane %v2618_v54, 1 }
 0xc7c   :  { %v6330_v60 = vsel %vm2020_vm7, %v2619_v57, %v2620_v58 }
 0xce8   :  { %v2649_v61 = vpop.permute.xlu0 %2648 }
 0xce9   :  { %4721 = vmatmul.mubr.msk.bf16.vlgmr.msra.gmra.mrb[12].mxu0 %vm1280_vm5, %v2649_v61 }
 0xcea   :  { %3058 = vmatpush1.bf16.msra.mxu0 %v6137_v42  ;;  %3089 = vmatprep.mubr.bf16.mxu0 %v5713_v1 }
 0xceb   :  { %3059 = vmatprep.subr.bf16.mxu0 %v6142_v43 }
 0xcee   :  { %3060 = vmatpush1.bf16.msra.mxu0 %v6144_v44 }
 0xcef   :  { %3061 = vmatprep.subr.bf16.mxu0 %v6148_v45 }
 0xcf2   :  { %3062 = vmatpush1.bf16.msra.mxu0 %v6150_v46 }
 0xcf3   :  { %3063 = vmatprep.subr.bf16.mxu0 %v6154_v47 }
 0xcf6   :  { %3064 = vmatpush1.bf16.msra.mxu0 %v6156_v48 }
 0xdbc   :  { %v2687_v63 = vpop.f32.mrb[12].mxu0 }
 0xdbd   :  { %v2696_v2 = vrot.slane %v2687_v63, 4  ;;  %v2698_v3 = vrot.slane %v2687_v63, 5  ;;  %v2689_v4 = vpop.f32.mrb[13].mxu0 }
 0xdbe   :  { %v2691_v6 = vpop.f32.mrb[14].mxu0  ;;  %v2697_v38 = vrot.slane %v2689_v4, 4  ;;  %v2699_v51 = vrot.slane %v2689_v4, 5 }
 0xdbf   :  { %v2704_v8 = vadd.f32 %v2696_v2, %v6181_v5  ;;  %v2706_v9 = vadd.f32 %v2698_v3, %v6183_v7  ;;  %v2692_v11 = vpop.f32.mrb[15].mxu0 }
 0xdc0   :  { %v2705_v39 = vadd.f32 %v2697_v38, %v6188_v18  ;;  %v2707_v40 = vadd.f32 %v2699_v51, %v6190_v20 }
 0xdc1   :  { %v4722_v12 = vmul.f32 -1.442695, %v2704_v8  ;;  %v4723_v13 = vmul.f32 -1.442695, %v2706_v9 }
 0xdc2   :  { %v4724_v36 = vmul.f32 -1.442695, %v2705_v39  ;;  %v4725_v19 = vmul.f32 -1.442695, %v2707_v40 }
 0xdc3   :  { %5149 = vpow2.f32 %v4722_v12 }
 0xdc4   :  { %5151 = vpow2.f32 %v4723_v13 }
 0xdc5   :  { %5153 = vtanh.f32 %v2705_v39 }
 0xdc6   :  { %5155 = vtanh.f32 %v2707_v40 }
 0xdcd   :  { %v5150_v24 = vpop.eup %5149 }
 0xdce   :  { %v5152_v21 = vpop.eup %5151  ;;  %v2714_v22 = vadd.f32 1.0, %v5150_v24 }
 0xdcf   :  { %v2715_v23 = vadd.f32 1.0, %v5152_v21  ;;  %v5154_v26 = vpop.eup %5153 }
 0xdd0   :  { %5157 = vrcp.f32 %v2714_v22  ;;  %v5156_v27 = vpop.eup %5155 }
 0xdd1   :  { %5159 = vrcp.f32 %v2715_v23 }
 0xdd2   :  { %5161 = vpow2.f32 %v4724_v36 }
 0xdd3   :  { %5163 = vpow2.f32 %v4725_v19 }
 0xdda   :  { %v5158_v15 = vpop.eup %5157 }
 0xddb   :  { %v5160_v31 = vpop.eup %5159  ;;  %v2742_v32 = vmul.f32 %v5158_v15, %v5154_v26  ;;  %v2740_v33 = vmul.f32 %v5158_v15, %v2736_v28 }
 0xddc   :  { %v2743_v34 = vmul.f32 %v5160_v31, %v5156_v27  ;;  %v2741_v35 = vmul.f32 %v5160_v31, %v2737_v30  ;;  %v5162_v37 = vpop.eup %5161 }
 0xddd   :  { %2746 = vrot.lane.b32.xlu1 %v2742_v32, %s5701_s19  ;;  %v5164_v17 = vpop.eup %5163  ;;  %v2728_v41 = vadd.f32 1.0, %v5162_v37 }
 0xdde   :  { %2748 = vrot.lane.b32.xlu0 %v2743_v34, %s5701_s19  ;;  %v2729_v14 = vadd.f32 1.0, %v5164_v17 }
 0xddf   :  { %5165 = vrcp.f32 %v2728_v41 }
 0xde0   :  { %5167 = vrcp.f32 %v2729_v14 }
 0xde9   :  { %v5166_v53 = vpop.eup %5165 }
 0xdea   :  { %v5168_v54 = vpop.eup %5167 }
 0xe4f   :  { %v2747_v49 = vpop.permute.xlu1 %2746 }
 0xe50   :  { %v2749_v16 = vpop.permute.xlu0 %2748  ;;  %v6349_v50 = vadd.f32 %v2747_v49, %v2740_v33 }
 0xe51   :  { %v6351_v52 = vadd.f32 %v2749_v16, %v2741_v35 }
 0xe52   :  { %5169 = vtanh.f32 %v6349_v50 }
 0xe53   :  { %5171 = vtanh.f32 %v6351_v52 }
 0xe5c   :  { %v5170_v57 = vpop.eup %5169 }
 0xe5d   :  { %v5172_v58 = vpop.eup %5171  ;;  %v2756_v61 = vmul.f32 %v5170_v57, %v5166_v53 }
 0xe5e   :  { %v2757_v63 = vmul.f32 %v5172_v58, %v5168_v54  ;;  %v2938_v54 = vrot.slane %v6349_v50, 7  ;;  %v2939_v58 = vrot.slane %v6351_v52, 7 }
 0xe5f   :  { %v2758_v2 = vpack.c.bf16 %v2756_v61, %v2756_v61 }
 0xe60   :  { %v2759_v3 = vpack.c.bf16 %v2757_v63, %v2757_v63 }
 0xe61   :  { %v2844_v4 = vunpack.c.l.b16 %v2758_v2  ;;  %v2768_v6 = vrot.slane %v2758_v2, %v6203_v0 }
 0xe62   :  { %v2783_v8 = vrot.slane %v2759_v3, %v6203_v0  ;;  %v2845_v9 = vunpack.c.l.b16 %v2759_v3 }
 0xe63   :  { %v2846_v11 = vrot.slane %v2844_v4, 4  ;;  %v2775_v12 = vrot.slane %v2768_v6, %v6203_v0 }
 0xe64   :  { %v2790_v13 = vrot.slane %v2783_v8, %v6203_v0  ;;  %v2847_v38 = vrot.slane %v2845_v9, 3 }
 0xe65   :  { %v2776_v51 = vcombine.high %v2775_v12, %v2775_v12 }
 0xe66   :  { %v2791_v39 = vcombine.high %v2790_v13, %v2790_v13  ;;  %v2848_v40 = vsel %vm2020_vm7, %v2847_v38, %v2846_v11 }
 0xe67   :  { %v2849_v24 = vpack.c.b16 %v2848_v40, %v2848_v40  ;;  %v2798_v21 = vrot.slane %v2776_v51, %v6207_v10 }
 0xe68   :  { %v2812_v22 = vrot.slane %v2791_v39, %v6207_v10 }
 0xe69   :  { %2850 = vrot.lane.b32.xlu1 %v2849_v24, %s5701_s19  ;;  %v2805_v23 = vrot.slane %v2798_v21, %v6207_v10 }
 0xe6a   :  { %v2819_v26 = vrot.slane %v2812_v22, %v6207_v10 }
 0xe6b   :  { %v2820_v28 = vunpack.c.l.b16 %v2805_v23 }
 0xe6c   :  { %v2821_v27 = vunpack.c.l.b16 %v2819_v26 }
 0xe6e   :  { %v2822_v15 = vrot.slane %v2821_v27, 7 }
 0xe70   :  { %v6366_v30 = vsel %vm2020_vm7, %v2822_v15, %v2820_v28 }
 0xedb   :  { %v2851_v31 = vpop.permute.xlu1 %2850 }
 0xedc   :  { %4726 = vmatmul.mubr.msk.bf16.vlgmr.msra.gmra.mrb[32].mxu1 %vm1280_vm5, %v2851_v31 }
 0xedd   :  { %3262 = vmatpush1.bf16.msra.mxu1 %v6137_v42  ;;  %3293 = vmatprep.mubr.bf16.mxu1 %v5713_v1 }
 0xede   :  { %3263 = vmatprep.subr.bf16.mxu1 %v6142_v43 }
 0xee1   :  { %3264 = vmatpush1.bf16.msra.mxu1 %v6144_v44 }
 0xee2   :  { %3265 = vmatprep.subr.bf16.mxu1 %v6148_v45 }
 0xee5   :  { %3266 = vmatpush1.bf16.msra.mxu1 %v6150_v46 }
 0xee6   :  { %3267 = vmatprep.subr.bf16.mxu1 %v6154_v47 }
 0xee9   :  { %3268 = vmatpush1.bf16.msra.mxu1 %v6156_v48 }
 0xfaf   :  { %v2889_v32 = vpop.f32.mrb[32].mxu1 }
 0xfb0   :  { %v2898_v33 = vrot.slane %v2889_v32, 3  ;;  %v2900_v34 = vrot.slane %v2889_v32, 4  ;;  %v2891_v35 = vpop.f32.mrb[33].mxu1 }
 0xfb1   :  { %v2893_v36 = vpop.f32.mrb[34].mxu1  ;;  %v2899_v45 = vrot.slane %v2891_v35, 3  ;;  %v2901_v46 = vrot.slane %v2891_v35, 4 }
 0xfb2   :  { %v2906_v42 = vadd.f32 %v2898_v33, %v6181_v5  ;;  %v2908_v19 = vadd.f32 %v2900_v34, %v6183_v7  ;;  %v2894_v43 = vpop.f32.mrb[35].mxu1 }
 0xfb3   :  { %v2907_v47 = vadd.f32 %v2899_v45, %v6188_v18  ;;  %v2909_v48 = vadd.f32 %v2901_v46, %v6190_v20 }
 0xfb4   :  { %v4727_v37 = vmul.f32 -1.442695, %v2906_v42  ;;  %v4728_v44 = vmul.f32 -1.442695, %v2908_v19 }
 0xfb5   :  { %v4729_v6 = vmul.f32 -1.442695, %v2907_v47  ;;  %v4730_v8 = vmul.f32 -1.442695, %v2909_v48 }
 0xfb6   :  { %5173 = vpow2.f32 %v4727_v37 }
 0xfb7   :  { %5175 = vpow2.f32 %v4728_v44 }
 0xfb8   :  { %5177 = vtanh.f32 %v2907_v47 }
 0xfb9   :  { %5179 = vtanh.f32 %v2909_v48 }
 0xfc0   :  { %v5174_v17 = vpop.eup %5173 }
 0xfc1   :  { %v5176_v41 = vpop.eup %5175  ;;  %v2916_v14 = vadd.f32 1.0, %v5174_v17 }
 0xfc2   :  { %v2917_v49 = vadd.f32 1.0, %v5176_v41  ;;  %v5178_v16 = vpop.eup %5177 }
 0xfc3   :  { %5181 = vrcp.f32 %v2916_v14  ;;  %v5180_v53 = vpop.eup %5179 }
 0xfc4   :  { %5183 = vrcp.f32 %v2917_v49 }
 0xfc5   :  { %5185 = vpow2.f32 %v4729_v6 }
 0xfc6   :  { %5187 = vpow2.f32 %v4730_v8 }
 0xfcd   :  { %v5182_v57 = vpop.eup %5181 }
 0xfce   :  { %v5184_v61 = vpop.eup %5183  ;;  %v2944_v63 = vmul.f32 %v5182_v57, %v5178_v16  ;;  %v2942_v2 = vmul.f32 %v5182_v57, %v2938_v54 }
 0xfcf   :  { %v2945_v3 = vmul.f32 %v5184_v61, %v5180_v53  ;;  %v2943_v4 = vmul.f32 %v5184_v61, %v2939_v58  ;;  %v5186_v9 = vpop.eup %5185 }
 0xfd0   :  { %2948 = vrot.lane.b32.xlu0 %v2944_v63, %s5701_s19  ;;  %v5188_v11 = vpop.eup %5187  ;;  %v2930_v12 = vadd.f32 1.0, %v5186_v9 }
 0xfd1   :  { %2950 = vrot.lane.b32.xlu1 %v2945_v3, %s5701_s19  ;;  %v2931_v50 = vadd.f32 1.0, %v5188_v11 }
 0xfd2   :  { %5189 = vrcp.f32 %v2930_v12 }
 0xfd3   :  { %5191 = vrcp.f32 %v2931_v50 }
 0xfdc   :  { %v5190_v39 = vpop.eup %5189 }
 0xfdd   :  { %v5192_v40 = vpop.eup %5191 }
0x1042   :  { %v2949_v13 = vpop.permute.xlu0 %2948 }
0x1043   :  { %v2951_v52 = vpop.permute.xlu1 %2950  ;;  %v6385_v38 = vadd.f32 %v2949_v13, %v2942_v2 }
0x1044   :  { %v6387_v51 = vadd.f32 %v2951_v52, %v2943_v4 }
0x1045   :  { %5193 = vtanh.f32 %v6385_v38 }
0x1046   :  { %5195 = vtanh.f32 %v6387_v51 }
0x104f   :  { %v5194_v24 = vpop.eup %5193 }
0x1050   :  { %v5196_v21 = vpop.eup %5195  ;;  %v2958_v22 = vmul.f32 %v5194_v24, %v5190_v39  ;;  %v3140_v24 = vrot.slane %v6385_v38, 7 }
0x1051   :  { %v2959_v23 = vmul.f32 %v5196_v21, %v5192_v40 }
0x1052   :  { %v2960_v26 = vpack.c.bf16 %v2958_v22, %v2958_v22  ;;  %v3141_v22 = vrot.slane %v6387_v51, 7 }
0x1053   :  { %v2961_v27 = vpack.c.bf16 %v2959_v23, %v2959_v23 }
0x1054   :  { %v3046_v28 = vunpack.c.l.b16 %v2960_v26  ;;  %v2970_v15 = vrot.slane %v2960_v26, %v6203_v0 }
0x1055   :  { %v2985_v31 = vrot.slane %v2961_v27, %v6203_v0  ;;  %v3047_v32 = vunpack.c.l.b16 %v2961_v27 }
0x1056   :  { %v3048_v33 = vrot.slane %v3046_v28, 5  ;;  %v2977_v34 = vrot.slane %v2970_v15, %v6203_v0 }
0x1057   :  { %v2992_v35 = vrot.slane %v2985_v31, %v6203_v0  ;;  %v3049_v36 = vrot.slane %v3047_v32, 4 }
0x1058   :  { %v2978_v42 = vcombine.high %v2977_v34, %v2977_v34 }
0x1059   :  { %v2993_v19 = vcombine.high %v2992_v35, %v2992_v35  ;;  %v3050_v43 = vsel %vm2020_vm7, %v3049_v36, %v3048_v33 }
0x105a   :  { %v3051_v37 = vpack.c.b16 %v3050_v43, %v3050_v43  ;;  %v3000_v44 = vrot.slane %v2978_v42, %v6207_v10 }
0x105b   :  { %v3014_v45 = vrot.slane %v2993_v19, %v6207_v10 }
0x105c   :  { %3052 = vrot.lane.b32.xlu0 %v3051_v37, %s5701_s19  ;;  %v3007_v46 = vrot.slane %v3000_v44, %v6207_v10 }
0x105d   :  { %v3021_v47 = vrot.slane %v3014_v45, %v6207_v10 }
0x105e   :  { %v3022_v48 = vunpack.c.l.b16 %v3007_v46 }
0x105f   :  { %v3023_v17 = vunpack.c.l.b16 %v3021_v47 }
0x1060   :  { %v3024_v41 = vrot.slane %v3022_v48, 1 }
0x1062   :  { %v6402_v14 = vsel %vm2020_vm7, %v3023_v17, %v3024_v41 }
0x10ce   :  { %v3053_v49 = vpop.permute.xlu0 %3052 }
0x10cf   :  { %4731 = vmatmul.mubr.msk.bf16.vlgmr.msra.gmra.mrb[16].mxu0 %vm1280_vm5, %v3053_v49 }
0x10d0   :  { %3614 = vmatprep.mubr.bf16.mxu0 %v5713_v1 }
0x11a2   :  { %v3091_v16 = vpop.f32.mrb[16].mxu0 }
0x11a3   :  { %v3100_v53 = vrot.slane %v3091_v16, 2  ;;  %v3102_v54 = vrot.slane %v3091_v16, 3  ;;  %v3093_v57 = vpop.f32.mrb[17].mxu0 }
0x11a4   :  { %v3095_v58 = vpop.f32.mrb[18].mxu0  ;;  %v3101_v6 = vrot.slane %v3093_v57, 2  ;;  %v3103_v8 = vrot.slane %v3093_v57, 3 }
0x11a5   :  { %v3108_v61 = vadd.f32 %v3100_v53, %v6181_v5  ;;  %v3110_v63 = vadd.f32 %v3102_v54, %v6183_v7  ;;  %v3096_v2 = vpop.f32.mrb[19].mxu0 }
0x11a6   :  { %v3109_v9 = vadd.f32 %v3101_v6, %v6188_v18  ;;  %v3111_v11 = vadd.f32 %v3103_v8, %v6190_v20 }
0x11a7   :  { %v4732_v3 = vmul.f32 -1.442695, %v3108_v61  ;;  %v4733_v4 = vmul.f32 -1.442695, %v3110_v63 }
0x11a8   :  { %v4734_v31 = vmul.f32 -1.442695, %v3109_v9  ;;  %v4735_v32 = vmul.f32 -1.442695, %v3111_v11 }
0x11a9   :  { %5197 = vpow2.f32 %v4732_v3 }
0x11aa   :  { %5199 = vpow2.f32 %v4733_v4 }
0x11ab   :  { %5201 = vtanh.f32 %v3109_v9 }
0x11ac   :  { %5203 = vtanh.f32 %v3111_v11 }
0x11b3   :  { %v5198_v12 = vpop.eup %5197 }
0x11b4   :  { %v5200_v50 = vpop.eup %5199  ;;  %v3118_v13 = vadd.f32 1.0, %v5198_v12 }
0x11b5   :  { %v3119_v52 = vadd.f32 1.0, %v5200_v50  ;;  %v5202_v39 = vpop.eup %5201 }
0x11b6   :  { %5205 = vrcp.f32 %v3118_v13  ;;  %v5204_v40 = vpop.eup %5203 }
0x11b7   :  { %5207 = vrcp.f32 %v3119_v52 }
0x11b8   :  { %5209 = vpow2.f32 %v4734_v31 }
0x11b9   :  { %5211 = vpow2.f32 %v4735_v32 }
0x11c0   :  { %v5206_v21 = vpop.eup %5205 }
0x11c1   :  { %v5208_v23 = vpop.eup %5207  ;;  %v3146_v26 = vmul.f32 %v5206_v21, %v5202_v39  ;;  %v3144_v27 = vmul.f32 %v5206_v21, %v3140_v24 }
0x11c2   :  { %v3147_v28 = vmul.f32 %v5208_v23, %v5204_v40  ;;  %v3145_v15 = vmul.f32 %v5208_v23, %v3141_v22  ;;  %v5210_v33 = vpop.eup %5209 }
0x11c3   :  { %3150 = vrot.lane.b32.xlu1 %v3146_v26, %s5701_s19  ;;  %v5212_v34 = vpop.eup %5211  ;;  %v3132_v35 = vadd.f32 1.0, %v5210_v33 }
0x11c4   :  { %3152 = vrot.lane.b32.xlu0 %v3147_v28, %s5701_s19  ;;  %v3133_v38 = vadd.f32 1.0, %v5212_v34 }
0x11c5   :  { %5213 = vrcp.f32 %v3132_v35 }
0x11c6   :  { %5215 = vrcp.f32 %v3133_v38 }
0x11cf   :  { %v5214_v43 = vpop.eup %5213 }
0x11d0   :  { %v5216_v37 = vpop.eup %5215 }
0x1235   :  { %v3151_v36 = vpop.permute.xlu1 %3150 }
0x1236   :  { %v3153_v51 = vpop.permute.xlu0 %3152  ;;  %v6414_v42 = vadd.f32 %v3151_v36, %v3144_v27 }
0x1237   :  { %v6416_v19 = vadd.f32 %v3153_v51, %v3145_v15 }
0x1238   :  { %5217 = vtanh.f32 %v6414_v42 }
0x1239   :  { %5219 = vtanh.f32 %v6416_v19 }
0x1242   :  { %v5218_v44 = vpop.eup %5217 }
0x1243   :  { %v5220_v45 = vpop.eup %5219  ;;  %v3160_v46 = vmul.f32 %v5218_v44, %v5214_v43 }
0x1244   :  { %v3161_v47 = vmul.f32 %v5220_v45, %v5216_v37  ;;  %v2219_v45 = vpack.c.b16 %v6256_v55, %v6256_v55  ;;  %v2622_v55 = vpack.c.b16 %v6330_v60, %v6330_v60 }
0x1245   :  { %v3162_v48 = vpack.c.bf16 %v3160_v46, %v3160_v46 }
0x1246   :  { %v3163_v17 = vpack.c.bf16 %v3161_v47, %v3161_v47 }
0x1247   :  { %v3250_v41 = vunpack.c.l.b16 %v3162_v48  ;;  %v3172_v49 = vrot.slane %v3162_v48, %v6203_v0 }
0x1248   :  { %v3188_v16 = vrot.slane %v3163_v17, %v6203_v0  ;;  %v3251_v53 = vunpack.c.l.b16 %v3163_v17 }
0x1249   :  { %v3252_v54 = vrot.slane %v3250_v41, 6  ;;  %v3173_v57 = vcombine.high %v3172_v49, %v3172_v49  ;;  %v2420_v49 = vpack.c.b16 %v6293_v25, %v6293_v25 }
0x124a   :  { %v3189_v58 = vcombine.high %v3188_v16, %v3188_v16  ;;  %v3253_v61 = vrot.slane %v3251_v53, 5 }
0x124b   :  { %v3180_v63 = vrot.slane %v3173_v57, %v6203_v0  ;;  %v2824_v57 = vpack.c.b16 %v6366_v30, %v6366_v30 }
0x124c   :  { %v3196_v2 = vrot.slane %v3189_v58, %v6203_v0  ;;  %v3254_v3 = vsel %vm2020_vm7, %v3253_v61, %v3252_v54  ;;  %v2629_v58 = vrot.slane %v2622_v55, %v6203_v0  ;;  %v3026_v61 = vpack.c.b16 %v6402_v14, %v6402_v14  ;;  %v6497_v55 = vld [vmem:[#allocation22 + $0x14] ss:$8 sps:$4 sm:$0xff]  }
0x124d   :  { %v3255_v4 = vpack.c.b16 %v3254_v3, %v3254_v3  ;;  %v3181_v6 = vcombine.high %v3180_v63, %v3180_v63  ;;  %v2831_v63 = vrot.slane %v2824_v57, %v6203_v0  ;;  %v6501_v57 = vld [vmem:[#allocation22 + $0x10] ss:$8 sps:$4 sm:$0xff]  }
0x124e   :  { %v3197_v8 = vcombine.high %v3196_v2, %v3196_v2  ;;  %v2636_v30 = vrot.slane %v2629_v58, %v6203_v0  ;;  %v3033_v3 = vrot.slane %v3026_v61, %v6203_v0  ;;  %v5045_v61 = vld [vmem:[#allocation21 + $0x24] ss:$8 sps:$4 sm:$0xff]  }
0x124f   :  { %3256 = vrot.lane.b32.xlu1 %v3255_v4, %s5701_s19  ;;  %v3204_v9 = vrot.slane %v3181_v6, %v6207_v10  ;;  %v2838_v14 = vrot.slane %v2831_v63, %v6203_v0 }
0x1250   :  { %v3218_v11 = vrot.slane %v3197_v8, %v6207_v10  ;;  %v3040_v6 = vrot.slane %v3033_v3, %v6203_v0  ;;  %v6511_v3 = vld [vmem:[#allocation22 + $0x34] ss:$8 sps:$4 sm:$0xff]  }
0x1251   :  { %v3211_v12 = vrot.slane %v3204_v9, %v6207_v10 }
0x1252   :  { %v3225_v50 = vrot.slane %v3218_v11, %v6207_v10 }
0x1253   :  { %v3226_v52 = vunpack.c.l.b16 %v3211_v12 }
0x1254   :  { %v3227_v13 = vunpack.c.l.b16 %v3225_v50 }
0x1256   :  { %v3228_v39 = vrot.slane %v3227_v13, 7 }
0x1258   :  { %v6431_v40 = vsel %vm2020_vm7, %v3228_v39, %v3226_v52 }
0x1259   :  { %v3230_v2 = vpack.c.b16 %v6431_v40, %v6431_v40 }
0x125b   :  { %v3237_v4 = vrot.slane %v3230_v2, %v6203_v0  ;;  %v5043_v2 = vld [vmem:[#allocation21 + $0x20] ss:$8 sps:$4 sm:$0xff]  }
0x125d   :  { %v3244_v8 = vrot.slane %v3237_v4, %v6203_v0 }
0x12c1   :  { %v3257_v24 = vpop.permute.xlu1 %3256 }
0x12c2   :  { %4736 = vmatmul.mubr.msk.bf16.vlgmr.msra.gmra.mrb[36].mxu1 %vm1280_vm5, %v3257_v24 }
0x12c3   :  { %3754 = vmatprep.mubr.bf16.mxu1 %v5713_v1 }
0x1395   :  { %v3295_v21 = vpop.f32.mrb[36].mxu1 }
0x1396   :  { %v3304_v22 = vrot.slane %v3295_v21, 1  ;;  %v3306_v23 = vrot.slane %v3295_v21, 2  ;;  %v3297_v26 = vpop.f32.mrb[37].mxu1 }
0x1397   :  { %v3299_v27 = vpop.f32.mrb[38].mxu1  ;;  %v3305_v34 = vrot.slane %v3297_v26, 1  ;;  %v3307_v35 = vrot.slane %v3297_v26, 2 }
0x1398   :  { %v3312_v28 = vadd.f32 %v3304_v22, %v6181_v5  ;;  %v3314_v15 = vadd.f32 %v3306_v23, %v6183_v7  ;;  %v3300_v31 = vpop.f32.mrb[39].mxu1  ;;  %v2022_v5 = vpack.c.b16 %v6219_v29, %v6219_v29  ;;  %v2226_v29 = vrot.slane %v2219_v45, %v6203_v0 }
0x1399   :  { %v3313_v38 = vadd.f32 %v3305_v34, %v6188_v18  ;;  %v3315_v36 = vadd.f32 %v3307_v35, %v6190_v20  ;;  %v3344_v18 = vrot.slane %v6414_v42, 7  ;;  %v3345_v20 = vrot.slane %v6416_v19, 7 }
0x139a   :  { %v4737_v32 = vmul.f32 -1.442695, %v3312_v28  ;;  %v4738_v33 = vmul.f32 -1.442695, %v3314_v15  ;;  %v2029_v41 = vrot.slane %v2022_v5, %v6203_v0  ;;  %v2427_v19 = vrot.slane %v2420_v49, %v6203_v0  ;;  %v5031_v49 = vld [vmem:[#allocation21] ss:$8 sps:$4 sm:$0xff]  }
0x139b   :  { %v2233_v25 = vrot.slane %v2226_v29, %v6203_v0  ;;  %v4739_v9 = vmul.f32 -1.442695, %v3313_v38  ;;  %v4740_v11 = vmul.f32 -1.442695, %v3315_v36  ;;  %v6495_v29 = vld [vmem:[#allocation22] ss:$8 sps:$4 sm:$0xff]  }
0x139c   :  { %5221 = vpow2.f32 %v4737_v32  ;;  %v2036_v42 = vrot.slane %v2029_v41, %v6203_v0  ;;  %v2434_v60 = vrot.slane %v2427_v19, %v6203_v0  ;;  %v6492_v41 = vld [vmem:[#allocation22 + $0x4] ss:$8 sps:$4 sm:$0xff]   ;;  %v5037_v19 = vld [vmem:[#allocation21 + $0x10] ss:$8 sps:$4 sm:$0xff]  }
0x139d   :  { %5223 = vpow2.f32 %v4738_v33  ;;  %3722 = vmatprep.subr.bf16.mxu1 %v6492_v41 }
0x139e   :  { %5225 = vtanh.f32 %v3313_v38  ;;  %3723 = vmatpush1.bf16.msra.mxu1 %v6495_v29 }
0x139f   :  { %5227 = vtanh.f32 %v3315_v36  ;;  %3724 = vmatprep.subr.bf16.mxu1 %v6497_v55 }
0x13a2   :  { %3725 = vmatpush1.bf16.msra.mxu1 %v6501_v57 }
0x13a6   :  { %v5222_v51 = vpop.eup %5221 }
0x13a7   :  { %v5224_v43 = vpop.eup %5223  ;;  %v3322_v37 = vadd.f32 1.0, %v5222_v51 }
0x13a8   :  { %v3323_v44 = vadd.f32 1.0, %v5224_v43  ;;  %v5226_v7 = vpop.eup %5225 }
0x13a9   :  { %5229 = vrcp.f32 %v3322_v37  ;;  %v5228_v46 = vpop.eup %5227 }
0x13aa   :  { %5231 = vrcp.f32 %v3323_v44 }
0x13ab   :  { %5233 = vpow2.f32 %v4739_v9  ;;  %v6516_v9 = vld [vmem:[#allocation22 + $0x30] ss:$8 sps:$4 sm:$0xff]  }
0x13ac   :  { %5235 = vpow2.f32 %v4740_v11 }
0x13b3   :  { %v5230_v47 = vpop.eup %5229 }
0x13b4   :  { %v5232_v48 = vpop.eup %5231  ;;  %v3350_v17 = vmul.f32 %v5230_v47, %v5226_v7  ;;  %v3348_v16 = vmul.f32 %v5230_v47, %v3344_v18 }
0x13b5   :  { %v3351_v53 = vmul.f32 %v5232_v48, %v5228_v46  ;;  %v3349_v54 = vmul.f32 %v5232_v48, %v3345_v20  ;;  %v5234_v12 = vpop.eup %5233 }
0x13b6   :  { %3354 = vrot.lane.b32.xlu0 %v3350_v17, %s5701_s19  ;;  %v5236_v50 = vpop.eup %5235  ;;  %v3336_v13 = vadd.f32 1.0, %v5234_v12 }
0x13b7   :  { %3356 = vrot.lane.b32.xlu1 %v3351_v53, %s5701_s19  ;;  %v3337_v52 = vadd.f32 1.0, %v5236_v50 }
0x13b8   :  { %5237 = vrcp.f32 %v3336_v13 }
0x13b9   :  { %5239 = vrcp.f32 %v3337_v52 }
0x13ba   :  { %2037 = vrot.lane.b32.xlu0 %v2036_v42, %s5701_s19  ;;  %v5039_v42 = vld [vmem:[#allocation21 + $0x14] ss:$8 sps:$4 sm:$0xff]  }
0x13bb   :  { %2234 = vrot.lane.b32.xlu1 %v2233_v25, %s5701_s19 }
0x13be   :  { %2435 = vrot.lane.b32.xlu0 %v2434_v60, %s5701_s19 }
0x13bf   :  { %2637 = vrot.lane.b32.xlu1 %v2636_v30, %s5701_s19  ;;  %v6508_v30 = vld [vmem:[#allocation22 + $0x20] ss:$8 sps:$4 sm:$0xff]  }
0x13c2   :  { %2839 = vrot.lane.b32.xlu0 %v2838_v14, %s5701_s19  ;;  %v5238_v28 = vpop.eup %5237  ;;  %v5051_v14 = vld [vmem:[#allocation21 + $0x34] ss:$8 sps:$4 sm:$0xff]  }
0x13c3   :  { %3041 = vrot.lane.b32.xlu1 %v3040_v6, %s5701_s19  ;;  %v5240_v15 = vpop.eup %5239 }
0x13c6   :  { %3245 = vrot.lane.b32.xlu0 %v3244_v8, %s5701_s19  ;;  %v5049_v8 = vld [vmem:[#allocation21 + $0x30] ss:$8 sps:$4 sm:$0xff]  }
0x1428   :  { %v3355_v39 = vpop.permute.xlu0 %3354 }
0x1429   :  { %v3357_v40 = vpop.permute.xlu1 %3356  ;;  %v3360_v24 = vadd.f32 %v3355_v39, %v3348_v16  ;;  %v5033_v16 = vld [vmem:[#allocation21 + $0x4] ss:$8 sps:$4 sm:$0xff]  }
0x142a   :  { %v3361_v21 = vadd.f32 %v3357_v40, %v3349_v54  ;;  %3582 = vmatprep.subr.bf16.mxu0 %v5033_v16 }
0x142b   :  { %5241 = vtanh.f32 %v3360_v24  ;;  %3583 = vmatpush1.bf16.msra.mxu0 %v5031_v49 }
0x142c   :  { %5243 = vtanh.f32 %v3361_v21  ;;  %v2038_v22 = vpop.permute.xlu0 %2037  ;;  %3584 = vmatprep.subr.bf16.mxu0 %v5039_v42 }
0x142d   :  { %v2235_v23 = vpop.permute.xlu1 %2234  ;;  %2041 = vst.msk [vmem:[#allocation2] sm:$0x1] %vm2040_vm8, %v2038_v22 }
0x142e   :  { %2238 = vst.msk [vmem:[#allocation2 + $0x1] sm:$0x1] %vm2040_vm8, %v2235_v23 }
0x142f   :  { %3585 = vmatpush1.bf16.msra.mxu0 %v5037_v19 }
0x1430   :  { %v2436_v26 = vpop.permute.xlu0 %2435  ;;  %3586 = vmatprep.subr.bf16.mxu0 %v5045_v61 }
0x1431   :  { %v2638_v27 = vpop.permute.xlu1 %2637  ;;  %2439 = vst.msk [vmem:[#allocation2 + $0x2] sm:$0x1] %vm2040_vm8, %v2436_v26 }
0x1432   :  { %2641 = vst.msk [vmem:[#allocation2 + $0x3] sm:$0x1] %vm2040_vm8, %v2638_v27 }
0x1433   :  { %3587 = vmatpush1.bf16.msra.mxu0 %v5043_v2 }
0x1434   :  { %v2840_v31 = vpop.permute.xlu0 %2839  ;;  %3588 = vmatprep.subr.bf16.mxu0 %v5051_v14  ;;  %v3454_v13 = vld [vmem:[#allocation2] sm:$0x1] }
0x1435   :  { %v5242_v32 = vpop.eup %5241  ;;  %v3042_v33 = vpop.permute.xlu1 %3041  ;;  %2843 = vst.msk [vmem:[#allocation2 + $0x4] sm:$0x1] %vm2040_vm8, %v2840_v31  ;;  %v3455_v52 = vld [vmem:[#allocation2 + $0x1] sm:$0x1] }
0x1436   :  { %v5244_v34 = vpop.eup %5243  ;;  %v3364_v35 = vmul.f32 %v5242_v32, %v5238_v28  ;;  %3045 = vst.msk [vmem:[#allocation2 + $0x5] sm:$0x1] %vm2040_vm8, %v3042_v33  ;;  %v3490_v21 = vcombine.low %v3454_v13, %v3455_v52 }
0x1437   :  { %v3365_v38 = vmul.f32 %v5244_v34, %v5240_v15  ;;  %3589 = vmatpush1.bf16.msra.mxu0 %v5049_v8 }
0x1438   :  { %v3366_v36 = vpack.c.bf16 %v3364_v35, %v3364_v35  ;;  %v3246_v51 = vpop.permute.xlu0 %3245  ;;  %3823 = vmatprep.subr.bf16.mxu0 %v6492_v41  ;;  %v3456_v12 = vld [vmem:[#allocation2 + $0x2] sm:$0x1]  ;;  %v3500_v15 = vrot.slane %v3490_v21, %v6203_v0 }
0x1439   :  { %v3367_v43 = vpack.c.bf16 %v3365_v38, %v3365_v38  ;;  %3249 = vst.msk [vmem:[#allocation2 + $0x6] sm:$0x1] %vm2040_vm8, %v3246_v51  ;;  %v3457_v50 = vld [vmem:[#allocation2 + $0x3] sm:$0x1] }
0x143a   :  { %v3376_v37 = vrot.slane %v3366_v36, %v6203_v0  ;;  %v3491_v39 = vcombine.low %v3456_v12, %v3457_v50 }
0x143b   :  { %v3392_v44 = vrot.slane %v3367_v43, %v6203_v0 }
0x143c   :  { %v3377_v5 = vcombine.high %v3376_v37, %v3376_v37  ;;  %v3458_v40 = vld [vmem:[#allocation2 + $0x4] sm:$0x1]  ;;  %v3507_v23 = vrot.slane %v3491_v39, %v6203_v0 }
0x143d   :  { %v3393_v7 = vcombine.high %v3392_v44, %v3392_v44  ;;  %v3459_v24 = vld [vmem:[#allocation2 + $0x5] sm:$0x1] }
0x143e   :  { %v3384_v45 = vrot.slane %v3377_v5, %v6203_v0  ;;  %v3492_v22 = vcombine.low %v3458_v40, %v3459_v24  ;;  %v3522_v33 = vcombine.low %v3500_v15, %v3507_v23  ;;  %v5716_v5 = vmov 1983009808  }
0x143f   :  { %v3400_v46 = vrot.slane %v3393_v7, %v6203_v0  ;;  %v3632_v7 = vunpack.c.l.s4 %v5716_v5 }
0x1440   :  { %v3385_v18 = vcombine.high %v3384_v45, %v3384_v45  ;;  %v3460_v26 = vld [vmem:[#allocation2 + $0x6] sm:$0x1]  ;;  %v3514_v31 = vrot.slane %v3492_v22, %v6203_v0  ;;  %v3530_v35 = vrot.slane %v3522_v33, %v6203_v0  ;;  %v3470_v45 = vld [vmem:[#allocation24] sm:$0x3] }
0x1441   :  { %v3401_v47 = vcombine.high %v3400_v46, %v3400_v46  ;;  %v3633_v46 = vunpack.c.0.s8 %v3632_v7 }
0x1442   :  { %v3408_v20 = vrot.slane %v3385_v18, %v6207_v10  ;;  %v3475_v18 = vrot.slane %v3470_v45, %v6041_v59 }
0x1443   :  { %v3422_v48 = vrot.slane %v3401_v47, %v6207_v10  ;;  %v3479_v47 = vrot.slane %v3470_v45, %v6045_v62 }
0x1444   :  { %v3415_v17 = vrot.slane %v3408_v20, %v6207_v10 }
0x1445   :  { %v3429_v53 = vrot.slane %v3422_v48, %v6207_v10  ;;  %v6504_v10 = vld [vmem:[#allocation22 + $0x24] ss:$8 sps:$4 sm:$0xff]   ;;  %v6553_v48 = vsub.s32 %v3633_v46, %v6037_v56 }
0x1446   :  { %v3430_v54 = vunpack.c.l.b16 %v3415_v17  ;;  %3726 = vmatprep.subr.bf16.mxu1 %v6504_v10 }
0x1447   :  { %v3431_v25 = vunpack.c.l.b16 %v3429_v53  ;;  %3727 = vmatpush1.bf16.msra.mxu1 %v6508_v30 }
0x1448   :  { %v3432_v58 = vrot.slane %v3430_v54, 1  ;;  %3728 = vmatprep.subr.bf16.mxu1 %v6511_v3 }
0x144a   :  { %v3433_v60 = vsel %vm2020_vm7, %v3431_v25, %v3432_v58 }
0x144b   :  { %v3434_v63 = vpack.c.b16 %v3433_v60, %v3433_v60  ;;  %3729 = vmatpush1.bf16.msra.mxu1 %v6516_v9 }
0x144c   :  { %3917 = vmatprep.subr.bf16.mxu1 %v6492_v41 }
0x144d   :  { %v3441_v4 = vrot.slane %v3434_v63, %v6203_v0 }
0x144e   :  { %3755 = vmatmul.mubr.bf16.vlgmr.msra.gmra.mrb[40].mxu1 %v5713_v1 }
0x144f   :  { %v3448_v6 = vrot.slane %v3441_v4, %v6203_v0  ;;  %3918 = vmatpush1.bf16.msra.mxu1 %v6495_v29  ;;  %3949 = vmatprep.mubr.bf16.mxu1 %v5713_v1 }
0x1450   :  { %3919 = vmatprep.subr.bf16.mxu1 %v6497_v55 }
0x1451   :  { %3449 = vrot.lane.b32.xlu1 %v3448_v6, %s5701_s19 }
0x1453   :  { %3920 = vmatpush1.bf16.msra.mxu1 %v6501_v57 }
0x1454   :  { %3921 = vmatprep.subr.bf16.mxu1 %v6504_v10 }
0x1457   :  { %3922 = vmatpush1.bf16.msra.mxu1 %v6508_v30 }
0x1458   :  { %3923 = vmatprep.subr.bf16.mxu1 %v6511_v3 }
0x145b   :  { %3924 = vmatpush1.bf16.msra.mxu1 %v6516_v9 }
0x145c   :  { %4105 = vmatprep.subr.bf16.mxu1 %v6492_v41 }
0x14c3   :  { %v3450_v11 = vpop.permute.xlu1 %3449 }
0x14c4   :  { %3453 = vst.msk [vmem:[#allocation2 + $0x7] sm:$0x1] %vm2040_vm8, %v3450_v11 }
0x14cb   :  { %v3461_v27 = vld [vmem:[#allocation2 + $0x7] sm:$0x1] }
0x14cc   :  { %v3493_v28 = vcombine.low %v3460_v26, %v3461_v27 }
0x14ce   :  { %v3521_v32 = vrot.slane %v3493_v28, %v6203_v0 }
0x14d0   :  { %v3523_v34 = vcombine.low %v3514_v31, %v3521_v32 }
0x14d2   :  { %v3537_v38 = vrot.slane %v3523_v34, %v6203_v0 }
0x14d4   :  { %v3538_v36 = vcombine.low %v3530_v35, %v3537_v38 }
0x14d6   :  { %4749 = vmatmul.mubr.msk.bf16.vlgmr.msra.gmra.mrb[20].mxu0 %vm1280_vm5, %v3538_v36 }
0x14d7   :  { %3824 = vmatpush1.bf16.msra.mxu0 %v6495_v29  ;;  %3855 = vmatprep.mubr.bf16.mxu0 %v5713_v1 }
0x14d8   :  { %3825 = vmatprep.subr.bf16.mxu0 %v6497_v55 }
0x14db   :  { %3826 = vmatpush1.bf16.msra.mxu0 %v6501_v57 }
0x14dc   :  { %3827 = vmatprep.subr.bf16.mxu0 %v6504_v10 }
0x14df   :  { %3828 = vmatpush1.bf16.msra.mxu0 %v6508_v30 }
0x14e0   :  { %3829 = vmatprep.subr.bf16.mxu0 %v6511_v3 }
0x14e3   :  { %3830 = vmatpush1.bf16.msra.mxu0 %v6516_v9 }
0x14e4   :  { %4011 = vmatprep.subr.bf16.mxu0 %v6492_v41 }
0x1521   :  { %v3756_v0 = vpop.f32.mrb[40].mxu1 }
0x1522   :  { %v3758_v51 = vpop.f32.mrb[41].mxu1 }
0x1523   :  { %v3765_v43 = vcombine.low %v3756_v0, %v3758_v51  ;;  %v3760_v37 = vpop.f32.mrb[42].mxu1 }
0x1524   :  { %v3761_v44 = vpop.f32.mrb[43].mxu1 }
0x1525   :  { %v3772_v19 = vrot.slane %v3765_v43, %v6553_v48 }
0x15a9   :  { %v3616_v20 = vpop.f32.mrb[20].mxu0 }
0x15aa   :  { %v6555_v17 = vadd.f32 %v3616_v20, %v3475_v18  ;;  %v3618_v49 = vpop.f32.mrb[21].mxu0 }
0x15ab   :  { %v6557_v16 = vadd.f32 %v3618_v49, %v3479_v47  ;;  %v3620_v53 = vpop.f32.mrb[22].mxu0 }
0x15ac   :  { %v6559_v54 = vadd.f32 %v3620_v53, %v3475_v18  ;;  %v3622_v42 = vpop.f32.mrb[23].mxu0 }
0x15ad   :  { %v3629_v59 = vcombine.low %v6555_v17, %v6557_v16  ;;  %v3630_v62 = vcombine.high %v6555_v17, %v6557_v16  ;;  %v6566_v25 = vadd.f32 %v3622_v42, %v3479_v47 }
0x15af   :  { %v3637_v56 = vrot.slane %v3629_v59, %v6553_v48  ;;  %v3647_v58 = vcombine.low %v6559_v54, %v6566_v25  ;;  %v3648_v61 = vcombine.high %v6559_v54, %v6566_v25 }
0x15b1   :  { %v3774_v60 = vadd.f32 %v3772_v19, %v3637_v56  ;;  %v3645_v38 = vcombine.high %v3637_v56, %v3637_v56 }
0x15b3   :  { %3785 = vrot.lane.b32.xlu1 %v3774_v60, %s5701_s19  ;;  %v4758_v63 = vmul.f32 -1.442695, %v3774_v60  ;;  %v3782_v2 = vrot.slane %v3774_v60, 2 }
0x15b5   :  { %5245 = vpow2.f32 %v4758_v63 }
0x15b6   :  { %5247 = vtanh.f32 %v3782_v2 }
0x15bf   :  { %v5246_v14 = vpop.eup %5245 }
0x15c0   :  { %v3778_v4 = vadd.f32 1.0, %v5246_v14  ;;  %v5248_v6 = vpop.eup %5247 }
0x15c2   :  { %5249 = vrcp.f32 %v3778_v4 }
0x15cc   :  { %v5250_v8 = vpop.eup %5249 }
0x15cd   :  { %v3796_v11 = vmul.f32 %v5250_v8, %v5248_v6  ;;  %v3795_v12 = vmul.f32 0.0, %v5250_v8 }
0x15cf   :  { %3798 = vrot.lane.b32.xlu0 %v3796_v11, %s5701_s19  ;;  %v3644_v11 = vrot.slane %v3630_v62, %v6553_v48 }
0x1625   :  { %v3786_v39 = vpop.permute.xlu1 %3785 }
0x1626   :  { %v3787_v40 = vrot.slane %v3786_v39, 2 }
0x1628   :  { %v4759_v24 = vmul.f32 -1.442695, %v3787_v40 }
0x1641   :  { %v3799_v50 = vpop.permute.xlu0 %3798 }
0x1642   :  { %v3801_v13 = vadd.f32 %v3799_v50, %v3795_v12 }
0x1644   :  { %5251 = vtanh.f32 %v3801_v13 }
0x1645   :  { %5253 = vpow2.f32 %v4759_v24 }
0x164e   :  { %v5252_v52 = vpop.eup %5251 }
0x164f   :  { %3804 = vrot.lane.b32.xlu0 %v5252_v52, %s5701_s19  ;;  %v5254_v21 = vpop.eup %5253 }
0x1650   :  { %v3792_v22 = vadd.f32 1.0, %v5254_v21 }
0x1652   :  { %5255 = vrcp.f32 %v3792_v22 }
0x165c   :  { %v5256_v23 = vpop.eup %5255 }
0x16c1   :  { %v3805_v26 = vpop.permute.xlu0 %3804 }
0x16c2   :  { %v6576_v27 = vmul.f32 %v5256_v23, %v3805_v26 }
0x16c4   :  { %v3819_v28 = vpack.c.bf16 %v6576_v27, %v6576_v27 }
0x16c6   :  { %4761 = vmatmul.mubr.msk.bf16.vlgmr.msra.gmra.mrb[24].mxu0 %vm1280_vm5, %v3819_v28 }
0x16c7   :  { %4012 = vmatpush1.bf16.msra.mxu0 %v6495_v29  ;;  %4043 = vmatprep.mubr.bf16.mxu0 %v5713_v1 }
0x16c8   :  { %4013 = vmatprep.subr.bf16.mxu0 %v6497_v55 }
0x16cb   :  { %4014 = vmatpush1.bf16.msra.mxu0 %v6501_v57 }
0x16cc   :  { %4015 = vmatprep.subr.bf16.mxu0 %v6504_v10 }
0x16cf   :  { %4016 = vmatpush1.bf16.msra.mxu0 %v6508_v30 }
0x16d0   :  { %4017 = vmatprep.subr.bf16.mxu0 %v6511_v3 }
0x16d3   :  { %4018 = vmatpush1.bf16.msra.mxu0 %v6516_v9 }
0x16d4   :  { %4199 = vmatprep.subr.bf16.mxu0 %v6492_v41 }
0x1799   :  { %v3857_v15 = vpop.f32.mrb[24].mxu0 }
0x179a   :  { %v3859_v31 = vpop.f32.mrb[25].mxu0 }
0x179b   :  { %v3866_v32 = vcombine.low %v3857_v15, %v3859_v31  ;;  %v3861_v33 = vpop.f32.mrb[26].mxu0 }
0x179c   :  { %v3862_v34 = vpop.f32.mrb[27].mxu0 }
0x179d   :  { %v3873_v35 = vrot.slane %v3866_v32, %v6553_v48 }
0x179f   :  { %v3875_v36 = vadd.f32 %v3873_v35, %v3645_v38 }
0x17a1   :  { %3886 = vrot.lane.b32.xlu0 %v3875_v36, %s5701_s19  ;;  %v4762_v0 = vmul.f32 -1.442695, %v3875_v36  ;;  %v3883_v51 = vrot.slane %v3875_v36, 2 }
0x17a3   :  { %5257 = vpow2.f32 %v4762_v0 }
0x17a4   :  { %5259 = vtanh.f32 %v3883_v51 }
0x17ad   :  { %v5258_v43 = vpop.eup %5257 }
0x17ae   :  { %v3879_v37 = vadd.f32 1.0, %v5258_v43  ;;  %v5260_v44 = vpop.eup %5259 }
0x17b0   :  { %5261 = vrcp.f32 %v3879_v37 }
0x17ba   :  { %v5262_v5 = vpop.eup %5261 }
0x17bb   :  { %v3897_v7 = vmul.f32 %v5262_v5, %v5260_v44  ;;  %v3896_v45 = vmul.f32 %v5262_v5, %v3801_v13  ;;  %v3646_v5 = vcombine.high %v3644_v11, %v3644_v11 }
0x17bd   :  { %3899 = vrot.lane.b32.xlu1 %v3897_v7, %s5701_s19 }
0x1813   :  { %v3887_v20 = vpop.permute.xlu0 %3886 }
0x1814   :  { %v3888_v49 = vrot.slane %v3887_v20, 2 }
0x1816   :  { %v4763_v53 = vmul.f32 -1.442695, %v3888_v49 }
0x182f   :  { %v3900_v46 = vpop.permute.xlu1 %3899 }
0x1830   :  { %v3902_v18 = vadd.f32 %v3900_v46, %v3896_v45 }
0x1832   :  { %5263 = vtanh.f32 %v3902_v18 }
0x1833   :  { %5265 = vpow2.f32 %v4763_v53 }
0x183c   :  { %v5264_v47 = vpop.eup %5263 }
0x183d   :  { %3905 = vrot.lane.b32.xlu1 %v5264_v47, %s5701_s19  ;;  %v5266_v42 = vpop.eup %5265 }
0x183e   :  { %v3893_v19 = vadd.f32 1.0, %v5266_v42 }
0x1840   :  { %5267 = vrcp.f32 %v3893_v19 }
0x184a   :  { %v5268_v59 = vpop.eup %5267 }
0x18af   :  { %v3906_v56 = vpop.permute.xlu1 %3905 }
0x18b0   :  { %v6594_v60 = vmul.f32 %v5268_v59, %v3906_v56 }
0x18b2   :  { %v3913_v63 = vpack.c.bf16 %v6594_v60, %v6594_v60 }
0x18b4   :  { %4764 = vmatmul.mubr.msk.bf16.vlgmr.msra.gmra.mrb[44].mxu1 %vm1280_vm5, %v3913_v63 }
0x18b5   :  { %4106 = vmatpush1.bf16.msra.mxu1 %v6495_v29  ;;  %4137 = vmatprep.mubr.bf16.mxu1 %v5713_v1 }
0x18b6   :  { %4107 = vmatprep.subr.bf16.mxu1 %v6497_v55 }
0x18b9   :  { %4108 = vmatpush1.bf16.msra.mxu1 %v6501_v57 }
0x18ba   :  { %4109 = vmatprep.subr.bf16.mxu1 %v6504_v10 }
0x18bd   :  { %4110 = vmatpush1.bf16.msra.mxu1 %v6508_v30 }
0x18be   :  { %4111 = vmatprep.subr.bf16.mxu1 %v6511_v3 }
0x18c1   :  { %4112 = vmatpush1.bf16.msra.mxu1 %v6516_v9 }
0x18c2   :  { %4293 = vmatprep.subr.bf16.mxu1 %v6492_v41 }
0x1987   :  { %v3951_v2 = vpop.f32.mrb[44].mxu1 }
0x1988   :  { %v3953_v14 = vpop.f32.mrb[45].mxu1 }
0x1989   :  { %v3960_v4 = vcombine.low %v3951_v2, %v3953_v14  ;;  %v3955_v6 = vpop.f32.mrb[46].mxu1 }
0x198a   :  { %v3956_v8 = vpop.f32.mrb[47].mxu1 }
0x198b   :  { %v3967_v12 = vrot.slane %v3960_v4, %v6553_v48 }
0x198d   :  { %v3969_v50 = vadd.f32 %v3967_v12, %v3644_v11 }
0x198f   :  { %3980 = vrot.lane.b32.xlu1 %v3969_v50, %s5701_s19  ;;  %v4765_v13 = vmul.f32 -1.442695, %v3969_v50  ;;  %v3977_v52 = vrot.slane %v3969_v50, 2 }
0x1991   :  { %5269 = vpow2.f32 %v4765_v13 }
0x1992   :  { %5271 = vtanh.f32 %v3977_v52 }
0x199b   :  { %v5270_v39 = vpop.eup %5269 }
0x199c   :  { %v3973_v40 = vadd.f32 1.0, %v5270_v39  ;;  %v5272_v24 = vpop.eup %5271 }
0x199e   :  { %5273 = vrcp.f32 %v3973_v40 }
0x19a8   :  { %v5274_v21 = vpop.eup %5273 }
0x19a9   :  { %v3991_v22 = vmul.f32 %v5274_v21, %v5272_v24  ;;  %v3990_v23 = vmul.f32 %v5274_v21, %v3902_v18  ;;  %v3655_v24 = vrot.slane %v3647_v58, %v6553_v48 }
0x19ab   :  { %3993 = vrot.lane.b32.xlu0 %v3991_v22, %s5701_s19 }
0x1a01   :  { %v3981_v26 = vpop.permute.xlu1 %3980 }
0x1a02   :  { %v3982_v28 = vrot.slane %v3981_v26, 2 }
0x1a04   :  { %v4766_v15 = vmul.f32 -1.442695, %v3982_v28 }
0x1a1d   :  { %v3994_v17 = vpop.permute.xlu0 %3993 }
0x1a1e   :  { %v3996_v16 = vadd.f32 %v3994_v17, %v3990_v23 }
0x1a20   :  { %5275 = vtanh.f32 %v3996_v16 }
0x1a21   :  { %5277 = vpow2.f32 %v4766_v15 }
0x1a2a   :  { %v5276_v62 = vpop.eup %5275 }
0x1a2b   :  { %3999 = vrot.lane.b32.xlu0 %v5276_v62, %s5701_s19  ;;  %v5278_v31 = vpop.eup %5277 }
0x1a2c   :  { %v3987_v32 = vadd.f32 1.0, %v5278_v31 }
0x1a2e   :  { %5279 = vrcp.f32 %v3987_v32 }
0x1a38   :  { %v5280_v33 = vpop.eup %5279 }
0x1a9d   :  { %v4000_v34 = vpop.permute.xlu0 %3999 }
0x1a9e   :  { %v6616_v35 = vmul.f32 %v5280_v33, %v4000_v34 }
0x1aa0   :  { %v4007_v38 = vpack.c.bf16 %v6616_v35, %v6616_v35 }
0x1aa2   :  { %4767 = vmatmul.mubr.msk.bf16.vlgmr.msra.gmra.mrb[28].mxu0 %vm1280_vm5, %v4007_v38 }
0x1aa3   :  { %4200 = vmatpush1.bf16.msra.mxu0 %v6495_v29  ;;  %4231 = vmatprep.mubr.bf16.mxu0 %v5713_v1 }
0x1aa4   :  { %4201 = vmatprep.subr.bf16.mxu0 %v6497_v55 }
0x1aa7   :  { %4202 = vmatpush1.bf16.msra.mxu0 %v6501_v57 }
0x1aa8   :  { %4203 = vmatprep.subr.bf16.mxu0 %v6504_v10 }
0x1aab   :  { %4204 = vmatpush1.bf16.msra.mxu0 %v6508_v30 }
0x1aac   :  { %4205 = vmatprep.subr.bf16.mxu0 %v6511_v3 }
0x1aaf   :  { %4206 = vmatpush1.bf16.msra.mxu0 %v6516_v9 }
0x1ab0   :  { %4387 = vmatprep.subr.bf16.mxu0 %v6492_v41 }
0x1b75   :  { %v4045_v36 = vpop.f32.mrb[28].mxu0 }
0x1b76   :  { %v4047_v0 = vpop.f32.mrb[29].mxu0 }
0x1b77   :  { %v4054_v51 = vcombine.low %v4045_v36, %v4047_v0  ;;  %v4049_v43 = vpop.f32.mrb[30].mxu0 }
0x1b78   :  { %v4050_v37 = vpop.f32.mrb[31].mxu0 }
0x1b79   :  { %v4061_v44 = vrot.slane %v4054_v51, %v6553_v48 }
0x1b7b   :  { %v4063_v7 = vadd.f32 %v4061_v44, %v3646_v5 }
0x1b7d   :  { %4074 = vrot.lane.b32.xlu0 %v4063_v7, %s5701_s19  ;;  %v4768_v45 = vmul.f32 -1.442695, %v4063_v7  ;;  %v4071_v46 = vrot.slane %v4063_v7, 2 }
0x1b7f   :  { %5281 = vpow2.f32 %v4768_v45 }
0x1b80   :  { %5283 = vtanh.f32 %v4071_v46 }
0x1b89   :  { %v5282_v18 = vpop.eup %5281 }
0x1b8a   :  { %v4067_v47 = vadd.f32 1.0, %v5282_v18  ;;  %v5284_v20 = vpop.eup %5283 }
0x1b8c   :  { %5285 = vrcp.f32 %v4067_v47 }
0x1b96   :  { %v5286_v41 = vpop.eup %5285 }
0x1b97   :  { %v4085_v49 = vmul.f32 %v5286_v41, %v5284_v20  ;;  %v4084_v53 = vmul.f32 %v5286_v41, %v3996_v16 }
0x1b99   :  { %4087 = vrot.lane.b32.xlu1 %v4085_v49, %s5701_s19 }
0x1bef   :  { %v4075_v56 = vpop.permute.xlu0 %4074 }
0x1bf0   :  { %v4076_v63 = vrot.slane %v4075_v56, 2 }
0x1bf2   :  { %v4769_v2 = vmul.f32 -1.442695, %v4076_v63 }
0x1c0b   :  { %v4088_v42 = vpop.permute.xlu1 %4087 }
0x1c0c   :  { %v4090_v19 = vadd.f32 %v4088_v42, %v4084_v53 }
0x1c0e   :  { %5287 = vtanh.f32 %v4090_v19 }
0x1c0f   :  { %5289 = vpow2.f32 %v4769_v2 }
0x1c18   :  { %v5288_v59 = vpop.eup %5287 }
0x1c19   :  { %4093 = vrot.lane.b32.xlu1 %v5288_v59, %s5701_s19  ;;  %v5290_v14 = vpop.eup %5289 }
0x1c1a   :  { %v4081_v4 = vadd.f32 1.0, %v5290_v14 }
0x1c1c   :  { %5291 = vrcp.f32 %v4081_v4 }
0x1c26   :  { %v5292_v6 = vpop.eup %5291 }
0x1c8b   :  { %v4094_v8 = vpop.permute.xlu1 %4093 }
0x1c8c   :  { %v6634_v11 = vmul.f32 %v5292_v6, %v4094_v8 }
0x1c8e   :  { %v4101_v12 = vpack.c.bf16 %v6634_v11, %v6634_v11 }
0x1c90   :  { %4770 = vmatmul.mubr.msk.bf16.vlgmr.msra.gmra.mrb[48].mxu1 %vm1280_vm5, %v4101_v12 }
0x1c91   :  { %4294 = vmatpush1.bf16.msra.mxu1 %v6495_v29  ;;  %4325 = vmatprep.mubr.bf16.mxu1 %v5713_v1 }
0x1c92   :  { %4295 = vmatprep.subr.bf16.mxu1 %v6497_v55 }
0x1c95   :  { %4296 = vmatpush1.bf16.msra.mxu1 %v6501_v57 }
0x1c96   :  { %4297 = vmatprep.subr.bf16.mxu1 %v6504_v10 }
0x1c99   :  { %4298 = vmatpush1.bf16.msra.mxu1 %v6508_v30 }
0x1c9a   :  { %4299 = vmatprep.subr.bf16.mxu1 %v6511_v3 }
0x1c9d   :  { %4300 = vmatpush1.bf16.msra.mxu1 %v6516_v9 }
0x1d63   :  { %v4139_v50 = vpop.f32.mrb[48].mxu1 }
0x1d64   :  { %v4141_v13 = vpop.f32.mrb[49].mxu1 }
0x1d65   :  { %v4148_v52 = vcombine.low %v4139_v50, %v4141_v13  ;;  %v4143_v39 = vpop.f32.mrb[50].mxu1 }
0x1d66   :  { %v4144_v40 = vpop.f32.mrb[51].mxu1 }
0x1d67   :  { %v4155_v21 = vrot.slane %v4148_v52, %v6553_v48 }
0x1d69   :  { %v4157_v22 = vadd.f32 %v4155_v21, %v3655_v24 }
0x1d6b   :  { %4168 = vrot.lane.b32.xlu1 %v4157_v22, %s5701_s19  ;;  %v4771_v23 = vmul.f32 -1.442695, %v4157_v22  ;;  %v4165_v17 = vrot.slane %v4157_v22, 2 }
0x1d6d   :  { %5293 = vpow2.f32 %v4771_v23 }
0x1d6e   :  { %5295 = vtanh.f32 %v4165_v17 }
0x1d77   :  { %v5294_v16 = vpop.eup %5293 }
0x1d78   :  { %v4161_v62 = vadd.f32 1.0, %v5294_v16  ;;  %v5296_v26 = vpop.eup %5295 }
0x1d7a   :  { %5297 = vrcp.f32 %v4161_v62 }
0x1d84   :  { %v5298_v28 = vpop.eup %5297 }
0x1d85   :  { %v4179_v15 = vmul.f32 %v5298_v28, %v5296_v26  ;;  %v4178_v31 = vmul.f32 %v5298_v28, %v4090_v19 }
0x1d87   :  { %4181 = vrot.lane.b32.xlu0 %v4179_v15, %s5701_s19 }
0x1ddd   :  { %v4169_v34 = vpop.permute.xlu1 %4168 }
0x1dde   :  { %v4170_v38 = vrot.slane %v4169_v34, 2 }
0x1de0   :  { %v4772_v36 = vmul.f32 -1.442695, %v4170_v38 }
0x1df9   :  { %v4182_v32 = vpop.permute.xlu0 %4181 }
0x1dfa   :  { %v4184_v58 = vadd.f32 %v4182_v32, %v4178_v31  ;;  %v6685_v32 = vld [vmem:[#allocation25] ss:$0 sm:$0xff] }
0x1dfb   :  { %v4003_v34 = vmul.f32 %v6685_v32, %v6616_v35 }
0x1dfc   :  { %5299 = vtanh.f32 %v4184_v58 }
0x1dfd   :  { %5301 = vpow2.f32 %v4772_v36  ;;  %v4004_v38 = vsel %vm3815_vm9, %v4003_v34, 0.0  ;;  %v4097_v36 = vmul.f32 %v6685_v32, %v6634_v11 }
0x1e06   :  { %v5300_v33 = vpop.eup %5299 }
0x1e07   :  { %4187 = vrot.lane.b32.xlu0 %v5300_v33, %s5701_s19  ;;  %v5302_v0 = vpop.eup %5301 }
0x1e08   :  { %v4175_v51 = vadd.f32 1.0, %v5302_v0  ;;  %v4098_v0 = vsel %vm3815_vm9, %v4097_v36, 0.0 }
0x1e0a   :  { %5303 = vrcp.f32 %v4175_v51 }
0x1e14   :  { %v5304_v43 = vpop.eup %5303 }
0x1e79   :  { %v4188_v37 = vpop.permute.xlu0 %4187 }
0x1e7a   :  { %v6655_v44 = vmul.f32 %v5304_v43, %v4188_v37 }
0x1e7c   :  { %v4195_v5 = vpack.c.bf16 %v6655_v44, %v6655_v44 }
0x1e7e   :  { %4773 = vmatmul.mubr.msk.bf16.vlgmr.msra.gmra.mrb[32].mxu0 %vm1280_vm5, %v4195_v5 }
0x1e7f   :  { %4388 = vmatpush1.bf16.msra.mxu0 %v6495_v29  ;;  %4419 = vmatprep.mubr.bf16.mxu0 %v5713_v1  ;;  %v3663_v1 = vcombine.high %v3655_v24, %v3655_v24  ;;  %v3662_v24 = vrot.slane %v3648_v61, %v6553_v48 }
0x1e80   :  { %4389 = vmatprep.subr.bf16.mxu0 %v6497_v55 }
0x1e83   :  { %4390 = vmatpush1.bf16.msra.mxu0 %v6501_v57 }
0x1e84   :  { %4391 = vmatprep.subr.bf16.mxu0 %v6504_v10 }
0x1e87   :  { %4392 = vmatpush1.bf16.msra.mxu0 %v6508_v30 }
0x1e88   :  { %4393 = vmatprep.subr.bf16.mxu0 %v6511_v3 }
0x1e8b   :  { %4394 = vmatpush1.bf16.msra.mxu0 %v6516_v9 }
0x1f51   :  { %v4233_v7 = vpop.f32.mrb[32].mxu0 }
0x1f52   :  { %v4235_v45 = vpop.f32.mrb[33].mxu0 }
0x1f53   :  { %v4242_v46 = vcombine.low %v4233_v7, %v4235_v45  ;;  %v4237_v18 = vpop.f32.mrb[34].mxu0 }
0x1f54   :  { %v4238_v47 = vpop.f32.mrb[35].mxu0 }
0x1f55   :  { %v4249_v29 = vrot.slane %v4242_v46, %v6553_v48 }
0x1f57   :  { %v4251_v20 = vadd.f32 %v4249_v29, %v3663_v1 }
0x1f59   :  { %4262 = vrot.lane.b32.xlu0 %v4251_v20, %s5701_s19  ;;  %v4774_v55 = vmul.f32 -1.442695, %v4251_v20  ;;  %v4259_v57 = vrot.slane %v4251_v20, 2 }
0x1f5b   :  { %5305 = vpow2.f32 %v4774_v55  ;;  %v3664_v55 = vcombine.high %v3662_v24, %v3662_v24 }
0x1f5c   :  { %5307 = vtanh.f32 %v4259_v57 }
0x1f65   :  { %v5306_v10 = vpop.eup %5305 }
0x1f66   :  { %v4255_v30 = vadd.f32 1.0, %v5306_v10  ;;  %v5308_v3 = vpop.eup %5307 }
0x1f68   :  { %5309 = vrcp.f32 %v4255_v30 }
0x1f72   :  { %v5310_v9 = vpop.eup %5309 }
0x1f73   :  { %v4273_v41 = vmul.f32 %v5310_v9, %v5308_v3  ;;  %v4272_v49 = vmul.f32 %v5310_v9, %v4184_v58  ;;  %v3814_v58 = vmul.f32 %v6685_v32, %v6576_v27 }
0x1f75   :  { %4275 = vrot.lane.b32.xlu1 %v4273_v41, %s5701_s19  ;;  %v3816_v33 = vsel %vm3815_vm9, %v3814_v58, 0.0 }
0x1fcb   :  { %v4263_v59 = vpop.permute.xlu0 %4262 }
0x1fcc   :  { %v4264_v56 = vrot.slane %v4263_v59, 2 }
0x1fce   :  { %v4775_v63 = vmul.f32 -1.442695, %v4264_v56 }
0x1fe7   :  { %v4276_v53 = vpop.permute.xlu1 %4275 }
0x1fe8   :  { %v4278_v42 = vadd.f32 %v4276_v53, %v4272_v49 }
0x1fea   :  { %5311 = vtanh.f32 %v4278_v42 }
0x1feb   :  { %5313 = vpow2.f32 %v4775_v63 }
0x1ff4   :  { %v5312_v19 = vpop.eup %5311 }
0x1ff5   :  { %4281 = vrot.lane.b32.xlu1 %v5312_v19, %s5701_s19  ;;  %v5314_v2 = vpop.eup %5313  ;;  %v4191_v19 = vmul.f32 %v6685_v32, %v6655_v44 }
0x1ff6   :  { %v4269_v14 = vadd.f32 1.0, %v5314_v2 }
0x1ff7   :  { %v4192_v59 = vsel %vm3815_vm9, %v4191_v19, 0.0 }
0x1ff8   :  { %5315 = vrcp.f32 %v4269_v14 }
0x2002   :  { %v5316_v4 = vpop.eup %5315 }
0x2067   :  { %v4282_v6 = vpop.permute.xlu1 %4281 }
0x2068   :  { %v6672_v8 = vmul.f32 %v5316_v4, %v4282_v6 }
0x206a   :  { %v4289_v12 = vpack.c.bf16 %v6672_v8, %v6672_v8  ;;  %v4285_v56 = vmul.f32 %v6685_v32, %v6672_v8 }
0x206c   :  { %4776 = vmatmul.mubr.msk.bf16.vlgmr.msra.gmra.mrb[52].mxu1 %vm1280_vm5, %v4289_v12  ;;  %v4286_v63 = vsel %vm3815_vm9, %v4285_v56, 0.0  ;;  %v4782_v12 = vld [vmem:[#allocation3] ss:$0 sm:$0xff] }
0x213f   :  { %v4327_v50 = vpop.f32.mrb[52].mxu1 }
0x2140   :  { %v4329_v13 = vpop.f32.mrb[53].mxu1 }
0x2141   :  { %v4336_v52 = vcombine.low %v4327_v50, %v4329_v13  ;;  %v4331_v39 = vpop.f32.mrb[54].mxu1 }
0x2142   :  { %v4332_v40 = vpop.f32.mrb[55].mxu1 }
0x2143   :  { %v4343_v21 = vrot.slane %v4336_v52, %v6553_v48 }
0x2145   :  { %v4345_v22 = vadd.f32 %v4343_v21, %v3662_v24 }
0x2147   :  { %4356 = vrot.lane.b32.xlu1 %v4345_v22, %s5701_s19  ;;  %v4777_v23 = vmul.f32 -1.442695, %v4345_v22  ;;  %v4353_v17 = vrot.slane %v4345_v22, 2 }
0x2149   :  { %5317 = vpow2.f32 %v4777_v23 }
0x214a   :  { %5319 = vtanh.f32 %v4353_v17 }
0x2153   :  { %v5318_v16 = vpop.eup %5317 }
0x2154   :  { %v4349_v62 = vadd.f32 1.0, %v5318_v16  ;;  %v5320_v26 = vpop.eup %5319 }
0x2156   :  { %5321 = vrcp.f32 %v4349_v62 }
0x2160   :  { %v5322_v28 = vpop.eup %5321 }
0x2161   :  { %v4367_v15 = vmul.f32 %v5322_v28, %v5320_v26  ;;  %v4366_v31 = vmul.f32 %v5322_v28, %v4278_v42  ;;  %v3909_v42 = vmul.f32 %v6685_v32, %v6594_v60 }
0x2163   :  { %4369 = vrot.lane.b32.xlu0 %v4367_v15, %s5701_s19 }
0x21b9   :  { %v4357_v51 = vpop.permute.xlu1 %4356 }
0x21ba   :  { %v4358_v43 = vrot.slane %v4357_v51, 2 }
0x21bc   :  { %v4778_v37 = vmul.f32 -1.442695, %v4358_v43 }
0x21d5   :  { %v4370_v54 = vpop.permute.xlu0 %4369 }
0x21d6   :  { %v4372_v25 = vadd.f32 %v4370_v54, %v4366_v31 }
0x21d8   :  { %5323 = vtanh.f32 %v4372_v25 }
0x21d9   :  { %5325 = vpow2.f32 %v4778_v37 }
0x21e2   :  { %v5324_v61 = vpop.eup %5323 }
0x21e3   :  { %4375 = vrot.lane.b32.xlu0 %v5324_v61, %s5701_s19  ;;  %v5326_v27 = vpop.eup %5325 }
0x21e4   :  { %v4363_v5 = vadd.f32 1.0, %v5326_v27 }
0x21e6   :  { %5327 = vrcp.f32 %v4363_v5 }
0x21f0   :  { %v5328_v7 = vpop.eup %5327 }
0x2202   :  { %3817 = vadd.xlane.f32.xlu0 %v3816_v33 }
0x2206   :  { %4005 = vadd.xlane.f32.xlu0 %v4004_v38 }
0x220a   :  { %4099 = vadd.xlane.f32.xlu0 %v4098_v0 }
0x2255   :  { %v4376_v45 = vpop.permute.xlu0 %4375 }
0x2256   :  { %v4378_v35 = vmul.f32 %v5328_v7, %v4376_v45 }
0x2258   :  { %v4383_v46 = vpack.c.bf16 %v4378_v35, %v4378_v35  ;;  %v4379_v2 = vmul.f32 %v6685_v32, %v4378_v35 }
0x225a   :  { %4779 = vmatmul.mubr.msk.bf16.vlgmr.msra.gmra.mrb[36].mxu0 %vm1280_vm5, %v4383_v46  ;;  %v4380_v14 = vsel %vm3815_vm9, %v4379_v2, 0.0 }
0x228f   :  { %v3818_v50 = vpop.xlane.xlu0 %3817 }
0x2293   :  { %v4006_v8 = vpop.xlane.xlu0 %4005 }
0x2297   :  { %v4100_v39 = vpop.xlane.xlu0 %4099 }
0x232d   :  { %v4421_v18 = vpop.f32.mrb[36].mxu0 }
0x232e   :  { %v4423_v47 = vpop.f32.mrb[37].mxu0 }
0x232f   :  { %v4430_v11 = vcombine.low %v4421_v18, %v4423_v47  ;;  %v4425_v29 = vpop.f32.mrb[38].mxu0 }
0x2330   :  { %v4426_v1 = vpop.f32.mrb[39].mxu0 }
0x2331   :  { %v4437_v20 = vrot.slane %v4430_v11, %v6553_v48  ;;  %v3910_v48 = vsel %vm3815_vm9, %v3909_v42, 0.0 }
0x2333   :  { %v4439_v57 = vadd.f32 %v4437_v20, %v3664_v55 }
0x2335   :  { %4450 = vrot.lane.b32.xlu0 %v4439_v57, %s5701_s19  ;;  %v4780_v10 = vmul.f32 -1.442695, %v4439_v57  ;;  %v4447_v30 = vrot.slane %v4439_v57, 2 }
0x2337   :  { %5329 = vpow2.f32 %v4780_v10 }
0x2338   :  { %5331 = vtanh.f32 %v4447_v30 }
0x2341   :  { %v5330_v3 = vpop.eup %5329 }
0x2342   :  { %v4443_v9 = vadd.f32 1.0, %v5330_v3  ;;  %v5332_v41 = vpop.eup %5331 }
0x2344   :  { %5333 = vrcp.f32 %v4443_v9 }
0x234e   :  { %v5334_v49 = vpop.eup %5333 }
0x234f   :  { %v4461_v53 = vmul.f32 %v5334_v49, %v5332_v41  ;;  %v4460_v60 = vmul.f32 %v5334_v49, %v4372_v25 }
0x2351   :  { %4463 = vrot.lane.b32.xlu1 %v4461_v53, %s5701_s19 }
0x2375   :  { %3911 = vadd.xlane.f32.xlu1 %v3910_v48 }
0x2379   :  { %4193 = vadd.xlane.f32.xlu1 %v4192_v59 }
0x237d   :  { %4287 = vadd.xlane.f32.xlu1 %v4286_v63 }
0x2381   :  { %4381 = vadd.xlane.f32.xlu1 %v4380_v14 }
0x23a7   :  { %v4451_v26 = vpop.permute.xlu0 %4450 }
0x23a8   :  { %v4452_v28 = vrot.slane %v4451_v26, 2 }
0x23aa   :  { %v4781_v15 = vmul.f32 -1.442695, %v4452_v28 }
0x23c3   :  { %v4464_v4 = vpop.permute.xlu1 %4463 }
0x23c4   :  { %v4466_v6 = vadd.f32 %v4464_v4, %v4460_v60 }
0x23c6   :  { %5335 = vtanh.f32 %v4466_v6 }
0x23c7   :  { %5337 = vpow2.f32 %v4781_v15 }
0x23d0   :  { %v5336_v44 = vpop.eup %5335 }
0x23d1   :  { %4469 = vrot.lane.b32.xlu1 %v5336_v44, %s5701_s19  ;;  %v5338_v31 = vpop.eup %5337  ;;  %s5653_s19 = scalar_lea.vmem %s4517_s30, 32 }
0x23d2   :  { %v4457_v54 = vadd.f32 1.0, %v5338_v31  ;;  %p5654_p0 = scmp.ne.s32.totalorder %s4517_s30, %s5653_s19  ;;  %p5659_p2 = scmp.lt.s32.totalorder %s5653_s19, %s5653_s19 }
0x23d4   :  { %5339 = vrcp.f32 %v4457_v54  ;;  %p5660_p3 = por %p5659_p2, %p5658_p1 }
0x23d5   :  { %4498 = vperm.xlu1 %4860, %v4782_v12  }
0x23d6   :  { %p5661_p4 = pnand %p5660_p3, %p5654_p0 }
0x23de   :  { %v5340_v25 = vpop.eup %5339 }
0x2402   :  { %v3912_v13 = vpop.xlane.xlu1 %3911 }
0x2403   :  { %v4478_v52 = vsel %vm4477_vm10, %v3818_v50, %v3912_v13 }
0x2404   :  { %v4480_v40 = vsel %vm4479_vm11, %v4478_v52, %v4006_v8 }
0x2405   :  { %v4482_v24 = vsel %vm4481_vm12, %v4480_v40, %v4100_v39 }
0x2406   :  { %v4194_v21 = vpop.xlane.xlu1 %4193 }
0x2407   :  { %v4484_v22 = vsel %vm4483_vm13, %v4482_v24, %v4194_v21 }
0x240a   :  { %v4288_v23 = vpop.xlane.xlu1 %4287 }
0x240b   :  { %v4486_v17 = vsel %vm4485_vm14, %v4484_v22, %v4288_v23 }
0x240e   :  { %v4382_v16 = vpop.xlane.xlu1 %4381 }
0x240f   :  { %v4488_v62 = vsel %vm4487_vm15, %v4486_v17, %v4382_v16 }
0x2443   :  { %v4470_v61 = vpop.permute.xlu1 %4469 }
0x2444   :  { %v4472_v58 = vmul.f32 %v5340_v25, %v4470_v61 }
0x2446   :  { %v4473_v33 = vmul.f32 %v6685_v32, %v4472_v58 }
0x2448   :  { %v4474_v34 = vsel %vm3815_vm9, %v4473_v33, 0.0 }
0x2449   :  { %4475 = vadd.xlane.f32.xlu0 %v4474_v34 }
0x2454   :  { %v4499_v38 = vpop.permute.xlu1 %4498 }
0x24d6   :  { %v4476_v36 = vpop.xlane.xlu0 %4475 }
0x24d7   :  { %v4490_v0 = vsel %vm4489_vm0, %v4488_v62, %v4476_v36 }
0x24d8   :  { %v4501_v51 = vadd.f32 %v4499_v38, %v4490_v0 }
0x24da   :  { %v4783_v43 = vmul.f32 -1.442695, %v4501_v51 }
0x24dc   :  { %5341 = vpow2.f32 %v4783_v43 }
0x24e6   :  { %v5342_v37 = vpop.eup %5341 }
0x24e7   :  { %v4505_v27 = vadd.f32 1.0, %v5342_v37 }
0x24e9   :  { %5343 = vrcp.f32 %v4505_v27 }
0x24f3   :  { %v5344_v5 = vpop.eup %5343 }
0x24f4   :  { %4509 = vst.msk [vmem:[#allocation27] sm:$0x3] %vm4508_vm1, %v5344_v5 }
0x24f5   :  { %5664 = shalt.err (!%p5661_p4)
}
0x24f6   :  { %s5665_s18 = scalar_lea.hbm %s6741_s15, 32 }
0x24f7   :  { %p5666_p5 = scmp.ne.s32.totalorder %s6741_s15, %s5665_s18  ;;  %p5669_p6 = scmp.lt.u32.totalorder %s5665_s18, %s6741_s15 }
0x24f9   :  { %p5671_p7 = pnand %p5669_p6, %p5666_p5 }
0x24fb   :  { %5674 = shalt.err (!%p5671_p7)
}
0x24fc   :  { %4519 = dma.vmem_to_hbm [thread:$0]  %s4517_s30, 32, %s6741_s15, [#allocation6]  }
0x24fd   :  { %5691 = dma.done.wait [#allocation6], 32  }
0x24fe   :  { %5692 = vsyncadd [#allocation6], 4294967264 }
0x24ff   :  { %4523 = vsyncpa [#allocation5], 1 }
0x2500   :  { %4524 = vsyncpa [#allocation8], 1 }
0x2501   :  { %4525 = vsyncpa [#allocation11], 1 }
0x2502   :  { %4526 = vsyncpa [#allocation14], 1 }
0x2503   :  { %4527 = vsyncpa [#allocation17], 1 }
0x2504   :  { %4528 = vsyncpa [#allocation20], 1 }
0x2505   :  { %4529 = vsyncpa [#allocation23], 1 }
0x2506   :  { %4530 = vsyncpa [#allocation26], 1 }
0x2507   :  { %4531 = vsyncpa [#allocation6], 1 }

</bundles_post_ra>
